<compile_context>
chip_gen: v5e
topology: v5e:2x2
jax: 0.10.0
libtpu: 0.0.40
codegen_flags: <defaults>
</compile_context>

<pallas_src>
import functools

import jax
import jax.numpy as jnp
from jax.experimental import pallas as pl
from jax.experimental.pallas import tpu as pltpu


def _round_up(x, m):
    return (x + m - 1) // m * m


# ------------------------------ Pallas kernel ------------------------------- #

def _conv_bn_act_kernel(x_ref, w_ref, b_ref, *rest, tap_specs, block_h, out_w,
                        apply_relu, has_residual):
    """Implicit-GEMM conv + folded-BN bias (+ residual) (+ ReLU) for one
    (image, cout-tile, row-tile) grid step.

      x_ref: (P, 1, Hph, Wph, Cin_pad)  stride-phase views of the padded input
      w_ref: (T, Cin_pad, TCout)        BN-folded conv weights, one slab per tap
      b_ref: (1, TCout)                 BN-folded bias (fp32)
      rest : [r_ref (1, TH, Wo_pad, TCout) fp32] + o_ref (1, TH, Wo_pad, TCout)
    """
    if has_residual:
        r_ref, o_ref = rest
    else:
        (o_ref,) = rest

    tcout = w_ref.shape[-1]
    row_base = pl.multiple_of(pl.program_id(2) * block_h, block_h)

    # Full K reduction (taps x Cin_pad) inside a single grid step -> fp32
    # accumulator; bias / residual / ReLU applied exactly once afterwards.
    acc = jnp.zeros((block_h * out_w, tcout), jnp.float32)
    for t, (phase, qy, qx) in enumerate(tap_specs):
        patch = x_ref[phase, 0,
                      pl.ds(row_base + qy, block_h),
                      pl.ds(qx, out_w), :]
        patch = patch.reshape(block_h * out_w, patch.shape[-1])
        acc = acc + jnp.dot(patch, w_ref[t],
                            preferred_element_type=jnp.float32)

    out = acc.reshape(block_h, out_w, tcout) + b_ref[...]
    if has_residual:
        out = out + r_ref[0].astype(jnp.float32)
    if apply_relu:
        out = jnp.maximum(out, 0.0)
    o_ref[0] = out.astype(o_ref.dtype)


# --------------------------- conv-stage wrapper ----------------------------- #

def _fold_bn(conv_params, cin_pad, cout_pad, compute_dtype, eps):
    """Fold eval-mode BN into the conv: -> (w[(kH*kW), Cin_pad, Cout_pad] bf16,
    b[1, Cout_pad] fp32).  Padded regions are zero."""
    w, gamma, beta, mean, var = conv_params
    cout, cin, kh, kw = w.shape
    scale = gamma / jnp.sqrt(var + eps)
    w_f = w * scale[:, None, None, None]                     # OIHW
    b_f = beta - mean * scale
    w_t = jnp.transpose(w_f, (2, 3, 1, 0)).reshape(kh * kw, cin, cout)
    w_p = jnp.pad(w_t, ((0, 0), (0, cin_pad - cin), (0, cout_pad - cout)))
    b_p = jnp.pad(b_f, (0, cout_pad - cout))
    return w_p.astype(compute_dtype), b_p.astype(jnp.float32).reshape(1, cout_pad)


def _build_phases(x_nhwc, ksize, stride, padding, dilation, ho_pad, wo_pad,
                  cin_pad, compute_dtype):
    """Pad x (spatial + channel) and split it into the stride phases that the
    kernel taps actually touch (total ~1x the activation size, vs 9x im2col).

    Returns (phases[P, N, Hph, Wph, Cin_pad], tap_specs) where
    tap_specs[t] = (phase_index, row_offset, col_offset) for tap t in (ky, kx)
    raster order, such that output(ho, wo) reads phases[p, n, ho+qy, wo+qx, :].
    """
    N, H, W, C = x_nhwc.shape
    assert C <= cin_pad
    s, d, k = stride, dilation, ksize
    q_max = ((k - 1) * d) // s
    hph, wph = ho_pad + q_max, wo_pad + q_max
    hp_total, wp_total = s * hph, s * wph

    used, tap_specs = [], []
    for ky in range(k):
        for kx in range(k):
            py, qy = (ky * d) % s, (ky * d) // s
            px, qx = (kx * d) % s, (kx * d) // s
            if (py, px) not in used:
                used.append((py, px))
            tap_specs.append((used.index((py, px)), qy, qx))

    pad_h = max(0, hp_total - padding - H)
    pad_w = max(0, wp_total - padding - W)
    xp = jnp.pad(x_nhwc, ((0, 0), (padding, pad_h), (padding, pad_w),
                          (0, cin_pad - C)))
    xp = xp[:, :hp_total, :wp_total, :].astype(compute_dtype)

    if s == 1:
        phases = xp[None]
    else:
        phases = jnp.stack([xp[:, py::s, px::s, :] for (py, px) in used], axis=0)
    return phases, tuple(tap_specs)


def conv2d_bn_act(x_nhwc, conv_params, *, ksize, stride, padding, dilation,
                  apply_relu, out_shape_padded, block_h, block_cout,
                  residual=None, out_dtype=jnp.float32,
                  compute_dtype=jnp.bfloat16, eps=1e-5):
    """One fused conv + folded-BN (+ residual) (+ ReLU) stage as a single
    pallas_call over grid (N, Cout_tiles, Ho_tiles)."""
    w = conv_params[0]
    cout, cin = w.shape[0], w.shape[1]
    N = x_nhwc.shape[0]
    ho_pad, wo_pad, cout_pad = out_shape_padded
    cin_pad = _round_up(cin, 128)
    assert cout <= cout_pad and ho_pad % block_h == 0
    assert cout_pad % block_cout == 0

    w_mat, b_vec = _fold_bn(conv_params, cin_pad, cout_pad, compute_dtype, eps)
    phases, tap_specs = _build_phases(x_nhwc, ksize, stride, padding, dilation,
                                      ho_pad, wo_pad, cin_pad, compute_dtype)
    n_phase, _, hph, wph, _ = phases.shape
    n_taps = ksize * ksize

    grid = (N, cout_pad // block_cout, ho_pad // block_h)

    in_specs = [
        pl.BlockSpec((n_phase, 1, hph, wph, cin_pad),
                     lambda n, j, i: (0, n, 0, 0, 0)),      # resident per image
        pl.BlockSpec((n_taps, cin_pad, block_cout),
                     lambda n, j, i: (0, 0, j)),            # resident per cout tile
        pl.BlockSpec((1, block_cout), lambda n, j, i: (0, j)),
    ]
    args = [phases, w_mat, b_vec]
    if residual is not None:
        in_specs.append(pl.BlockSpec((1, block_h, wo_pad, block_cout),
                                     lambda n, j, i: (n, i, 0, j)))
        args.append(residual)
    out_spec = pl.BlockSpec((1, block_h, wo_pad, block_cout),
                            lambda n, j, i: (n, i, 0, j))

    kern = functools.partial(
        _conv_bn_act_kernel, tap_specs=tap_specs, block_h=block_h,
        out_w=wo_pad, apply_relu=apply_relu, has_residual=residual is not None)

    out_bytes = N * ho_pad * wo_pad * cout_pad * jnp.dtype(out_dtype).itemsize
    bytes_accessed = (phases.size * phases.dtype.itemsize
                      + w_mat.size * w_mat.dtype.itemsize
                      + b_vec.size * 4 + out_bytes
                      + (residual.size * residual.dtype.itemsize
                         if residual is not None else 0))
    flops = 2 * N * ho_pad * wo_pad * n_taps * cin_pad * cout_pad

    return pl.pallas_call(
        kern,
        out_shape=jax.ShapeDtypeStruct((N, ho_pad, wo_pad, cout_pad), out_dtype),
        grid=grid,
        in_specs=in_specs,
        out_specs=out_spec,
        compiler_params=pltpu.CompilerParams(
            # Every grid step writes a distinct output tile (full K reduction is
            # in-step), so all axes are safe to shard across cores.
            dimension_semantics=("parallel", "parallel", "parallel"),
            vmem_limit_bytes=48 * 1024 * 1024),
        cost_estimate=pl.CostEstimate(flops=flops, transcendentals=0,
                                      bytes_accessed=bytes_accessed),
    )(*args)


# ------------------------------- BasicBlock --------------------------------- #

def basic_block_forward(x_nchw, params, stride=1, padding=1, dilation=1,
                        compute_dtype=jnp.bfloat16, eps=1e-5):
    """Pallas implementation of BasicBlock.forward (NCHW in, NCHW out)."""
    N, inplanes, H, W = x_nchw.shape
    planes = params["conv1"][0].shape[0]
    x = jnp.transpose(x_nchw, (0, 2, 3, 1)).astype(jnp.float32)   # NHWC fp32

    eff = dilation * 2 + 1                                        # 3x3 kernel
    ho = (H + 2 * padding - eff) // stride + 1
    wo = (W + 2 * padding - eff) // stride + 1

    # Shared padded output tiling for all three conv stages of the block.
    cpl_pad = _round_up(planes, 128)                 # lane-dense Cout
    wo_pad = _round_up(wo, 8)                        # sublane-aligned W
    block_h = max(1, min(ho, max(1, 512 // wo_pad)))  # GEMM M tile ~ 512 rows
    ho_pad = _round_up(ho, block_h)
    block_cout = 256 if cpl_pad % 256 == 0 else 128
    out_padded = (ho_pad, wo_pad, cpl_pad)

    # conv1: 3x3 + BN + ReLU (bf16 out -- only consumed as conv2's input).
    y1 = conv2d_bn_act(x, params["conv1"], ksize=3, stride=stride,
                       padding=padding, dilation=dilation, apply_relu=True,
                       out_shape_padded=out_padded, block_h=block_h,
                       block_cout=block_cout, out_dtype=compute_dtype,
                       compute_dtype=compute_dtype, eps=eps)

    # Residual branch (kept fp32 for the in-kernel add).
    downsample = (stride != 1) or (inplanes != planes)
    if downsample:
        res = conv2d_bn_act(x, params["downsample"], ksize=1, stride=stride,
                            padding=0, dilation=1, apply_relu=False,
                            out_shape_padded=out_padded, block_h=block_h,
                            block_cout=block_cout, out_dtype=jnp.float32,
                            compute_dtype=compute_dtype, eps=eps)
    else:
        assert (ho, wo) == (H, W)
        res = jnp.pad(x, ((0, 0), (0, ho_pad - H), (0, wo_pad - W),
                          (0, cpl_pad - inplanes)))

    # conv2: 3x3 s1 p1 + BN, with residual add + final ReLU fused in-kernel.
    # (y1 is sliced to the valid region so conv2's halo is exact zeros.)
    y2 = conv2d_bn_act(y1[:, :ho, :wo, :], params["conv2"], ksize=3, stride=1,
                       padding=1, dilation=1, apply_relu=True, residual=res,
                       out_shape_padded=out_padded, block_h=block_h,
                       block_cout=block_cout, out_dtype=jnp.float32,
                       compute_dtype=compute_dtype, eps=eps)

    out = y2[:, :ho, :wo, :planes]
    return jnp.transpose(out, (0, 3, 1, 2))                       # back to NCHW


# ------------------------------- references --------------------------------- #

def _ref_conv_bn(x_nchw, conv_params, stride, padding, dilation, relu, eps=1e-5):
    w, gamma, beta, mean, var = conv_params
    y = jax.lax.conv_general_dilated(
        x_nchw, w, window_strides=(stride, stride),
        padding=((padding, padding), (padding, padding)),
        rhs_dilation=(dilation, dilation),
        dimension_numbers=("NCHW", "OIHW", "NCHW"),
        precision=jax.lax.Precision.HIGHEST)
    inv = 1.0 / jnp.sqrt(var + eps)
    y = (y - mean[None, :, None, None]) * inv[None, :, None, None]
    y = y * gamma[None, :, None, None] + beta[None, :, None, None]
    if relu:
        y = jnp.maximum(y, 0.0)
    return y


def basic_block_reference(x_nchw, params, stride=1, padding=1, dilation=1):
    """Pure fp32 eval-mode reference (PyTorch semantics)."""
    inplanes = x_nchw.shape[1]
    planes = params["conv1"][0].shape[0]
    y = _ref_conv_bn(x_nchw, params["conv1"], stride, padding, dilation, True)
    y = _ref_conv_bn(y, params["conv2"], 1, 1, 1, False)
    if stride != 1 or inplanes != planes:
        res = _ref_conv_bn(x_nchw, params["downsample"], stride, 0, 1, False)
    else:
        res = x_nchw
    return jnp.maximum(y + res, 0.0)


def _matched_conv_bn(x_nhwc, conv_params, stride, padding, dilation, relu,
                     compute_dtype, eps=1e-5):
    """Reference conv mirroring the kernel's numerics: BN folded, then weights
    and activations rounded to bf16, fp32 accumulation."""
    w, gamma, beta, mean, var = conv_params
    scale = gamma / jnp.sqrt(var + eps)
    w_f = (w * scale[:, None, None, None]).astype(compute_dtype).astype(jnp.float32)
    b_f = (beta - mean * scale).astype(jnp.float32)
    xb = x_nhwc.astype(compute_dtype).astype(jnp.float32)
    w_hwio = jnp.transpose(w_f, (2, 3, 1, 0))
    y = jax.lax.conv_general_dilated(
        xb, w_hwio, window_strides=(stride, stride),
        padding=((padding, padding), (padding, padding)),
        rhs_dilation=(dilation, dilation),
        dimension_numbers=("NHWC", "HWIO", "NHWC"),
        precision=jax.lax.Precision.HIGHEST)
    y = y + b_f
    if relu:
        y = jnp.maximum(y, 0.0)
    return y


def basic_block_matched_reference(x_nchw, params, stride, padding, dilation,
                                  compute_dtype, eps=1e-5):
    x = jnp.transpose(x_nchw, (0, 2, 3, 1)).astype(jnp.float32)
    inplanes = x.shape[-1]
    planes = params["conv1"][0].shape[0]
    y1 = _matched_conv_bn(x, params["conv1"], stride, padding, dilation, True,
                          compute_dtype, eps)
    y1 = y1.astype(compute_dtype).astype(jnp.float32)   # conv1 kernel output is bf16
    y2 = _matched_conv_bn(y1, params["conv2"], 1, 1, 1, False, compute_dtype, eps)
    if stride != 1 or inplanes != planes:
        res = _matched_conv_bn(x, params["downsample"], stride, 0, 1, False,
                               compute_dtype, eps)
    else:
        res = x
    out = jnp.maximum(y2 + res, 0.0)
    return jnp.transpose(out, (0, 3, 1, 2))


# ----------------------------------- main ------------------------------------ #

def _init_conv_bn(key, cout, cin, k):
    k1, k2, k3, k4, k5 = jax.random.split(key, 5)
    w = jax.random.normal(k1, (cout, cin, k, k), jnp.float32) * 0.1
    gamma = 1.0 + 0.1 * jax.random.normal(k2, (cout,), jnp.float32)
    beta = 0.1 * jax.random.normal(k3, (cout,), jnp.float32)
    mean = 0.1 * jax.random.normal(k4, (cout,), jnp.float32)
    var = 1.0 + 0.1 * jnp.abs(jax.random.normal(k5, (cout,), jnp.float32))
    return (w, gamma, beta, mean, var)


def _run_case(key, n, inplanes, planes, hw, stride, padding, dilation):
    kx, k1, k2, k3 = jax.random.split(key, 4)
    x = jax.random.normal(kx, (n, inplanes, hw, hw), jnp.float32)
    params = {
        "conv1": _init_conv_bn(k1, planes, inplanes, 3),
        "conv2": _init_conv_bn(k2, planes, planes, 3),
    }
    if stride != 1 or inplanes != planes:
        params["downsample"] = _init_conv_bn(k3, planes, inplanes, 1)

    fwd = jax.jit(functools.partial(basic_block_forward, stride=stride,
                                    padding=padding, dilation=dilation))
    out = jax.block_until_ready(fwd(x, params))

    matched = basic_block_matched_reference(x, params, stride, padding, dilation,
                                            jnp.bfloat16)
    ref32 = basic_block_reference(x, params, stride=stride, padding=padding,
                                  dilation=dilation)
    assert out.shape == ref32.shape, (out.shape, ref32.shape)
    # Tight check vs a reference with identical (bf16-in / fp32-acc) numerics.
    err_m = float(jnp.max(jnp.abs(out - matched)))
    assert jnp.allclose(out, matched, rtol=1e-2, atol=1e-2), err_m
    # Loose sanity check vs the true fp32 eval-mode reference (bf16 noise only).
    err_f = float(jnp.max(jnp.abs(out - ref32)))
    assert jnp.allclose(out, ref32, rtol=0.15, atol=0.15), err_f


if __name__ == "__main__":
    key = jax.random.PRNGKey(0)
    k_a, k_b, k_c = jax.random.split(key, 3)
    # Downsample path: stride 2, channel change.
    _run_case(k_a, n=2, inplanes=4, planes=8, hw=16, stride=2, padding=1,
              dilation=1)
    # Identity-residual path: stride 1, same channels.
    _run_case(k_b, n=2, inplanes=8, planes=8, hw=16, stride=1, padding=1,
              dilation=1)
    # Dilated path: stride 1, dilation 2, channel change (1x1 downsample).
    _run_case(k_c, n=2, inplanes=4, planes=8, hw=16, stride=1, padding=2,
              dilation=2)
    print("KERNEL_OK")
</pallas_src>

<mosaic_0001>
module attributes {stable_mosaic.version = 11 : i64} {
  func.func @_conv_bn_act_kernel(%arg0: i32, %arg1: i32, %arg2: i32, %arg3: memref<4x1x9x9x128xbf16, #tpu.memory_space<vmem>>, %arg4: memref<9x128x128xbf16, #tpu.memory_space<vmem>>, %arg5: memref<1x128xf32, #tpu.memory_space<vmem>>, %arg6: memref<1x8x8x128xbf16, #tpu.memory_space<vmem>>) attributes {dimension_semantics = [#tpu.dimension_semantics<parallel>, #tpu.dimension_semantics<parallel>, #tpu.dimension_semantics<parallel>], iteration_bounds = array<i64: 2, 1, 1>, scalar_prefetch = 0 : i64, scratch_operands = 0 : i64, tpu.core_type = #tpu.core_type<tc>, window_params = [{transform_indices = @transform_0, window_bounds = array<i64: 4, 1, 9, 9, 128>}, {transform_indices = @transform_1, window_bounds = array<i64: 9, 128, 128>}, {transform_indices = @transform_2, window_bounds = array<i64: 1, 128>}, {transform_indices = @transform_3, window_bounds = array<i64: 1, 8, 8, 128>}]} {
    %c8_i32 = arith.constant 8 : i32
    %0 = arith.muli %arg2, %c8_i32 : i32
    %1 = tpu.assume_multiple %0, 8 : i32
    %cst = arith.constant 0.000000e+00 : f32
    %2 = vector.broadcast %cst : f32 to vector<64x128xf32>
    %c0_i32 = arith.constant 0 : i32
    %3 = arith.addi %1, %c0_i32 : i32
    %c0 = arith.constant 0 : index
    %c0_0 = arith.constant 0 : index
    %4 = arith.index_cast %3 : i32 to index
    %c0_1 = arith.constant 0 : index
    %c0_2 = arith.constant 0 : index
    %5 = vector.load %arg3[%c0, %c0_0, %4, %c0_1, %c0_2] : memref<4x1x9x9x128xbf16, #tpu.memory_space<vmem>>, vector<1x1x8x8x128xbf16>
    %6 = vector.shape_cast %5 : vector<1x1x8x8x128xbf16> to vector<8x8x128xbf16>
    %7 = vector.shape_cast %6 : vector<8x8x128xbf16> to vector<64x128xbf16>
    %c0_3 = arith.constant 0 : index
    %c0_4 = arith.constant 0 : index
    %c0_5 = arith.constant 0 : index
    %8 = vector.load %arg4[%c0_3, %c0_4, %c0_5] : memref<9x128x128xbf16, #tpu.memory_space<vmem>>, vector<1x128x128xbf16>
    %9 = vector.shape_cast %8 : vector<1x128x128xbf16> to vector<128x128xbf16>
    %cst_6 = arith.constant dense<0.000000e+00> : vector<64x128xf32>
    %10 = tpu.matmul %7, %9, %cst_6 {dimension_numbers = #tpu.dot_dimension_numbers<[1], [0], [0], [1], [0, 0, 1, 1], [], []>} : vector<64x128xbf16>, vector<128x128xbf16>, vector<64x128xf32> -> vector<64x128xf32>
    %11 = arith.addf %2, %10 : vector<64x128xf32>
    %c0_i32_7 = arith.constant 0 : i32
    %12 = arith.addi %1, %c0_i32_7 : i32
    %c1 = arith.constant 1 : index
    %c0_8 = arith.constant 0 : index
    %13 = arith.index_cast %12 : i32 to index
    %c0_9 = arith.constant 0 : index
    %c0_10 = arith.constant 0 : index
    %14 = vector.load %arg3[%c1, %c0_8, %13, %c0_9, %c0_10] : memref<4x1x9x9x128xbf16, #tpu.memory_space<vmem>>, vector<1x1x8x8x128xbf16>
    %15 = vector.shape_cast %14 : vector<1x1x8x8x128xbf16> to vector<8x8x128xbf16>
    %16 = vector.shape_cast %15 : vector<8x8x128xbf16> to vector<64x128xbf16>
    %c1_11 = arith.constant 1 : index
    %c0_12 = arith.constant 0 : index
    %c0_13 = arith.constant 0 : index
    %17 = vector.load %arg4[%c1_11, %c0_12, %c0_13] : memref<9x128x128xbf16, #tpu.memory_space<vmem>>, vector<1x128x128xbf16>
    %18 = vector.shape_cast %17 : vector<1x128x128xbf16> to vector<128x128xbf16>
    %cst_14 = arith.constant dense<0.000000e+00> : vector<64x128xf32>
    %19 = tpu.matmul %16, %18, %cst_14 {dimension_numbers = #tpu.dot_dimension_numbers<[1], [0], [0], [1], [0, 0, 1, 1], [], []>} : vector<64x128xbf16>, vector<128x128xbf16>, vector<64x128xf32> -> vector<64x128xf32>
    %20 = arith.addf %11, %19 : vector<64x128xf32>
    %c0_i32_15 = arith.constant 0 : i32
    %21 = arith.addi %1, %c0_i32_15 : i32
    %c0_16 = arith.constant 0 : index
    %c0_17 = arith.constant 0 : index
    %22 = arith.index_cast %21 : i32 to index
    %c1_18 = arith.constant 1 : index
    %c0_19 = arith.constant 0 : index
    %23 = vector.load %arg3[%c0_16, %c0_17, %22, %c1_18, %c0_19] : memref<4x1x9x9x128xbf16, #tpu.memory_space<vmem>>, vector<1x1x8x8x128xbf16>
    %24 = vector.shape_cast %23 : vector<1x1x8x8x128xbf16> to vector<8x8x128xbf16>
    %25 = vector.shape_cast %24 : vector<8x8x128xbf16> to vector<64x128xbf16>
    %c2 = arith.constant 2 : index
    %c0_20 = arith.constant 0 : index
    %c0_21 = arith.constant 0 : index
    %26 = vector.load %arg4[%c2, %c0_20, %c0_21] : memref<9x128x128xbf16, #tpu.memory_space<vmem>>, vector<1x128x128xbf16>
    %27 = vector.shape_cast %26 : vector<1x128x128xbf16> to vector<128x128xbf16>
    %cst_22 = arith.constant dense<0.000000e+00> : vector<64x128xf32>
    %28 = tpu.matmul %25, %27, %cst_22 {dimension_numbers = #tpu.dot_dimension_numbers<[1], [0], [0], [1], [0, 0, 1, 1], [], []>} : vector<64x128xbf16>, vector<128x128xbf16>, vector<64x128xf32> -> vector<64x128xf32>
    %29 = arith.addf %20, %28 : vector<64x128xf32>
    %c0_i32_23 = arith.constant 0 : i32
    %30 = arith.addi %1, %c0_i32_23 : i32
    %c2_24 = arith.constant 2 : index
    %c0_25 = arith.constant 0 : index
    %31 = arith.index_cast %30 : i32 to index
    %c0_26 = arith.constant 0 : index
    %c0_27 = arith.constant 0 : index
    %32 = vector.load %arg3[%c2_24, %c0_25, %31, %c0_26, %c0_27] : memref<4x1x9x9x128xbf16, #tpu.memory_space<vmem>>, vector<1x1x8x8x128xbf16>
    %33 = vector.shape_cast %32 : vector<1x1x8x8x128xbf16> to vector<8x8x128xbf16>
    %34 = vector.shape_cast %33 : vector<8x8x128xbf16> to vector<64x128xbf16>
    %c3 = arith.constant 3 : index
    %c0_28 = arith.constant 0 : index
    %c0_29 = arith.constant 0 : index
    %35 = vector.load %arg4[%c3, %c0_28, %c0_29] : memref<9x128x128xbf16, #tpu.memory_space<vmem>>, vector<1x128x128xbf16>
    %36 = vector.shape_cast %35 : vector<1x128x128xbf16> to vector<128x128xbf16>
    %cst_30 = arith.constant dense<0.000000e+00> : vector<64x128xf32>
    %37 = tpu.matmul %34, %36, %cst_30 {dimension_numbers = #tpu.dot_dimension_numbers<[1], [0], [0], [1], [0, 0, 1, 1], [], []>} : vector<64x128xbf16>, vector<128x128xbf16>, vector<64x128xf32> -> vector<64x128xf32>
    %38 = arith.addf %29, %37 : vector<64x128xf32>
    %c0_i32_31 = arith.constant 0 : i32
    %39 = arith.addi %1, %c0_i32_31 : i32
    %c3_32 = arith.constant 3 : index
    %c0_33 = arith.constant 0 : index
    %40 = arith.index_cast %39 : i32 to index
    %c0_34 = arith.constant 0 : index
    %c0_35 = arith.constant 0 : index
    %41 = vector.load %arg3[%c3_32, %c0_33, %40, %c0_34, %c0_35] : memref<4x1x9x9x128xbf16, #tpu.memory_space<vmem>>, vector<1x1x8x8x128xbf16>
    %42 = vector.shape_cast %41 : vector<1x1x8x8x128xbf16> to vector<8x8x128xbf16>
    %43 = vector.shape_cast %42 : vector<8x8x128xbf16> to vector<64x128xbf16>
    %c4 = arith.constant 4 : index
    %c0_36 = arith.constant 0 : index
    %c0_37 = arith.constant 0 : index
    %44 = vector.load %arg4[%c4, %c0_36, %c0_37] : memref<9x128x128xbf16, #tpu.memory_space<vmem>>, vector<1x128x128xbf16>
    %45 = vector.shape_cast %44 : vector<1x128x128xbf16> to vector<128x128xbf16>
    %cst_38 = arith.constant dense<0.000000e+00> : vector<64x128xf32>
    %46 = tpu.matmul %43, %45, %cst_38 {dimension_numbers = #tpu.dot_dimension_numbers<[1], [0], [0], [1], [0, 0, 1, 1], [], []>} : vector<64x128xbf16>, vector<128x128xbf16>, vector<64x128xf32> -> vector<64x128xf32>
    %47 = arith.addf %38, %46 : vector<64x128xf32>
    %c0_i32_39 = arith.constant 0 : i32
    %48 = arith.addi %1, %c0_i32_39 : i32
    %c2_40 = arith.constant 2 : index
    %c0_41 = arith.constant 0 : index
    %49 = arith.index_cast %48 : i32 to index
    %c1_42 = arith.constant 1 : index
    %c0_43 = arith.constant 0 : index
    %50 = vector.load %arg3[%c2_40, %c0_41, %49, %c1_42, %c0_43] : memref<4x1x9x9x128xbf16, #tpu.memory_space<vmem>>, vector<1x1x8x8x128xbf16>
    %51 = vector.shape_cast %50 : vector<1x1x8x8x128xbf16> to vector<8x8x128xbf16>
    %52 = vector.shape_cast %51 : vector<8x8x128xbf16> to vector<64x128xbf16>
    %c5 = arith.constant 5 : index
    %c0_44 = arith.constant 0 : index
    %c0_45 = arith.constant 0 : index
    %53 = vector.load %arg4[%c5, %c0_44, %c0_45] : memref<9x128x128xbf16, #tpu.memory_space<vmem>>, vector<1x128x128xbf16>
    %54 = vector.shape_cast %53 : vector<1x128x128xbf16> to vector<128x128xbf16>
    %cst_46 = arith.constant dense<0.000000e+00> : vector<64x128xf32>
    %55 = tpu.matmul %52, %54, %cst_46 {dimension_numbers = #tpu.dot_dimension_numbers<[1], [0], [0], [1], [0, 0, 1, 1], [], []>} : vector<64x128xbf16>, vector<128x128xbf16>, vector<64x128xf32> -> vector<64x128xf32>
    %56 = arith.addf %47, %55 : vector<64x128xf32>
    %c1_i32 = arith.constant 1 : i32
    %57 = arith.addi %1, %c1_i32 : i32
    %c0_47 = arith.constant 0 : index
    %c0_48 = arith.constant 0 : index
    %58 = arith.index_cast %57 : i32 to index
    %c0_49 = arith.constant 0 : index
    %c0_50 = arith.constant 0 : index
    %59 = vector.load %arg3[%c0_47, %c0_48, %58, %c0_49, %c0_50] : memref<4x1x9x9x128xbf16, #tpu.memory_space<vmem>>, vector<1x1x8x8x128xbf16>
    %60 = vector.shape_cast %59 : vector<1x1x8x8x128xbf16> to vector<8x8x128xbf16>
    %61 = vector.shape_cast %60 : vector<8x8x128xbf16> to vector<64x128xbf16>
    %c6 = arith.constant 6 : index
    %c0_51 = arith.constant 0 : index
    %c0_52 = arith.constant 0 : index
    %62 = vector.load %arg4[%c6, %c0_51, %c0_52] : memref<9x128x128xbf16, #tpu.memory_space<vmem>>, vector<1x128x128xbf16>
    %63 = vector.shape_cast %62 : vector<1x128x128xbf16> to vector<128x128xbf16>
    %cst_53 = arith.constant dense<0.000000e+00> : vector<64x128xf32>
    %64 = tpu.matmul %61, %63, %cst_53 {dimension_numbers = #tpu.dot_dimension_numbers<[1], [0], [0], [1], [0, 0, 1, 1], [], []>} : vector<64x128xbf16>, vector<128x128xbf16>, vector<64x128xf32> -> vector<64x128xf32>
    %65 = arith.addf %56, %64 : vector<64x128xf32>
    %c1_i32_54 = arith.constant 1 : i32
    %66 = arith.addi %1, %c1_i32_54 : i32
    %c1_55 = arith.constant 1 : index
    %c0_56 = arith.constant 0 : index
    %67 = arith.index_cast %66 : i32 to index
    %c0_57 = arith.constant 0 : index
    %c0_58 = arith.constant 0 : index
    %68 = vector.load %arg3[%c1_55, %c0_56, %67, %c0_57, %c0_58] : memref<4x1x9x9x128xbf16, #tpu.memory_space<vmem>>, vector<1x1x8x8x128xbf16>
    %69 = vector.shape_cast %68 : vector<1x1x8x8x128xbf16> to vector<8x8x128xbf16>
    %70 = vector.shape_cast %69 : vector<8x8x128xbf16> to vector<64x128xbf16>
    %c7 = arith.constant 7 : index
    %c0_59 = arith.constant 0 : index
    %c0_60 = arith.constant 0 : index
    %71 = vector.load %arg4[%c7, %c0_59, %c0_60] : memref<9x128x128xbf16, #tpu.memory_space<vmem>>, vector<1x128x128xbf16>
    %72 = vector.shape_cast %71 : vector<1x128x128xbf16> to vector<128x128xbf16>
    %cst_61 = arith.constant dense<0.000000e+00> : vector<64x128xf32>
    %73 = tpu.matmul %70, %72, %cst_61 {dimension_numbers = #tpu.dot_dimension_numbers<[1], [0], [0], [1], [0, 0, 1, 1], [], []>} : vector<64x128xbf16>, vector<128x128xbf16>, vector<64x128xf32> -> vector<64x128xf32>
    %74 = arith.addf %65, %73 : vector<64x128xf32>
    %c1_i32_62 = arith.constant 1 : i32
    %75 = arith.addi %1, %c1_i32_62 : i32
    %c0_63 = arith.constant 0 : index
    %c0_64 = arith.constant 0 : index
    %76 = arith.index_cast %75 : i32 to index
    %c1_65 = arith.constant 1 : index
    %c0_66 = arith.constant 0 : index
    %77 = vector.load %arg3[%c0_63, %c0_64, %76, %c1_65, %c0_66] : memref<4x1x9x9x128xbf16, #tpu.memory_space<vmem>>, vector<1x1x8x8x128xbf16>
    %78 = vector.shape_cast %77 : vector<1x1x8x8x128xbf16> to vector<8x8x128xbf16>
    %79 = vector.shape_cast %78 : vector<8x8x128xbf16> to vector<64x128xbf16>
    %c8 = arith.constant 8 : index
    %c0_67 = arith.constant 0 : index
    %c0_68 = arith.constant 0 : index
    %80 = vector.load %arg4[%c8, %c0_67, %c0_68] : memref<9x128x128xbf16, #tpu.memory_space<vmem>>, vector<1x128x128xbf16>
    %81 = vector.shape_cast %80 : vector<1x128x128xbf16> to vector<128x128xbf16>
    %cst_69 = arith.constant dense<0.000000e+00> : vector<64x128xf32>
    %82 = tpu.matmul %79, %81, %cst_69 {dimension_numbers = #tpu.dot_dimension_numbers<[1], [0], [0], [1], [0, 0, 1, 1], [], []>} : vector<64x128xbf16>, vector<128x128xbf16>, vector<64x128xf32> -> vector<64x128xf32>
    %83 = arith.addf %74, %82 : vector<64x128xf32>
    %84 = vector.shape_cast %83 : vector<64x128xf32> to vector<8x8x128xf32>
    %c0_70 = arith.constant 0 : index
    %c0_71 = arith.constant 0 : index
    %85 = vector.load %arg5[%c0_70, %c0_71] : memref<1x128xf32, #tpu.memory_space<vmem>>, vector<1x128xf32>
    %86 = vector.shape_cast %85 : vector<1x128xf32> to vector<1x1x128xf32>
    %87 = vector.broadcast %86 : vector<1x1x128xf32> to vector<8x8x128xf32>
    %88 = arith.addf %84, %87 : vector<8x8x128xf32>
    %cst_72 = arith.constant 0.000000e+00 : f32
    %89 = vector.broadcast %cst_72 : f32 to vector<8x8x128xf32>
    %90 = arith.maximumf %88, %89 : vector<8x8x128xf32>
    %91 = arith.truncf %90 : vector<8x8x128xf32> to vector<8x8x128xbf16>
    %c0_73 = arith.constant 0 : index
    %c0_74 = arith.constant 0 : index
    %c0_75 = arith.constant 0 : index
    %c0_76 = arith.constant 0 : index
    %92 = vector.load %arg6[%c0_73, %c0_74, %c0_75, %c0_76] : memref<1x8x8x128xbf16, #tpu.memory_space<vmem>>, vector<1x8x8x128xbf16>
    %93 = vector.shape_cast %92 : vector<1x8x8x128xbf16> to vector<8x8x128xbf16>
    %94 = vector.shape_cast %91 : vector<8x8x128xbf16> to vector<1x8x8x128xbf16>
    tpu.vector_store %arg6[%c0_73, %c0_74, %c0_75, %c0_76], %94 {strides = array<i32>} : memref<1x8x8x128xbf16, #tpu.memory_space<vmem>>, vector<1x8x8x128xbf16>,
    return
  }
  func.func @transform_0(%arg0: i32, %arg1: i32, %arg2: i32) -> (i32, i32, i32, i32, i32) {
    %c0_i32 = arith.constant 0 : i32
    %c0_i32_0 = arith.constant 0 : i32
    %c0_i32_1 = arith.constant 0 : i32
    %c0_i32_2 = arith.constant 0 : i32
    %c0_i32_3 = arith.constant 0 : i32
    return %c0_i32, %arg0, %c0_i32_0, %c0_i32_1, %c0_i32_2 : i32, i32, i32, i32, i32
  }
  func.func @transform_1(%arg0: i32, %arg1: i32, %arg2: i32) -> (i32, i32, i32) {
    %c0_i32 = arith.constant 0 : i32
    %c0_i32_0 = arith.constant 0 : i32
    %c0_i32_1 = arith.constant 0 : i32
    return %c0_i32, %c0_i32_0, %arg1 : i32, i32, i32
  }
  func.func @transform_2(%arg0: i32, %arg1: i32, %arg2: i32) -> (i32, i32) {
    %c0_i32 = arith.constant 0 : i32
    %c0_i32_0 = arith.constant 0 : i32
    return %c0_i32, %arg1 : i32, i32
  }
  func.func @transform_3(%arg0: i32, %arg1: i32, %arg2: i32) -> (i32, i32, i32, i32) {
    %c0_i32 = arith.constant 0 : i32
    %c0_i32_0 = arith.constant 0 : i32
    return %arg0, %arg2, %c0_i32, %arg1 : i32, i32, i32, i32
  }
}

module attributes {stable_mosaic.version = 11 : i64} {
  func.func @_conv_bn_act_kernel(%arg0: i32, %arg1: i32, %arg2: i32, %arg3: memref<1x1x8x8x128xbf16, #tpu.memory_space<vmem>>, %arg4: memref<1x128x128xbf16, #tpu.memory_space<vmem>>, %arg5: memref<1x128xf32, #tpu.memory_space<vmem>>, %arg6: memref<1x8x8x128xf32, #tpu.memory_space<vmem>>) attributes {dimension_semantics = [#tpu.dimension_semantics<parallel>, #tpu.dimension_semantics<parallel>, #tpu.dimension_semantics<parallel>], iteration_bounds = array<i64: 2, 1, 1>, scalar_prefetch = 0 : i64, scratch_operands = 0 : i64, tpu.core_type = #tpu.core_type<tc>, window_params = [{transform_indices = @transform_0, window_bounds = array<i64: 1, 1, 8, 8, 128>}, {transform_indices = @transform_1, window_bounds = array<i64: 1, 128, 128>}, {transform_indices = @transform_2, window_bounds = array<i64: 1, 128>}, {transform_indices = @transform_3, window_bounds = array<i64: 1, 8, 8, 128>}]} {
    %c8_i32 = arith.constant 8 : i32
    %0 = arith.muli %arg2, %c8_i32 : i32
    %1 = tpu.assume_multiple %0, 8 : i32
    %cst = arith.constant 0.000000e+00 : f32
    %2 = vector.broadcast %cst : f32 to vector<64x128xf32>
    %c0_i32 = arith.constant 0 : i32
    %3 = arith.addi %1, %c0_i32 : i32
    %c0 = arith.constant 0 : index
    %c0_0 = arith.constant 0 : index
    %4 = arith.index_cast %3 : i32 to index
    %c0_1 = arith.constant 0 : index
    %c0_2 = arith.constant 0 : index
    %5 = vector.load %arg3[%c0, %c0_0, %4, %c0_1, %c0_2] : memref<1x1x8x8x128xbf16, #tpu.memory_space<vmem>>, vector<1x1x8x8x128xbf16>
    %6 = vector.shape_cast %5 : vector<1x1x8x8x128xbf16> to vector<8x8x128xbf16>
    %7 = vector.shape_cast %6 : vector<8x8x128xbf16> to vector<64x128xbf16>
    %c0_3 = arith.constant 0 : index
    %c0_4 = arith.constant 0 : index
    %c0_5 = arith.constant 0 : index
    %8 = vector.load %arg4[%c0_3, %c0_4, %c0_5] : memref<1x128x128xbf16, #tpu.memory_space<vmem>>, vector<1x128x128xbf16>
    %9 = vector.shape_cast %8 : vector<1x128x128xbf16> to vector<128x128xbf16>
    %cst_6 = arith.constant dense<0.000000e+00> : vector<64x128xf32>
    %10 = tpu.matmul %7, %9, %cst_6 {dimension_numbers = #tpu.dot_dimension_numbers<[1], [0], [0], [1], [0, 0, 1, 1], [], []>} : vector<64x128xbf16>, vector<128x128xbf16>, vector<64x128xf32> -> vector<64x128xf32>
    %11 = arith.addf %2, %10 : vector<64x128xf32>
    %12 = vector.shape_cast %11 : vector<64x128xf32> to vector<8x8x128xf32>
    %c0_7 = arith.constant 0 : index
    %c0_8 = arith.constant 0 : index
    %13 = vector.load %arg5[%c0_7, %c0_8] : memref<1x128xf32, #tpu.memory_space<vmem>>, vector<1x128xf32>
    %14 = vector.shape_cast %13 : vector<1x128xf32> to vector<1x1x128xf32>
    %15 = vector.broadcast %14 : vector<1x1x128xf32> to vector<8x8x128xf32>
    %16 = arith.addf %12, %15 : vector<8x8x128xf32>
    %c0_9 = arith.constant 0 : index
    %c0_10 = arith.constant 0 : index
    %c0_11 = arith.constant 0 : index
    %c0_12 = arith.constant 0 : index
    %17 = vector.load %arg6[%c0_9, %c0_10, %c0_11, %c0_12] : memref<1x8x8x128xf32, #tpu.memory_space<vmem>>, vector<1x8x8x128xf32>
    %18 = vector.shape_cast %17 : vector<1x8x8x128xf32> to vector<8x8x128xf32>
    %19 = vector.shape_cast %16 : vector<8x8x128xf32> to vector<1x8x8x128xf32>
    tpu.vector_store %arg6[%c0_9, %c0_10, %c0_11, %c0_12], %19 {strides = array<i32>} : memref<1x8x8x128xf32, #tpu.memory_space<vmem>>, vector<1x8x8x128xf32>,
    return
  }
  func.func @transform_0(%arg0: i32, %arg1: i32, %arg2: i32) -> (i32, i32, i32, i32, i32) {
    %c0_i32 = arith.constant 0 : i32
    %c0_i32_0 = arith.constant 0 : i32
    %c0_i32_1 = arith.constant 0 : i32
    %c0_i32_2 = arith.constant 0 : i32
    %c0_i32_3 = arith.constant 0 : i32
    return %c0_i32, %arg0, %c0_i32_0, %c0_i32_1, %c0_i32_2 : i32, i32, i32, i32, i32
  }
  func.func @transform_1(%arg0: i32, %arg1: i32, %arg2: i32) -> (i32, i32, i32) {
    %c0_i32 = arith.constant 0 : i32
    %c0_i32_0 = arith.constant 0 : i32
    %c0_i32_1 = arith.constant 0 : i32
    return %c0_i32, %c0_i32_0, %arg1 : i32, i32, i32
  }
  func.func @transform_2(%arg0: i32, %arg1: i32, %arg2: i32) -> (i32, i32) {
    %c0_i32 = arith.constant 0 : i32
    %c0_i32_0 = arith.constant 0 : i32
    return %c0_i32, %arg1 : i32, i32
  }
  func.func @transform_3(%arg0: i32, %arg1: i32, %arg2: i32) -> (i32, i32, i32, i32) {
    %c0_i32 = arith.constant 0 : i32
    %c0_i32_0 = arith.constant 0 : i32
    return %arg0, %arg2, %c0_i32, %arg1 : i32, i32, i32, i32
  }
}

module attributes {stable_mosaic.version = 11 : i64} {
  func.func @_conv_bn_act_kernel(%arg0: i32, %arg1: i32, %arg2: i32, %arg3: memref<1x1x10x10x128xbf16, #tpu.memory_space<vmem>>, %arg4: memref<9x128x128xbf16, #tpu.memory_space<vmem>>, %arg5: memref<1x128xf32, #tpu.memory_space<vmem>>, %arg6: memref<1x8x8x128xf32, #tpu.memory_space<vmem>>, %arg7: memref<1x8x8x128xf32, #tpu.memory_space<vmem>>) attributes {dimension_semantics = [#tpu.dimension_semantics<parallel>, #tpu.dimension_semantics<parallel>, #tpu.dimension_semantics<parallel>], iteration_bounds = array<i64: 2, 1, 1>, scalar_prefetch = 0 : i64, scratch_operands = 0 : i64, tpu.core_type = #tpu.core_type<tc>, window_params = [{transform_indices = @transform_0, window_bounds = array<i64: 1, 1, 10, 10, 128>}, {transform_indices = @transform_1, window_bounds = array<i64: 9, 128, 128>}, {transform_indices = @transform_2, window_bounds = array<i64: 1, 128>}, {transform_indices = @transform_3, window_bounds = array<i64: 1, 8, 8, 128>}, {transform_indices = @transform_4, window_bounds = array<i64: 1, 8, 8, 128>}]} {
    %c8_i32 = arith.constant 8 : i32
    %0 = arith.muli %arg2, %c8_i32 : i32
    %1 = tpu.assume_multiple %0, 8 : i32
    %cst = arith.constant 0.000000e+00 : f32
    %2 = vector.broadcast %cst : f32 to vector<64x128xf32>
    %c0_i32 = arith.constant 0 : i32
    %3 = arith.addi %1, %c0_i32 : i32
    %c0 = arith.constant 0 : index
    %c0_0 = arith.constant 0 : index
    %4 = arith.index_cast %3 : i32 to index
    %c0_1 = arith.constant 0 : index
    %c0_2 = arith.constant 0 : index
    %5 = vector.load %arg3[%c0, %c0_0, %4, %c0_1, %c0_2] : memref<1x1x10x10x128xbf16, #tpu.memory_space<vmem>>, vector<1x1x8x8x128xbf16>
    %6 = vector.shape_cast %5 : vector<1x1x8x8x128xbf16> to vector<8x8x128xbf16>
    %7 = vector.shape_cast %6 : vector<8x8x128xbf16> to vector<64x128xbf16>
    %c0_3 = arith.constant 0 : index
    %c0_4 = arith.constant 0 : index
    %c0_5 = arith.constant 0 : index
    %8 = vector.load %arg4[%c0_3, %c0_4, %c0_5] : memref<9x128x128xbf16, #tpu.memory_space<vmem>>, vector<1x128x128xbf16>
    %9 = vector.shape_cast %8 : vector<1x128x128xbf16> to vector<128x128xbf16>
    %cst_6 = arith.constant dense<0.000000e+00> : vector<64x128xf32>
    %10 = tpu.matmul %7, %9, %cst_6 {dimension_numbers = #tpu.dot_dimension_numbers<[1], [0], [0], [1], [0, 0, 1, 1], [], []>} : vector<64x128xbf16>, vector<128x128xbf16>, vector<64x128xf32> -> vector<64x128xf32>
    %11 = arith.addf %2, %10 : vector<64x128xf32>
    %c0_i32_7 = arith.constant 0 : i32
    %12 = arith.addi %1, %c0_i32_7 : i32
    %c0_8 = arith.constant 0 : index
    %c0_9 = arith.constant 0 : index
    %13 = arith.index_cast %12 : i32 to index
    %c1 = arith.constant 1 : index
    %c0_10 = arith.constant 0 : index
    %14 = vector.load %arg3[%c0_8, %c0_9, %13, %c1, %c0_10] : memref<1x1x10x10x128xbf16, #tpu.memory_space<vmem>>, vector<1x1x8x8x128xbf16>
    %15 = vector.shape_cast %14 : vector<1x1x8x8x128xbf16> to vector<8x8x128xbf16>
    %16 = vector.shape_cast %15 : vector<8x8x128xbf16> to vector<64x128xbf16>
    %c1_11 = arith.constant 1 : index
    %c0_12 = arith.constant 0 : index
    %c0_13 = arith.constant 0 : index
    %17 = vector.load %arg4[%c1_11, %c0_12, %c0_13] : memref<9x128x128xbf16, #tpu.memory_space<vmem>>, vector<1x128x128xbf16>
    %18 = vector.shape_cast %17 : vector<1x128x128xbf16> to vector<128x128xbf16>
    %cst_14 = arith.constant dense<0.000000e+00> : vector<64x128xf32>
    %19 = tpu.matmul %16, %18, %cst_14 {dimension_numbers = #tpu.dot_dimension_numbers<[1], [0], [0], [1], [0, 0, 1, 1], [], []>} : vector<64x128xbf16>, vector<128x128xbf16>, vector<64x128xf32> -> vector<64x128xf32>
    %20 = arith.addf %11, %19 : vector<64x128xf32>
    %c0_i32_15 = arith.constant 0 : i32
    %21 = arith.addi %1, %c0_i32_15 : i32
    %c0_16 = arith.constant 0 : index
    %c0_17 = arith.constant 0 : index
    %22 = arith.index_cast %21 : i32 to index
    %c2 = arith.constant 2 : index
    %c0_18 = arith.constant 0 : index
    %23 = vector.load %arg3[%c0_16, %c0_17, %22, %c2, %c0_18] : memref<1x1x10x10x128xbf16, #tpu.memory_space<vmem>>, vector<1x1x8x8x128xbf16>
    %24 = vector.shape_cast %23 : vector<1x1x8x8x128xbf16> to vector<8x8x128xbf16>
    %25 = vector.shape_cast %24 : vector<8x8x128xbf16> to vector<64x128xbf16>
    %c2_19 = arith.constant 2 : index
    %c0_20 = arith.constant 0 : index
    %c0_21 = arith.constant 0 : index
    %26 = vector.load %arg4[%c2_19, %c0_20, %c0_21] : memref<9x128x128xbf16, #tpu.memory_space<vmem>>, vector<1x128x128xbf16>
    %27 = vector.shape_cast %26 : vector<1x128x128xbf16> to vector<128x128xbf16>
    %cst_22 = arith.constant dense<0.000000e+00> : vector<64x128xf32>
    %28 = tpu.matmul %25, %27, %cst_22 {dimension_numbers = #tpu.dot_dimension_numbers<[1], [0], [0], [1], [0, 0, 1, 1], [], []>} : vector<64x128xbf16>, vector<128x128xbf16>, vector<64x128xf32> -> vector<64x128xf32>
    %29 = arith.addf %20, %28 : vector<64x128xf32>
    %c1_i32 = arith.constant 1 : i32
    %30 = arith.addi %1, %c1_i32 : i32
    %c0_23 = arith.constant 0 : index
    %c0_24 = arith.constant 0 : index
    %31 = arith.index_cast %30 : i32 to index
    %c0_25 = arith.constant 0 : index
    %c0_26 = arith.constant 0 : index
    %32 = vector.load %arg3[%c0_23, %c0_24, %31, %c0_25, %c0_26] : memref<1x1x10x10x128xbf16, #tpu.memory_space<vmem>>, vector<1x1x8x8x128xbf16>
    %33 = vector.shape_cast %32 : vector<1x1x8x8x128xbf16> to vector<8x8x128xbf16>
    %34 = vector.shape_cast %33 : vector<8x8x128xbf16> to vector<64x128xbf16>
    %c3 = arith.constant 3 : index
    %c0_27 = arith.constant 0 : index
    %c0_28 = arith.constant 0 : index
    %35 = vector.load %arg4[%c3, %c0_27, %c0_28] : memref<9x128x128xbf16, #tpu.memory_space<vmem>>, vector<1x128x128xbf16>
    %36 = vector.shape_cast %35 : vector<1x128x128xbf16> to vector<128x128xbf16>
    %cst_29 = arith.constant dense<0.000000e+00> : vector<64x128xf32>
    %37 = tpu.matmul %34, %36, %cst_29 {dimension_numbers = #tpu.dot_dimension_numbers<[1], [0], [0], [1], [0, 0, 1, 1], [], []>} : vector<64x128xbf16>, vector<128x128xbf16>, vector<64x128xf32> -> vector<64x128xf32>
    %38 = arith.addf %29, %37 : vector<64x128xf32>
    %c1_i32_30 = arith.constant 1 : i32
    %39 = arith.addi %1, %c1_i32_30 : i32
    %c0_31 = arith.constant 0 : index
    %c0_32 = arith.constant 0 : index
    %40 = arith.index_cast %39 : i32 to index
    %c1_33 = arith.constant 1 : index
    %c0_34 = arith.constant 0 : index
    %41 = vector.load %arg3[%c0_31, %c0_32, %40, %c1_33, %c0_34] : memref<1x1x10x10x128xbf16, #tpu.memory_space<vmem>>, vector<1x1x8x8x128xbf16>
    %42 = vector.shape_cast %41 : vector<1x1x8x8x128xbf16> to vector<8x8x128xbf16>
    %43 = vector.shape_cast %42 : vector<8x8x128xbf16> to vector<64x128xbf16>
    %c4 = arith.constant 4 : index
    %c0_35 = arith.constant 0 : index
    %c0_36 = arith.constant 0 : index
    %44 = vector.load %arg4[%c4, %c0_35, %c0_36] : memref<9x128x128xbf16, #tpu.memory_space<vmem>>, vector<1x128x128xbf16>
    %45 = vector.shape_cast %44 : vector<1x128x128xbf16> to vector<128x128xbf16>
    %cst_37 = arith.constant dense<0.000000e+00> : vector<64x128xf32>
    %46 = tpu.matmul %43, %45, %cst_37 {dimension_numbers = #tpu.dot_dimension_numbers<[1], [0], [0], [1], [0, 0, 1, 1], [], []>} : vector<64x128xbf16>, vector<128x128xbf16>, vector<64x128xf32> -> vector<64x128xf32>
    %47 = arith.addf %38, %46 : vector<64x128xf32>
    %c1_i32_38 = arith.constant 1 : i32
    %48 = arith.addi %1, %c1_i32_38 : i32
    %c0_39 = arith.constant 0 : index
    %c0_40 = arith.constant 0 : index
    %49 = arith.index_cast %48 : i32 to index
    %c2_41 = arith.constant 2 : index
    %c0_42 = arith.constant 0 : index
    %50 = vector.load %arg3[%c0_39, %c0_40, %49, %c2_41, %c0_42] : memref<1x1x10x10x128xbf16, #tpu.memory_space<vmem>>, vector<1x1x8x8x128xbf16>
    %51 = vector.shape_cast %50 : vector<1x1x8x8x128xbf16> to vector<8x8x128xbf16>
    %52 = vector.shape_cast %51 : vector<8x8x128xbf16> to vector<64x128xbf16>
    %c5 = arith.constant 5 : index
    %c0_43 = arith.constant 0 : index
    %c0_44 = arith.constant 0 : index
    %53 = vector.load %arg4[%c5, %c0_43, %c0_44] : memref<9x128x128xbf16, #tpu.memory_space<vmem>>, vector<1x128x128xbf16>
    %54 = vector.shape_cast %53 : vector<1x128x128xbf16> to vector<128x128xbf16>
    %cst_45 = arith.constant dense<0.000000e+00> : vector<64x128xf32>
    %55 = tpu.matmul %52, %54, %cst_45 {dimension_numbers = #tpu.dot_dimension_numbers<[1], [0], [0], [1], [0, 0, 1, 1], [], []>} : vector<64x128xbf16>, vector<128x128xbf16>, vector<64x128xf32> -> vector<64x128xf32>
    %56 = arith.addf %47, %55 : vector<64x128xf32>
    %c2_i32 = arith.constant 2 : i32
    %57 = arith.addi %1, %c2_i32 : i32
    %c0_46 = arith.constant 0 : index
    %c0_47 = arith.constant 0 : index
    %58 = arith.index_cast %57 : i32 to index
    %c0_48 = arith.constant 0 : index
    %c0_49 = arith.constant 0 : index
    %59 = vector.load %arg3[%c0_46, %c0_47, %58, %c0_48, %c0_49] : memref<1x1x10x10x128xbf16, #tpu.memory_space<vmem>>, vector<1x1x8x8x128xbf16>
    %60 = vector.shape_cast %59 : vector<1x1x8x8x128xbf16> to vector<8x8x128xbf16>
    %61 = vector.shape_cast %60 : vector<8x8x128xbf16> to vector<64x128xbf16>
    %c6 = arith.constant 6 : index
    %c0_50 = arith.constant 0 : index
    %c0_51 = arith.constant 0 : index
    %62 = vector.load %arg4[%c6, %c0_50, %c0_51] : memref<9x128x128xbf16, #tpu.memory_space<vmem>>, vector<1x128x128xbf16>
    %63 = vector.shape_cast %62 : vector<1x128x128xbf16> to vector<128x128xbf16>
    %cst_52 = arith.constant dense<0.000000e+00> : vector<64x128xf32>
    %64 = tpu.matmul %61, %63, %cst_52 {dimension_numbers = #tpu.dot_dimension_numbers<[1], [0], [0], [1], [0, 0, 1, 1], [], []>} : vector<64x128xbf16>, vector<128x128xbf16>, vector<64x128xf32> -> vector<64x128xf32>
    %65 = arith.addf %56, %64 : vector<64x128xf32>
    %c2_i32_53 = arith.constant 2 : i32
    %66 = arith.addi %1, %c2_i32_53 : i32
    %c0_54 = arith.constant 0 : index
    %c0_55 = arith.constant 0 : index
    %67 = arith.index_cast %66 : i32 to index
    %c1_56 = arith.constant 1 : index
    %c0_57 = arith.constant 0 : index
    %68 = vector.load %arg3[%c0_54, %c0_55, %67, %c1_56, %c0_57] : memref<1x1x10x10x128xbf16, #tpu.memory_space<vmem>>, vector<1x1x8x8x128xbf16>
    %69 = vector.shape_cast %68 : vector<1x1x8x8x128xbf16> to vector<8x8x128xbf16>
    %70 = vector.shape_cast %69 : vector<8x8x128xbf16> to vector<64x128xbf16>
    %c7 = arith.constant 7 : index
    %c0_58 = arith.constant 0 : index
    %c0_59 = arith.constant 0 : index
    %71 = vector.load %arg4[%c7, %c0_58, %c0_59] : memref<9x128x128xbf16, #tpu.memory_space<vmem>>, vector<1x128x128xbf16>
    %72 = vector.shape_cast %71 : vector<1x128x128xbf16> to vector<128x128xbf16>
    %cst_60 = arith.constant dense<0.000000e+00> : vector<64x128xf32>
    %73 = tpu.matmul %70, %72, %cst_60 {dimension_numbers = #tpu.dot_dimension_numbers<[1], [0], [0], [1], [0, 0, 1, 1], [], []>} : vector<64x128xbf16>, vector<128x128xbf16>, vector<64x128xf32> -> vector<64x128xf32>
    %74 = arith.addf %65, %73 : vector<64x128xf32>
    %c2_i32_61 = arith.constant 2 : i32
    %75 = arith.addi %1, %c2_i32_61 : i32
    %c0_62 = arith.constant 0 : index
    %c0_63 = arith.constant 0 : index
    %76 = arith.index_cast %75 : i32 to index
    %c2_64 = arith.constant 2 : index
    %c0_65 = arith.constant 0 : index
    %77 = vector.load %arg3[%c0_62, %c0_63, %76, %c2_64, %c0_65] : memref<1x1x10x10x128xbf16, #tpu.memory_space<vmem>>, vector<1x1x8x8x128xbf16>
    %78 = vector.shape_cast %77 : vector<1x1x8x8x128xbf16> to vector<8x8x128xbf16>
    %79 = vector.shape_cast %78 : vector<8x8x128xbf16> to vector<64x128xbf16>
    %c8 = arith.constant 8 : index
    %c0_66 = arith.constant 0 : index
    %c0_67 = arith.constant 0 : index
    %80 = vector.load %arg4[%c8, %c0_66, %c0_67] : memref<9x128x128xbf16, #tpu.memory_space<vmem>>, vector<1x128x128xbf16>
    %81 = vector.shape_cast %80 : vector<1x128x128xbf16> to vector<128x128xbf16>
    %cst_68 = arith.constant dense<0.000000e+00> : vector<64x128xf32>
    %82 = tpu.matmul %79, %81, %cst_68 {dimension_numbers = #tpu.dot_dimension_numbers<[1], [0], [0], [1], [0, 0, 1, 1], [], []>} : vector<64x128xbf16>, vector<128x128xbf16>, vector<64x128xf32> -> vector<64x128xf32>
    %83 = arith.addf %74, %82 : vector<64x128xf32>
    %84 = vector.shape_cast %83 : vector<64x128xf32> to vector<8x8x128xf32>
    %c0_69 = arith.constant 0 : index
    %c0_70 = arith.constant 0 : index
    %85 = vector.load %arg5[%c0_69, %c0_70] : memref<1x128xf32, #tpu.memory_space<vmem>>, vector<1x128xf32>
    %86 = vector.shape_cast %85 : vector<1x128xf32> to vector<1x1x128xf32>
    %87 = vector.broadcast %86 : vector<1x1x128xf32> to vector<8x8x128xf32>
    %88 = arith.addf %84, %87 : vector<8x8x128xf32>
    %c0_71 = arith.constant 0 : index
    %c0_72 = arith.constant 0 : index
    %c0_73 = arith.constant 0 : index
    %c0_74 = arith.constant 0 : index
    %89 = vector.load %arg6[%c0_71, %c0_72, %c0_73, %c0_74] : memref<1x8x8x128xf32, #tpu.memory_space<vmem>>, vector<1x8x8x128xf32>
    %90 = vector.shape_cast %89 : vector<1x8x8x128xf32> to vector<8x8x128xf32>
    %91 = arith.addf %88, %90 : vector<8x8x128xf32>
    %cst_75 = arith.constant 0.000000e+00 : f32
    %92 = vector.broadcast %cst_75 : f32 to vector<8x8x128xf32>
    %93 = arith.maximumf %91, %92 : vector<8x8x128xf32>
    %c0_76 = arith.constant 0 : index
    %c0_77 = arith.constant 0 : index
    %c0_78 = arith.constant 0 : index
    %c0_79 = arith.constant 0 : index
    %94 = vector.load %arg7[%c0_76, %c0_77, %c0_78, %c0_79] : memref<1x8x8x128xf32, #tpu.memory_space<vmem>>, vector<1x8x8x128xf32>
    %95 = vector.shape_cast %94 : vector<1x8x8x128xf32> to vector<8x8x128xf32>
    %96 = vector.shape_cast %93 : vector<8x8x128xf32> to vector<1x8x8x128xf32>
    tpu.vector_store %arg7[%c0_76, %c0_77, %c0_78, %c0_79], %96 {strides = array<i32>} : memref<1x8x8x128xf32, #tpu.memory_space<vmem>>, vector<1x8x8x128xf32>,
    return
  }
  func.func @transform_0(%arg0: i32, %arg1: i32, %arg2: i32) -> (i32, i32, i32, i32, i32) {
    %c0_i32 = arith.constant 0 : i32
    %c0_i32_0 = arith.constant 0 : i32
    %c0_i32_1 = arith.constant 0 : i32
    %c0_i32_2 = arith.constant 0 : i32
    %c0_i32_3 = arith.constant 0 : i32
    return %c0_i32, %arg0, %c0_i32_0, %c0_i32_1, %c0_i32_2 : i32, i32, i32, i32, i32
  }
  func.func @transform_1(%arg0: i32, %arg1: i32, %arg2: i32) -> (i32, i32, i32) {
    %c0_i32 = arith.constant 0 : i32
    %c0_i32_0 = arith.constant 0 : i32
    %c0_i32_1 = arith.constant 0 : i32
    return %c0_i32, %c0_i32_0, %arg1 : i32, i32, i32
  }
  func.func @transform_2(%arg0: i32, %arg1: i32, %arg2: i32) -> (i32, i32) {
    %c0_i32 = arith.constant 0 : i32
    %c0_i32_0 = arith.constant 0 : i32
    return %c0_i32, %arg1 : i32, i32
  }
  func.func @transform_3(%arg0: i32, %arg1: i32, %arg2: i32) -> (i32, i32, i32, i32) {
    %c0_i32 = arith.constant 0 : i32
    %c0_i32_0 = arith.constant 0 : i32
    return %arg0, %arg2, %c0_i32, %arg1 : i32, i32, i32, i32
  }
  func.func @transform_4(%arg0: i32, %arg1: i32, %arg2: i32) -> (i32, i32, i32, i32) {
    %c0_i32 = arith.constant 0 : i32
    %c0_i32_0 = arith.constant 0 : i32
    return %arg0, %arg2, %c0_i32, %arg1 : i32, i32, i32, i32
  }
}

</mosaic_0001>

<bundles_post_ra>
// kernel: basic_block_forward.4
= control target key start
LH: loop header
LB: loop body
LE: loop exit
PB: predicated region body
PF: predicated region fallthrough
CT: control target
= control target key end

     0   :  { %s679_s12 = smov 0   ;;  %s681_s13 = smov 0   ;;  %s743_s0 = inlined_call_operand.vmem [shape: bf16[1,2,8,8,128], index: 0, kind: input, shape index: {}]   ;;  %s744_s1 = inlined_call_operand.vmem [shape: bf16[1,128,128], index: 1, kind: input, shape index: {}]   ;;  %s745_s2 = inlined_call_operand.vmem [shape: f32[1,128], index: 2, kind: input, shape index: {}]   ;;  %s746_s3 = inlined_call_operand.vmem [shape: f32[2,8,8,128], index: 3, kind: output, shape index: {}]  }
   0x1   :  { %s683_s14 = smov 0  }
   0x2 LB: > { %s32_s15 = sadd.s32 1, %s653_s13  ;;  %p517_p0 = scmp.ge.s32.totalorder %s657_s14, 1  ;;  %s657_s14 = sphi %s683_s14, %s13_s14   ;;  %s653_s13 = sphi %s681_s13, %s748_s13   ;;  %s649_s12 = sphi %s679_s12, %s747_s12  }
   0x3   : > { %p34_p1 = scmp.ge.s32.totalorder %s32_s15, 2  ;;  %p177_p2 = scmp.lt.s32.totalorder %s657_s14, 3 }
   0x5   : > { %s750_s15 = smov (%p34_p1, %s32_s15), 0  ;;  %p178_p3 = pnand %p517_p0, %p177_p2 }
   0x6   : > { %p215_p4 = scmp.lt.s32.totalorder (!%p178_p3), %s649_s12, 1 }
   0x7   : > { %181 = sbr.rel (%p178_p3) target bundleno = 189 (0xbd), region = 32 }
   0xc   : > { %v585_v0 = vld [vmem:[%s744_s1 + $0x38] sm:$0xff]  ;;  %v584_v1 = vld [vmem:[%s744_s1 + $0x30] sm:$0xff]  ;;  %v583_v2 = vld [vmem:[%s744_s1 + $0x28] sm:$0xff]  ;;  %s752_s12 = smov (!%p215_p4, %s649_s12), 1 }
   0xd   : > { %339 = vmatpush.bf16.msra.mxu0 %v585_v0  ;;  %586 = vmatpush.bf16.msra.mxu1 %v585_v0  ;;  %v582_v3 = vld [vmem:[%s744_s1 + $0x20] sm:$0xff]  ;;  %v581_v4 = vld [vmem:[%s744_s1 + $0x18] sm:$0xff]  ;;  %v580_v5 = vld [vmem:[%s744_s1 + $0x10] sm:$0xff]  ;;  %s572_s30 = sshll.u32 %s752_s12, 5  ;;  %s573_s9 = sshll.u32 %s752_s12, 6 }
   0xe   : > { %587 = vmatpush.bf16.msra.mxu2 %v585_v0  ;;  %588 = vmatpush.bf16.msra.mxu3 %v585_v0  ;;  %v579_v6 = vld [vmem:[%s744_s1 + $0x8] sm:$0xff]  ;;  %v578_v7 = vld [vmem:[%s744_s1] sm:$0xff]  ;;  %s219_s8 = scalar_lea.vmem %s743_s0, %s572_s30  ;;  %s238_s18 = scalar_lea.vmem %s746_s3, %s573_s9 }
   0xf   : > { %v574_v8 = vld [vmem:[%s219_s8] sm:$0xff]  ;;  %v575_v9 = vld [vmem:[%s219_s8 + $0x8] sm:$0xff]  ;;  %v576_v10 = vld [vmem:[%s219_s8 + $0x10] sm:$0xff] }
  0x10   : > { %v577_v11 = vld [vmem:[%s219_s8 + $0x18] sm:$0xff]  ;;  %v634_v12 = vld [vmem:[%s745_s2] ss:$0 sm:$0xff] }
  0x11   : > { %340 = vmatpush.bf16.msra.mxu0 %v584_v1  ;;  %589 = vmatpush.bf16.msra.mxu1 %v584_v1 }
  0x12   : > { %590 = vmatpush.bf16.msra.mxu2 %v584_v1  ;;  %591 = vmatpush.bf16.msra.mxu3 %v584_v1 }
  0x15   : > { %341 = vmatpush.bf16.msra.mxu0 %v583_v2  ;;  %592 = vmatpush.bf16.msra.mxu1 %v583_v2 }
  0x16   : > { %593 = vmatpush.bf16.msra.mxu2 %v583_v2  ;;  %594 = vmatpush.bf16.msra.mxu3 %v583_v2 }
  0x19   : > { %342 = vmatpush.bf16.msra.mxu0 %v582_v3  ;;  %595 = vmatpush.bf16.msra.mxu1 %v582_v3 }
  0x1a   : > { %596 = vmatpush.bf16.msra.mxu2 %v582_v3  ;;  %597 = vmatpush.bf16.msra.mxu3 %v582_v3 }
  0x1d   : > { %343 = vmatpush.bf16.msra.mxu0 %v581_v4  ;;  %598 = vmatpush.bf16.msra.mxu1 %v581_v4 }
  0x1e   : > { %599 = vmatpush.bf16.msra.mxu2 %v581_v4  ;;  %600 = vmatpush.bf16.msra.mxu3 %v581_v4 }
  0x21   : > { %344 = vmatpush.bf16.msra.mxu0 %v580_v5  ;;  %601 = vmatpush.bf16.msra.mxu1 %v580_v5 }
  0x22   : > { %602 = vmatpush.bf16.msra.mxu2 %v580_v5  ;;  %603 = vmatpush.bf16.msra.mxu3 %v580_v5 }
  0x25   : > { %345 = vmatpush.bf16.msra.mxu0 %v579_v6  ;;  %604 = vmatpush.bf16.msra.mxu1 %v579_v6 }
  0x26   : > { %605 = vmatpush.bf16.msra.mxu2 %v579_v6  ;;  %606 = vmatpush.bf16.msra.mxu3 %v579_v6 }
  0x29   : > { %346 = vmatpush.bf16.msra.mxu0 %v578_v7  ;;  %607 = vmatpush.bf16.msra.mxu1 %v578_v7 }
  0x2a   : > { %608 = vmatpush.bf16.msra.mxu2 %v578_v7  ;;  %609 = vmatpush.bf16.msra.mxu3 %v578_v7 }
  0x2c   : > { %347 = vmatmul.bf16.vlgmr.msra.gmra.mxu0 %v574_v8  ;;  %352 = vmatmul.bf16.vlgmr.msra.gmra.mxu1 %v575_v9 }
  0x2d   : > { %357 = vmatmul.bf16.vlgmr.msra.gmra.mxu2 %v576_v10  ;;  %362 = vmatmul.bf16.vlgmr.msra.gmra.mxu3 %v577_v11 }
  0xa9   : > { %v348_v13 = vpop.f32.mrf.mxu0  ;;  %v353_v14 = vpop.f32.mrf.mxu1 }
  0xaa   : > { %v372_v15 = vadd.f32 %v634_v12, %v348_v13  ;;  %v374_v16 = vadd.f32 %v634_v12, %v353_v14 }
  0xac   : > { %380 = vst [vmem:[%s238_s18] sm:$0xff] %v372_v15 }
  0xad   : > { %382 = vst [vmem:[%s238_s18 + $0x10] sm:$0xff] %v374_v16 }
  0xb0   : > { %v358_v17 = vpop.f32.mrf.mxu2  ;;  %v363_v18 = vpop.f32.mrf.mxu3 }
  0xb1   : > { %v376_v19 = vadd.f32 %v634_v12, %v358_v17  ;;  %v378_v20 = vadd.f32 %v634_v12, %v363_v18  ;;  %v350_v21 = vpop.f32.mrf.mxu0  ;;  %v355_v22 = vpop.f32.mrf.mxu1 }
  0xb2   : > { %v373_v23 = vadd.f32 %v634_v12, %v350_v21  ;;  %v375_v24 = vadd.f32 %v634_v12, %v355_v22 }
  0xb3   : > { %384 = vst [vmem:[%s238_s18 + $0x20] sm:$0xff] %v376_v19 }
  0xb4   : > { %386 = vst [vmem:[%s238_s18 + $0x30] sm:$0xff] %v378_v20 }
  0xb5   : > { %381 = vst [vmem:[%s238_s18 + $0x8] sm:$0xff] %v373_v23 }
  0xb6   : > { %383 = vst [vmem:[%s238_s18 + $0x18] sm:$0xff] %v375_v24 }
  0xb8   : > { %v360_v25 = vpop.f32.mrf.mxu2  ;;  %v365_v26 = vpop.f32.mrf.mxu3 }
  0xb9   : > { %v377_v27 = vadd.f32 %v634_v12, %v360_v25  ;;  %v379_v28 = vadd.f32 %v634_v12, %v365_v26 }
  0xbb   : > { %385 = vst [vmem:[%s238_s18 + $0x28] sm:$0xff] %v377_v27 }
  0xbc   : > { %387 = vst [vmem:[%s238_s18 + $0x38] sm:$0xff] %v379_v28 }
  0xbd PF: > { %s13_s14 = sadd.s32 1, %s657_s14   ;;  %s747_s12 = smov %s653_s13 }
  0xbe   : > { %p10_p5 = scmp.ge.s32.totalorder %s13_s14, 4   ;;  %s748_s13 = smov %s750_s15 }
  0xc0   :  { %12 = sbr.rel (!%p10_p5) target bundleno = 2 (0x2), region = 69 }

// kernel: basic_block_forward.3
= control target key start
LH: loop header
LB: loop body
LE: loop exit
PB: predicated region body
PF: predicated region fallthrough
CT: control target
= control target key end

     0   :  { %s3138_s12 = smov 0   ;;  %s3140_s13 = smov 0   ;;  %s3698_s0 = inlined_call_operand.vmem [shape: bf16[4,2,9,9,128], index: 0, kind: input, shape index: {}]   ;;  %s3699_s1 = inlined_call_operand.vmem [shape: bf16[9,128,128], index: 1, kind: input, shape index: {}]   ;;  %s3700_s2 = inlined_call_operand.vmem [shape: f32[1,128], index: 2, kind: input, shape index: {}]   ;;  %s3701_s3 = inlined_call_operand.vmem [shape: bf16[2,8,8,128], index: 3, kind: output, shape index: {}]  }
   0x1   :  { %s3142_s14 = smov 0   ;;  %s3144_s15 = smov 0  }
   0x2   :  { %s3146_s16 = smov 0  }
   0x3 LB: > { %s32_s17 = sadd.s32 1, %s3112_s15  ;;  %p46_p1 = scmp.ne.s32.totalorder %s3104_s13, %s3100_s12  ;;  %s3116_s16 = sphi %s3146_s16, %s13_s16   ;;  %s3112_s15 = sphi %s3144_s15, %s3707_s15   ;;  %s3108_s14 = sphi %s3142_s14, %s3706_s14   ;;  %s3104_s13 = sphi %s3140_s13, %s3705_s13   ;;  %s3100_s12 = sphi %s3138_s12, %s3704_s12  }
   0x4   : > { %p34_p0 = scmp.ge.s32.totalorder %s32_s17, 2  ;;  %p47_p2 = scmp.eq.s32.totalorder %s3116_s16, 0 }
   0x5   : > { %s39_s19 = sadd.s32 1, %s3104_s13  ;;  %p2307_p5 = scmp.ge.s32.totalorder %s3116_s16, 2 }
   0x6   : > { %s3709_s17 = smov (%p34_p0, %s32_s17), 0  ;;  %p48_p3 = por %p47_p2, %p46_p1 }
   0x7   : > { %s36_s18 = ssub.s32 %s3112_s15, %s3709_s17  ;;  %167 = sbr.rel (%p2307_p5) target bundleno = 53 (0x35), region = 24 }
   0x8   : > { %p37_p4 = scmp.eq.s32.totalorder %s36_s18, 0 }
   0xa   : > { %s3173_s20 = scalar_select %p37_p4, %s3104_s13, %s39_s19  }
   0xc   : > { %170 = sbr.rel (!%p48_p3) target bundleno = 53 (0x35), region = 28  ;;  %s172_s21 = sand.u32 (%p48_p3), 1, %s3104_s13  }
   0xd   : > { %s3035_s22 = smul.u32 (%p48_p3), 72, %s3112_s15 }
   0xe   : > { %s3034_s23 = smul.u32 (%p48_p3), 288, %s172_s21 }
   0xf   : > { %s3181_s26 = scalar_lea.vmem (%p48_p3), %s3698_s0, %s3035_s22 }
  0x10   : > { %v194_v0 = vld [vmem:[%s3181_s26] sm:$0xff] (%p48_p3)   ;;  %v198_v1 = vld [vmem:[%s3181_s26 + $0x8] sm:$0xff] (%p48_p3)   ;;  %v202_v2 = vld [vmem:[%s3181_s26 + $0x10] sm:$0xff] (%p48_p3)   ;;  %s3186_s27 = scalar_lea.vmem (%p48_p3), [#allocation2], %s3034_s23 }
  0x11   : > { %195 = vst [vmem:[%s3186_s27] sm:$0xff] %v194_v0   ;;  %v206_v3 = vld [vmem:[%s3181_s26 + $0x18] sm:$0xff]   ;;  %v210_v4 = vld [vmem:[%s3181_s26 + $0x20] sm:$0xff]   ;;  %v214_v5 = vld [vmem:[%s3181_s26 + $0x28] sm:$0xff]  }
  0x12   : > { %199 = vst [vmem:[%s3186_s27 + $0x8] sm:$0xff] %v198_v1   ;;  %v218_v6 = vld [vmem:[%s3181_s26 + $0x30] sm:$0xff]   ;;  %v222_v7 = vld [vmem:[%s3181_s26 + $0x38] sm:$0xff]   ;;  %v226_v8 = vld [vmem:[%s3181_s26 + $0x40] sm:$0xff]  }
  0x13   : > { %203 = vst [vmem:[%s3186_s27 + $0x10] sm:$0xff] %v202_v2   ;;  %v230_v9 = vld [vmem:[%s3181_s26 + $0x90] sm:$0xff]   ;;  %v234_v10 = vld [vmem:[%s3181_s26 + $0x98] sm:$0xff]   ;;  %v238_v11 = vld [vmem:[%s3181_s26 + $0xa0] sm:$0xff]  }
  0x14   : > { %207 = vst [vmem:[%s3186_s27 + $0x18] sm:$0xff] %v206_v3   ;;  %v242_v12 = vld [vmem:[%s3181_s26 + $0xa8] sm:$0xff]   ;;  %v246_v13 = vld [vmem:[%s3181_s26 + $0xb0] sm:$0xff]   ;;  %v250_v14 = vld [vmem:[%s3181_s26 + $0xb8] sm:$0xff]  }
  0x15   : > { %211 = vst [vmem:[%s3186_s27 + $0x20] sm:$0xff] %v210_v4   ;;  %v254_v15 = vld [vmem:[%s3181_s26 + $0xc0] sm:$0xff]   ;;  %v258_v16 = vld [vmem:[%s3181_s26 + $0xc8] sm:$0xff]   ;;  %v262_v17 = vld [vmem:[%s3181_s26 + $0xd0] sm:$0xff]  }
  0x16   : > { %215 = vst [vmem:[%s3186_s27 + $0x28] sm:$0xff] %v214_v5   ;;  %v266_v18 = vld [vmem:[%s3181_s26 + $0x120] sm:$0xff]   ;;  %v270_v19 = vld [vmem:[%s3181_s26 + $0x128] sm:$0xff]   ;;  %v274_v20 = vld [vmem:[%s3181_s26 + $0x130] sm:$0xff]  }
  0x17   : > { %219 = vst [vmem:[%s3186_s27 + $0x30] sm:$0xff] %v218_v6   ;;  %v278_v21 = vld [vmem:[%s3181_s26 + $0x138] sm:$0xff]   ;;  %v282_v22 = vld [vmem:[%s3181_s26 + $0x140] sm:$0xff]   ;;  %v286_v23 = vld [vmem:[%s3181_s26 + $0x148] sm:$0xff]  }
  0x18   : > { %223 = vst [vmem:[%s3186_s27 + $0x38] sm:$0xff] %v222_v7   ;;  %v290_v24 = vld [vmem:[%s3181_s26 + $0x150] sm:$0xff]   ;;  %v294_v25 = vld [vmem:[%s3181_s26 + $0x158] sm:$0xff]   ;;  %v298_v26 = vld [vmem:[%s3181_s26 + $0x160] sm:$0xff]  }
  0x19   : > { %227 = vst [vmem:[%s3186_s27 + $0x40] sm:$0xff] %v226_v8   ;;  %v302_v27 = vld [vmem:[%s3181_s26 + $0x1b0] sm:$0xff]   ;;  %v306_v28 = vld [vmem:[%s3181_s26 + $0x1b8] sm:$0xff]   ;;  %v310_v29 = vld [vmem:[%s3181_s26 + $0x1c0] sm:$0xff]  }
  0x1a   : > { %231 = vst [vmem:[%s3186_s27 + $0x48] sm:$0xff] %v230_v9   ;;  %v314_v30 = vld [vmem:[%s3181_s26 + $0x1c8] sm:$0xff]   ;;  %v318_v31 = vld [vmem:[%s3181_s26 + $0x1d0] sm:$0xff]   ;;  %v322_v32 = vld [vmem:[%s3181_s26 + $0x1d8] sm:$0xff]  }
  0x1b   : > { %235 = vst [vmem:[%s3186_s27 + $0x50] sm:$0xff] %v234_v10   ;;  %v326_v33 = vld [vmem:[%s3181_s26 + $0x1e0] sm:$0xff]   ;;  %v330_v34 = vld [vmem:[%s3181_s26 + $0x1e8] sm:$0xff]   ;;  %v334_v35 = vld [vmem:[%s3181_s26 + $0x1f0] sm:$0xff]  }
  0x1c   : > { %239 = vst [vmem:[%s3186_s27 + $0x58] sm:$0xff] %v238_v11  }
  0x1d   : > { %243 = vst [vmem:[%s3186_s27 + $0x60] sm:$0xff] %v242_v12  }
  0x1e   : > { %247 = vst [vmem:[%s3186_s27 + $0x68] sm:$0xff] %v246_v13  }
  0x1f   : > { %251 = vst [vmem:[%s3186_s27 + $0x70] sm:$0xff] %v250_v14  }
  0x20   : > { %255 = vst [vmem:[%s3186_s27 + $0x78] sm:$0xff] %v254_v15  }
  0x21   : > { %259 = vst [vmem:[%s3186_s27 + $0x80] sm:$0xff] %v258_v16  }
  0x22   : > { %263 = vst [vmem:[%s3186_s27 + $0x88] sm:$0xff] %v262_v17  }
  0x23   : > { %267 = vst [vmem:[%s3186_s27 + $0x90] sm:$0xff] %v266_v18  }
  0x24   : > { %271 = vst [vmem:[%s3186_s27 + $0x98] sm:$0xff] %v270_v19  }
  0x25   : > { %275 = vst [vmem:[%s3186_s27 + $0xa0] sm:$0xff] %v274_v20  }
  0x26   : > { %279 = vst [vmem:[%s3186_s27 + $0xa8] sm:$0xff] %v278_v21  }
  0x27   : > { %283 = vst [vmem:[%s3186_s27 + $0xb0] sm:$0xff] %v282_v22  }
  0x28   : > { %287 = vst [vmem:[%s3186_s27 + $0xb8] sm:$0xff] %v286_v23  }
  0x29   : > { %291 = vst [vmem:[%s3186_s27 + $0xc0] sm:$0xff] %v290_v24  }
  0x2a   : > { %295 = vst [vmem:[%s3186_s27 + $0xc8] sm:$0xff] %v294_v25  }
  0x2b   : > { %299 = vst [vmem:[%s3186_s27 + $0xd0] sm:$0xff] %v298_v26  }
  0x2c   : > { %303 = vst [vmem:[%s3186_s27 + $0xd8] sm:$0xff] %v302_v27  }
  0x2d   : > { %307 = vst [vmem:[%s3186_s27 + $0xe0] sm:$0xff] %v306_v28  }
  0x2e   : > { %311 = vst [vmem:[%s3186_s27 + $0xe8] sm:$0xff] %v310_v29  }
  0x2f   : > { %315 = vst [vmem:[%s3186_s27 + $0xf0] sm:$0xff] %v314_v30  }
  0x30   : > { %319 = vst [vmem:[%s3186_s27 + $0xf8] sm:$0xff] %v318_v31  }
  0x31   : > { %323 = vst [vmem:[%s3186_s27 + $0x100] sm:$0xff] %v322_v32  }
  0x32   : > { %327 = vst [vmem:[%s3186_s27 + $0x108] sm:$0xff] %v326_v33  }
  0x33   : > { %331 = vst [vmem:[%s3186_s27 + $0x110] sm:$0xff] %v330_v34  }
  0x34   : > { %335 = vst [vmem:[%s3186_s27 + $0x118] sm:$0xff] %v334_v35  }
  0x35 PF: > { %p2309_p6 = scmp.ge.s32.totalorder %s3116_s16, 1  ;;  %p504_p7 = scmp.lt.s32.totalorder %s3116_s16, 3 }
  0x37   : > { %p505_p8 = pnand %p2309_p6, %p504_p7 }
  0x38   : > { %s511_s30 = sand.u32 (!%p505_p8), 1, %s3100_s12   ;;  %p556_p9 = scmp.lt.s32.totalorder (!%p505_p8), %s3108_s14, 1 }
  0x39   : > { %508 = sbr.rel (%p505_p8) target bundleno = 387 (0x183), region = 69 }
  0x3a   : > { %s3036_s8 = smul.u32 (!%p505_p8), 288, %s511_s30 }
  0x3c   : > { %s3287_s27 = scalar_lea.vmem (!%p505_p8), [#allocation2], %s3036_s8 }
  0x3e   : > { %v2922_v36 = vld [vmem:[%s3699_s1 + $0x78] sm:$0xff]  ;;  %v2921_v38 = vld [vmem:[%s3699_s1 + $0x70] sm:$0xff]  ;;  %v2920_v42 = vld [vmem:[%s3699_s1 + $0x68] sm:$0xff]  ;;  %vm842_vm0 = vsmask.f32 3328  ;;  %s3711_s14 = smov (!%p556_p9, %s3108_s14), 1 }
  0x3f   : > { %v2930_v37 = vld [vmem:[%s3699_s1 + $0xb8] sm:$0xff]  ;;  %3018 = vmatpush.bf16.msra.mxu1 %v2922_v36  ;;  %696 = vmatpush.bf16.msra.mxu0 %v2922_v36  ;;  %v2929_v39 = vld [vmem:[%s3699_s1 + $0xb0] sm:$0xff]  ;;  %v2928_v43 = vld [vmem:[%s3699_s1 + $0xa8] sm:$0xff]  ;;  %vm843_vm1 = vsmask.f32 7440  ;;  %s2898_s8 = sshll.u32 %s3711_s14, 5 }
  0x40   : > { %1038 = vmatpush.bf16.msra.mxu2 %v2930_v37  ;;  %v2942_v40 = vld [vmem:[%s3699_s1 + $0xf8] sm:$0xff]  ;;  %v2941_v41 = vld [vmem:[%s3699_s1 + $0xf0] sm:$0xff]  ;;  %v2940_v44 = vld [vmem:[%s3699_s1 + $0xe8] sm:$0xff]  ;;  %s3662_s11 = scalar_lea.vmem %s3701_s3, %s2898_s8 }
  0x41   : > { %1175 = vmatpush.bf16.msra.mxu3 %v2942_v40  ;;  %v826_v45 = vld [vmem:[%s3287_s27] sm:$0xf]  ;;  %v828_v47 = vld [vmem:[%s3287_s27 + $0x8] sm:$0xf]  ;;  %v827_v52 = vld [vmem:[%s3287_s27 + $0x4] sm:$0x1] }
  0x42   : > { %v2919_v46 = vld [vmem:[%s3699_s1 + $0x60] sm:$0xff]  ;;  %v846_v49 = vshrl.u32 %v826_v45, 16  ;;  %v849_v50 = vshll.u32 %v826_v45, 16  ;;  %v860_v51 = vshrl.u32 %v828_v47, 16  ;;  %v829_v53 = vld [vmem:[%s3287_s27 + $0xc] sm:$0x1]  ;;  %vm3318_vm2 = vmor %vm842_vm0, %vm843_vm1 }
  0x43   : > { %3019 = vmatpush.bf16.msra.mxu1 %v2921_v38  ;;  %697 = vmatpush.bf16.msra.mxu0 %v2921_v38  ;;  %v2927_v48 = vld [vmem:[%s3699_s1 + $0xa0] sm:$0xff]  ;;  %v863_v54 = vshll.u32 %v828_v47, 16  ;;  %v2918_v59 = vld [vmem:[%s3699_s1 + $0x58] sm:$0xff]  ;;  %v855_v63 = vshll.u32 %v827_v52, 16  ;;  %v869_v0 = vshll.u32 %v829_v53, 16  ;;  %v2917_v3 = vld [vmem:[%s3699_s1 + $0x50] sm:$0xff] }
  0x44   : > { %1039 = vmatpush.bf16.msra.mxu2 %v2929_v39  ;;  %v2939_v55 = vld [vmem:[%s3699_s1 + $0xe0] sm:$0xff]  ;;  %v848_v56 = vrot.slane %v846_v49, 4  ;;  %v851_v57 = vrot.slane %v849_v50, 5  ;;  %v862_v58 = vrot.slane %v860_v51, 4  ;;  %v2926_v61 = vld [vmem:[%s3699_s1 + $0x98] sm:$0xff]  ;;  %v2925_v4 = vld [vmem:[%s3699_s1 + $0x90] sm:$0xff] }
  0x45   : > { %1176 = vmatpush.bf16.msra.mxu3 %v2941_v41  ;;  %v865_v60 = vrot.slane %v863_v54, 5  ;;  %v2938_v2 = vld [vmem:[%s3699_s1 + $0xd8] sm:$0xff]  ;;  %v857_v6 = vrot.slane %v855_v63, 5  ;;  %v871_v8 = vrot.slane %v869_v0, 5  ;;  %v830_v9 = vld [vmem:[%s3287_s27 + $0x10] sm:$0xf] }
  0x46   : > { %v852_v62 = vor.u32 %v851_v57, %v848_v56  ;;  %v832_v11 = vld [vmem:[%s3287_s27 + $0x18] sm:$0xf]  ;;  %v2937_v12 = vld [vmem:[%s3699_s1 + $0xd0] sm:$0xff]  ;;  %v2916_v13 = vld [vmem:[%s3699_s1 + $0x48] sm:$0xff]  ;;  %v874_v14 = vshrl.u32 %v830_v9, 16  ;;  %v877_v15 = vshll.u32 %v830_v9, 16 }
  0x47   : > { %3020 = vmatpush.bf16.msra.mxu1 %v2920_v42  ;;  %698 = vmatpush.bf16.msra.mxu0 %v2920_v42  ;;  %v866_v1 = vor.u32 %v865_v60, %v862_v58  ;;  %v2924_v16 = vld [vmem:[%s3699_s1 + $0x88] sm:$0xff]  ;;  %v888_v19 = vshrl.u32 %v832_v11, 16  ;;  %v891_v20 = vshll.u32 %v832_v11, 16  ;;  %v2915_v21 = vld [vmem:[%s3699_s1 + $0x40] sm:$0xff]  ;;  %v2913_v23 = vld [vmem:[%s3287_s27 + $0x6c] sm:$0xf0] }
  0x48   : > { %1040 = vmatpush.bf16.msra.mxu2 %v2928_v43  ;;  %v853_v5 = vrot.slane %v852_v62, 4  ;;  %v2346_v22 = vld [vmem:[%s3287_s27 + $0x68] sm:$0xf]  ;;  %v2910_v24 = vld [vmem:[%s3699_s1 + $0x38] sm:$0xff]  ;;  %v2923_v26 = vld [vmem:[%s3699_s1 + $0x80] sm:$0xff]  ;;  %v876_v32 = vrot.slane %v874_v14, 4 }
  0x49   : > { %1177 = vmatpush.bf16.msra.mxu3 %v2940_v44  ;;  %v867_v7 = vrot.slane %v866_v1, 4  ;;  %v2936_v25 = vld [vmem:[%s3699_s1 + $0xc8] sm:$0xff]  ;;  %v2911_v28 = vld [vmem:[%s3287_s27 + $0x4c] sm:$0xf0]  ;;  %v831_v31 = vld [vmem:[%s3287_s27 + $0x14] sm:$0x1]  ;;  %v2347_v39 = vor.u32 %v2913_v23, %v2346_v22 }
  0x4a   : > { %v858_v17 = vsel %vm3318_vm2, %v853_v5, %v857_v6  ;;  %v2338_v27 = vld [vmem:[%s3287_s27 + $0x48] sm:$0xf]  ;;  %v879_v33 = vrot.slane %v877_v15, 5  ;;  %v890_v34 = vrot.slane %v888_v19, 4  ;;  %v893_v35 = vrot.slane %v891_v20, 5  ;;  %v2954_v36 = vld [vmem:[%s3699_s1 + $0x138] sm:$0xff] }
  0x4b   : > { %3021 = vmatpush.bf16.msra.mxu1 %v2919_v46  ;;  %699 = vmatpush.bf16.msra.mxu0 %v2919_v46  ;;  %v872_v18 = vsel %vm3318_vm2, %v867_v7, %v871_v8  ;;  %v974_v29 = vunpack.c.l.b16 %v858_v17  ;;  %v2974_v37 = vld [vmem:[%s3699_s1 + $0x1b8] sm:$0xff]  ;;  %v2339_v40 = vor.u32 %v2911_v28, %v2338_v27  ;;  %v2935_v42 = vld [vmem:[%s3699_s1 + $0xc0] sm:$0xff]  ;;  %v2506_v43 = vld [vmem:[%s3287_s27 + $0x90] sm:$0xf]  ;;  %v883_v45 = vshll.u32 %v831_v31, 16 }
  0x4c   : > { %1041 = vmatpush.bf16.msra.mxu2 %v2927_v48  ;;  %v975_v30 = vunpack.c.l.b16 %v872_v18  ;;  %v833_v38 = vld [vmem:[%s3287_s27 + $0x1c] sm:$0x1]  ;;  %v2931_v44 = vld [vmem:[%s3287_s27 + $0x94] sm:$0xf0]  ;;  %v2909_v46 = vld [vmem:[%s3699_s1 + $0x30] sm:$0xff]  ;;  %v880_v47 = vor.u32 %v879_v33, %v876_v32  ;;  %v894_v48 = vor.u32 %v893_v35, %v890_v34 }
  0x4d   : > { %1178 = vmatpush.bf16.msra.mxu3 %v2939_v55  ;;  %v897_v49 = vshll.u32 %v833_v38, 16  ;;  %v2986_v50 = vld [vmem:[%s3699_s1 + $0x1f8] sm:$0xff]  ;;  %v2953_v51 = vld [vmem:[%s3699_s1 + $0x130] sm:$0xff]  ;;  %v2507_v53 = vor.u32 %v2931_v44, %v2506_v43  ;;  %v2908_v54 = vld [vmem:[%s3699_s1 + $0x28] sm:$0xff]  ;;  %v885_v55 = vrot.slane %v883_v45, 5 }
  0x4e   : > { %v982_v41 = vpack.c.b16 %v975_v30, %v974_v29  ;;  %v2973_v52 = vld [vmem:[%s3699_s1 + $0x1b0] sm:$0xff]  ;;  %v881_v56 = vrot.slane %v880_v47, 4  ;;  %v895_v57 = vrot.slane %v894_v48, 4  ;;  %v834_v60 = vld [vmem:[%s3287_s27 + $0x20] sm:$0xf]  ;;  %v2972_v62 = vld [vmem:[%s3699_s1 + $0x1a8] sm:$0xff] }
  0x4f   : > { %3022 = vmatpush.bf16.msra.mxu1 %v2918_v59  ;;  %700 = vmatpush.bf16.msra.mxu0 %v2918_v59  ;;  %v899_v58 = vrot.slane %v897_v49, 5  ;;  %v2985_v59 = vld [vmem:[%s3699_s1 + $0x1f0] sm:$0xff]  ;;  %v836_v63 = vld [vmem:[%s3287_s27 + $0x28] sm:$0xf]  ;;  %v902_v0 = vshrl.u32 %v834_v60, 16  ;;  %v905_v1 = vshll.u32 %v834_v60, 16 }
  0x50   : > { %1042 = vmatpush.bf16.msra.mxu2 %v2926_v61  ;;  %v2952_v61 = vld [vmem:[%s3699_s1 + $0x128] sm:$0xff]  ;;  %v916_v5 = vshrl.u32 %v836_v63, 16  ;;  %v919_v6 = vshll.u32 %v836_v63, 16  ;;  %v2951_v8 = vld [vmem:[%s3699_s1 + $0x120] sm:$0xff]  ;;  %v2350_v11 = vld [vmem:[%s3287_s27 + $0x78] sm:$0xf] }
  0x51   : > { %1179 = vmatpush.bf16.msra.mxu3 %v2938_v2  ;;  %v2907_v2 = vld [vmem:[%s3699_s1 + $0x20] sm:$0xff]  ;;  %v2984_v7 = vld [vmem:[%s3699_s1 + $0x1e8] sm:$0xff]  ;;  %v904_v17 = vrot.slane %v902_v0, 4  ;;  %v907_v18 = vrot.slane %v905_v1, 5  ;;  %v2906_v19 = vld [vmem:[%s3699_s1 + $0x18] sm:$0xff] }
  0x52   : > { %v2971_v9 = vld [vmem:[%s3699_s1 + $0x1a0] sm:$0xff]  ;;  %v918_v20 = vrot.slane %v916_v5, 4  ;;  %v2950_v22 = vld [vmem:[%s3699_s1 + $0x118] sm:$0xff]  ;;  %v2932_v29 = vld [vmem:[%s3287_s27 + $0xa4] sm:$0xf0] }
  0x53   : > { %3023 = vmatpush.bf16.msra.mxu1 %v2917_v3  ;;  %701 = vmatpush.bf16.msra.mxu0 %v2917_v3  ;;  %v886_v3 = vsel %vm3318_vm2, %v881_v56, %v885_v55  ;;  %v2912_v14 = vld [vmem:[%s3287_s27 + $0x5c] sm:$0xf0]  ;;  %v835_v23 = vld [vmem:[%s3287_s27 + $0x24] sm:$0x1]  ;;  %v908_v30 = vor.u32 %v907_v18, %v904_v17  ;;  %v2905_v31 = vld [vmem:[%s3699_s1 + $0x10] sm:$0xff] }
  0x54   : > { %1043 = vmatpush.bf16.msra.mxu2 %v2925_v4  ;;  %v900_v4 = vsel %vm3318_vm2, %v895_v57, %v899_v58  ;;  %v976_v15 = vunpack.c.l.b16 %v886_v3  ;;  %v2510_v28 = vld [vmem:[%s3287_s27 + $0xa0] sm:$0xf]  ;;  %v911_v32 = vshll.u32 %v835_v23, 16  ;;  %v2949_v35 = vld [vmem:[%s3699_s1 + $0x110] sm:$0xff]  ;;  %v2904_v38 = vld [vmem:[%s3699_s1 + $0x8] sm:$0xff] }
  0x55   : > { %1180 = vmatpush.bf16.msra.mxu3 %v2937_v12  ;;  %v2914_v12 = vld [vmem:[%s3287_s27 + $0x7c] sm:$0xf0]  ;;  %v838_v44 = vld [vmem:[%s3287_s27 + $0x30] sm:$0xf]  ;;  %v2948_v45 = vld [vmem:[%s3699_s1 + $0x108] sm:$0xff] }
  0x56   : > { %v2983_v43 = vld [vmem:[%s3699_s1 + $0x1e0] sm:$0xff]  ;;  %v2969_v47 = vld [vmem:[%s3699_s1 + $0x190] sm:$0xff]  ;;  %v930_v48 = vshrl.u32 %v838_v44, 16  ;;  %v933_v49 = vshll.u32 %v838_v44, 16  ;;  %v2962_v56 = vld [vmem:[%s3699_s1 + $0x178] sm:$0xff] }
  0x57   : > { %3024 = vmatpush.bf16.msra.mxu1 %v2916_v13  ;;  %702 = vmatpush.bf16.msra.mxu0 %v2916_v13  ;;  %v2342_v13 = vld [vmem:[%s3287_s27 + $0x58] sm:$0xf]  ;;  %v2947_v57 = vld [vmem:[%s3699_s1 + $0x100] sm:$0xff]  ;;  %v2961_v5 = vld [vmem:[%s3699_s1 + $0x170] sm:$0xff] }
  0x58   : > { %1044 = vmatpush.bf16.msra.mxu2 %v2924_v16  ;;  %v977_v16 = vunpack.c.l.b16 %v900_v4  ;;  %v2386_v58 = vld [vmem:[%s3287_s27] sm:$0xf]  ;;  %v2994_v60 = vld [vmem:[%s3699_s1 + $0x238] sm:$0xff]  ;;  %v932_v1 = vrot.slane %v930_v48, 4  ;;  %v2956_v48 = vld [vmem:[%s3699_s1 + $0x148] sm:$0xff] }
  0x59   : > { %1181 = vmatpush.bf16.msra.mxu3 %v2936_v25  ;;  %v2351_v25 = vor.u32 %v2914_v12, %v2350_v11  ;;  %v2514_v12 = vld [vmem:[%s3287_s27 + $0xb0] sm:$0xf] }
  0x5a   : > { %v983_v27 = vpack.c.b16 %v977_v16, %v976_v15  ;;  %v2993_v15 = vld [vmem:[%s3699_s1 + $0x230] sm:$0xff] }
  0x5b   : > { %3025 = vmatpush.bf16.msra.mxu1 %v2915_v21  ;;  %703 = vmatpush.bf16.msra.mxu0 %v2915_v21  ;;  %v921_v21 = vrot.slane %v919_v6, 5  ;;  %v839_v6 = vld [vmem:[%s3287_s27 + $0x34] sm:$0x1] }
  0x5c   : > { %1045 = vmatpush.bf16.msra.mxu2 %v2923_v26  ;;  %v2343_v26 = vor.u32 %v2912_v14, %v2342_v13  ;;  %v2933_v13 = vld [vmem:[%s3287_s27 + $0xb4] sm:$0xf0]  ;;  %v939_v16 = vshll.u32 %v839_v6, 16  ;;  %v2834_v6 = vld [vmem:[%s3287_s27 + $0x10] sm:$0xf] }
  0x5d   : > { %1182 = vmatpush.bf16.msra.mxu3 %v2935_v42  ;;  %v922_v33 = vor.u32 %v921_v21, %v918_v20  ;;  %v2968_v20 = vld [vmem:[%s3699_s1 + $0x188] sm:$0xff]  ;;  %v2515_v21 = vor.u32 %v2933_v13, %v2514_v12 }
  0x5e   : > { %714 = vmatmul.bf16.vlgmr.msra.gmra.mxu1 %v2347_v39  ;;  %704 = vmatmul.bf16.vlgmr.msra.gmra.mxu0 %v2339_v40  ;;  %v909_v39 = vrot.slane %v908_v30, 4  ;;  %v913_v40 = vrot.slane %v911_v32, 5  ;;  %v941_v23 = vrot.slane %v939_v16, 5  ;;  %v2980_v30 = vld [vmem:[%s3699_s1 + $0x1c8] sm:$0xff]  ;;  %v2398_v16 = vld [vmem:[%s3287_s27 + $0x30] sm:$0xf] }
  0x5f   : > { %797 = vmatpush.bf16.msrb.mxu1 %v2910_v24  ;;  %1312 = vmatpush.bf16.msrb.mxu0 %v2954_v36  ;;  %v837_v24 = vld [vmem:[%s3287_s27 + $0x2c] sm:$0x1]  ;;  %v2511_v36 = vor.u32 %v2932_v29, %v2510_v28  ;;  %v2959_v29 = vld [vmem:[%s3699_s1 + $0x160] sm:$0xff] }
  0x60   : > { %1696 = vmatpush.bf16.msrb.mxu2 %v2974_v37  ;;  %1183 = vmatmul.bf16.vlgmr.msra.gmra.mxu3 %v2507_v53  ;;  %v925_v34 = vshll.u32 %v837_v24, 16  ;;  %v2970_v37 = vld [vmem:[%s3699_s1 + $0x198] sm:$0xff]  ;;  %v2992_v28 = vld [vmem:[%s3699_s1 + $0x228] sm:$0xff] }
  0x61   : > { %1046 = vmatmul.bf16.vlgmr.msra.gmra.mxu2 %v982_v41  ;;  %1833 = vmatpush.bf16.msrb.mxu3 %v2986_v50  ;;  %v923_v41 = vrot.slane %v922_v33, 4  ;;  %v2982_v50 = vld [vmem:[%s3699_s1 + $0x1d8] sm:$0xff] }
  0x62   : > { %v927_v42 = vrot.slane %v925_v34, 5  ;;  %v2958_v34 = vld [vmem:[%s3699_s1 + $0x158] sm:$0xff] }
  0x63   : > { %798 = vmatpush.bf16.msrb.mxu1 %v2909_v46  ;;  %1313 = vmatpush.bf16.msrb.mxu0 %v2953_v51  ;;  %v840_v46 = vld [vmem:[%s3287_s27 + $0x38] sm:$0xf]  ;;  %v2903_v51 = vld [vmem:[%s3699_s1] sm:$0xff] }
  0x64   : > { %1697 = vmatpush.bf16.msrb.mxu2 %v2973_v52  ;;  %v914_v52 = vsel %vm3318_vm2, %v909_v39, %v913_v40  ;;  %v928_v53 = vsel %vm3318_vm2, %v923_v41, %v927_v42  ;;  %v947_v55 = vshll.u32 %v840_v46, 16  ;;  %v2957_v41 = vld [vmem:[%s3699_s1 + $0x150] sm:$0xff] }
  0x65   : > { %1834 = vmatpush.bf16.msrb.mxu3 %v2985_v59  ;;  %v2899_v59 = vld [vmem:[%s3287_s27 + $0x4] sm:$0xf0]  ;;  %v978_v63 = vunpack.c.l.b16 %v914_v52  ;;  %v979_v0 = vunpack.c.l.b16 %v928_v53  ;;  %v2989_v52 = vld [vmem:[%s3699_s1 + $0x210] sm:$0xff]  ;;  %v2394_v53 = vld [vmem:[%s3287_s27 + $0x20] sm:$0xf] }
  0x66   : > { %v949_v4 = vrot.slane %v947_v55, 5  ;;  %v2901_v55 = vld [vmem:[%s3287_s27 + $0x24] sm:$0xf0] }
  0x67   : > { %799 = vmatpush.bf16.msrb.mxu1 %v2908_v54  ;;  %1314 = vmatpush.bf16.msrb.mxu0 %v2952_v61  ;;  %v944_v54 = vshrl.u32 %v840_v46, 16  ;;  %v2578_v61 = vld [vmem:[%s3287_s27 + $0xd8] sm:$0xf]  ;;  %v984_v11 = vpack.c.b16 %v979_v0, %v978_v63  ;;  %v2934_v46 = vld [vmem:[%s3287_s27 + $0xc4] sm:$0xf0] }
  0x68   : > { %1698 = vmatpush.bf16.msrb.mxu2 %v2972_v62  ;;  %v2943_v62 = vld [vmem:[%s3287_s27 + $0xdc] sm:$0xf0]  ;;  %v2786_v63 = vld [vmem:[%s3287_s27 + $0x50] sm:$0xf]  ;;  %v2975_v0 = vld [vmem:[%s3287_s27 + $0x54] sm:$0xf0] }
  0x69   : > { %1835 = vmatpush.bf16.msrb.mxu3 %v2984_v7  ;;  %v946_v3 = vrot.slane %v944_v54, 4  ;;  %v841_v7 = vld [vmem:[%s3287_s27 + $0x3c] sm:$0x1]  ;;  %v2988_v54 = vld [vmem:[%s3699_s1 + $0x208] sm:$0xff] }
  0x6a   : > { %v953_v18 = vshll.u32 %v841_v7, 16 }
  0x6b   : > { %800 = vmatpush.bf16.msrb.mxu1 %v2907_v2  ;;  %1315 = vmatpush.bf16.msrb.mxu0 %v2951_v8  ;;  %v935_v2 = vrot.slane %v933_v49, 5  ;;  %v2387_v8 = vor.u32 %v2899_v59, %v2386_v58  ;;  %v950_v17 = vor.u32 %v949_v4, %v946_v3  ;;  %v2979_v49 = vld [vmem:[%s3699_s1 + $0x1c0] sm:$0xff]  ;;  %v2714_v58 = vld [vmem:[%s3287_s27 + $0x8] sm:$0xf]  ;;  %v2963_v59 = vld [vmem:[%s3287_s27 + $0xc] sm:$0xf0] }
  0x6c   : > { %1699 = vmatpush.bf16.msrb.mxu2 %v2971_v9  ;;  %v2579_v9 = vor.u32 %v2943_v62, %v2578_v61  ;;  %v2715_v62 = vor.u32 %v2963_v59, %v2714_v58  ;;  %v2624_v3 = vld [vmem:[%s3287_s27 + $0x90] sm:$0xf]  ;;  %v2626_v4 = vld [vmem:[%s3287_s27 + $0x98] sm:$0xf] }
  0x6d   : > { %1836 = vmatpush.bf16.msrb.mxu3 %v2983_v43  ;;  %v936_v14 = vor.u32 %v935_v2, %v932_v1  ;;  %v951_v24 = vrot.slane %v950_v17, 4  ;;  %v2787_v1 = vor.u32 %v2975_v0, %v2786_v63  ;;  %v2987_v2 = vld [vmem:[%s3699_s1 + $0x200] sm:$0xff]  ;;  %v1366_v7 = vshrl.u32 %v2624_v3, 16  ;;  %v2902_v17 = vld [vmem:[%s3287_s27 + $0x34] sm:$0xf0] }
  0x6e   : > { %719 = vmatmul.bf16.gmra.mxu1 %v2351_v25  ;;  %709 = vmatmul.bf16.gmra.mxu0 %v2343_v26  ;;  %v955_v25 = vrot.slane %v953_v18, 5  ;;  %v2967_v26 = vld [vmem:[%s3699_s1 + $0x180] sm:$0xff]  ;;  %v2590_v18 = vld [vmem:[%s3287_s27 + $0x108] sm:$0xf] }
  0x6f   : > { %801 = vmatpush.bf16.msrb.mxu1 %v2906_v19  ;;  %1316 = vmatpush.bf16.msrb.mxu0 %v2950_v22  ;;  %v2960_v19 = vld [vmem:[%s3699_s1 + $0x168] sm:$0xff]  ;;  %v937_v22 = vrot.slane %v936_v14, 4  ;;  %v1901_v14 = vshrl.u32 %v2834_v6, 16 }
  0x70   : > { %1700 = vmatpush.bf16.msrb.mxu2 %v2970_v37  ;;  %1188 = vmatmul.bf16.gmra.mxu3 %v2511_v36  ;;  %v956_v33 = vsel %vm3318_vm2, %v951_v24, %v955_v25  ;;  %v2900_v36 = vld [vmem:[%s3287_s27 + $0x14] sm:$0xf0]  ;;  %v2582_v37 = vld [vmem:[%s3287_s27 + $0xe8] sm:$0xf] }
  0x71   : > { %1051 = vmatmul.bf16.gmra.mxu2 %v983_v27  ;;  %1837 = vmatpush.bf16.msrb.mxu3 %v2982_v50  ;;  %v2981_v27 = vld [vmem:[%s3699_s1 + $0x1d0] sm:$0xff]  ;;  %v942_v32 = vsel %vm3318_vm2, %v937_v22, %v941_v23  ;;  %v981_v40 = vunpack.c.l.b16 %v956_v33  ;;  %v2990_v50 = vld [vmem:[%s3699_s1 + $0x218] sm:$0xff]  ;;  %v1368_v23 = vrot.slane %v1366_v7, 4 }
  0x72   : > { %v980_v39 = vunpack.c.l.b16 %v942_v32  ;;  %v2627_v22 = vld [vmem:[%s3287_s27 + $0x9c] sm:$0x1]  ;;  %v2833_v32 = vld [vmem:[%s3287_s27 + $0xc] sm:$0x1]  ;;  %v2835_v33 = vld [vmem:[%s3287_s27 + $0x14] sm:$0x1] }
  0x73   : > { %802 = vmatpush.bf16.msrb.mxu1 %v2905_v31  ;;  %1317 = vmatpush.bf16.msrb.mxu0 %v2949_v35  ;;  %v2991_v31 = vld [vmem:[%s3699_s1 + $0x220] sm:$0xff]  ;;  %v2390_v35 = vld [vmem:[%s3287_s27 + $0x10] sm:$0xf] }
  0x74   : > { %1701 = vmatpush.bf16.msrb.mxu2 %v2969_v47  ;;  %v2391_v42 = vor.u32 %v2900_v36, %v2390_v35  ;;  %v985_v44 = vpack.c.b16 %v981_v40, %v980_v39  ;;  %v1389_v36 = vshll.u32 %v2627_v22, 16 }
  0x75   : > { %1838 = vmatpush.bf16.msrb.mxu3 %v2981_v27  ;;  %v2964_v27 = vld [vmem:[%s3287_s27 + $0x1c] sm:$0xf0] }
  0x77   : > { %803 = vmatpush.bf16.msrb.mxu1 %v2904_v38  ;;  %1318 = vmatpush.bf16.msrb.mxu0 %v2948_v45  ;;  %v2944_v38 = vld [vmem:[%s3287_s27 + $0xec] sm:$0xf0]  ;;  %v2518_v45 = vld [vmem:[%s3287_s27 + $0xc0] sm:$0xf] }
  0x78   : > { %1702 = vmatpush.bf16.msrb.mxu2 %v2968_v20  ;;  %v2583_v43 = vor.u32 %v2944_v38, %v2582_v37  ;;  %v2519_v47 = vor.u32 %v2934_v46, %v2518_v45  ;;  %v2718_v20 = vld [vmem:[%s3287_s27 + $0x18] sm:$0xf]  ;;  %v1910_v46 = vshll.u32 %v2835_v33, 16 }
  0x79   : > { %1839 = vmatpush.bf16.msrb.mxu3 %v2980_v30  ;;  %v1903_v30 = vrot.slane %v1901_v14, 4  ;;  %v2719_v38 = vor.u32 %v2964_v27, %v2718_v20  ;;  %v2631_v14 = vld [vmem:[%s3287_s27 + $0xac] sm:$0x1] }
  0x7a   : > { %v1912_v59 = vrot.slane %v1910_v46, 5 }
  0x7b   : > { %804 = vmatpush.bf16.msrb.mxu1 %v2903_v51  ;;  %1319 = vmatpush.bf16.msrb.mxu0 %v2947_v57  ;;  %v2955_v51 = vld [vmem:[%s3699_s1 + $0x140] sm:$0xff] }
  0x7c   : > { %1703 = vmatpush.bf16.msrb.mxu2 %v2967_v26  ;;  %v2945_v57 = vld [vmem:[%s3287_s27 + $0xfc] sm:$0xf0] }
  0x7d   : > { %1840 = vmatpush.bf16.msrb.mxu3 %v2979_v49  ;;  %v2628_v49 = vld [vmem:[%s3287_s27 + $0xa0] sm:$0xf] }
  0x7e   : > { %805 = vmatmul.bf16.vlgmr.msrb.gmra.mxu1 %v2387_v8  ;;  %1320 = vmatmul.bf16.vlgmr.msrb.gmra.mxu0 %v2579_v9  ;;  %v1369_v8 = vshll.u32 %v2624_v3, 16  ;;  %v1380_v9 = vshrl.u32 %v2626_v4, 16 }
  0x7f   : > { %1558 = vmatpush.bf16.msra.mxu1 %v2962_v56  ;;  %2079 = vmatpush.bf16.msra.mxu0 %v2994_v60  ;;  %v2586_v56 = vld [vmem:[%s3287_s27 + $0xf8] sm:$0xf] }
  0x80   : > { %1193 = vmatmul.bf16.gmra.mxu3 %v2515_v21  ;;  %3026 = vmatpush.bf16.msra.mxu2 %v2994_v60  ;;  %v2395_v60 = vor.u32 %v2901_v55, %v2394_v53  ;;  %v2587_v61 = vor.u32 %v2945_v57, %v2586_v56  ;;  %v2625_v21 = vld [vmem:[%s3287_s27 + $0x94] sm:$0x1]  ;;  %v1371_v24 = vrot.slane %v1369_v8, 5  ;;  %v1382_v25 = vrot.slane %v1380_v9, 4  ;;  %v2838_v55 = vld [vmem:[%s3287_s27 + $0x20] sm:$0xf] }
  0x81   : > { %1056 = vmatmul.bf16.gmra.mxu2 %v984_v11  ;;  %v1383_v11 = vshll.u32 %v2626_v4, 16  ;;  %v1375_v35 = vshll.u32 %v2625_v21, 16  ;;  %v1932_v3 = vshll.u32 %v2838_v55, 16  ;;  %v2629_v8 = vld [vmem:[%s3287_s27 + $0xa4] sm:$0x1] }
  0x82   : > { %v1372_v39 = vor.u32 %v1371_v24, %v1368_v23  ;;  %v2837_v23 = vld [vmem:[%s3287_s27 + $0x1c] sm:$0x1]  ;;  %v2839_v24 = vld [vmem:[%s3287_s27 + $0x24] sm:$0x1] }
  0x83   : > { %1559 = vmatpush.bf16.msra.mxu1 %v2961_v5  ;;  %2080 = vmatpush.bf16.msra.mxu0 %v2993_v15  ;;  %v2832_v5 = vld [vmem:[%s3287_s27 + $0x8] sm:$0xf]  ;;  %v1385_v26 = vrot.slane %v1383_v11, 5 }
  0x84   : > { %3027 = vmatpush.bf16.msra.mxu2 %v2993_v15  ;;  %v1887_v12 = vshrl.u32 %v2832_v5, 16  ;;  %v1890_v13 = vshll.u32 %v2832_v5, 16  ;;  %v1904_v15 = vshll.u32 %v2834_v6, 16 }
  0x85   : > { %v1386_v40 = vor.u32 %v1385_v26, %v1382_v25  ;;  %v2722_v25 = vld [vmem:[%s3287_s27 + $0x28] sm:$0xf]  ;;  %v2965_v26 = vld [vmem:[%s3287_s27 + $0x2c] sm:$0xf0] }
  0x87   : > { %1560 = vmatpush.bf16.msra.mxu1 %v2960_v19  ;;  %2081 = vmatpush.bf16.msra.mxu0 %v2992_v28  ;;  %v2946_v19 = vld [vmem:[%s3287_s27 + $0x10c] sm:$0xf0] }
  0x88   : > { %3028 = vmatpush.bf16.msra.mxu2 %v2992_v28  ;;  %v1889_v28 = vrot.slane %v1887_v12, 4  ;;  %v2591_v37 = vor.u32 %v2946_v19, %v2590_v18  ;;  %v1934_v18 = vrot.slane %v1932_v3, 5 }
  0x8b   : > { %1561 = vmatpush.bf16.msra.mxu1 %v2959_v29  ;;  %2082 = vmatpush.bf16.msra.mxu0 %v2991_v31  ;;  %v1892_v29 = vrot.slane %v1890_v13, 5 }
  0x8c   : > { %3029 = vmatpush.bf16.msra.mxu2 %v2991_v31  ;;  %v1906_v31 = vrot.slane %v1904_v15, 5 }
  0x8e   : > { %810 = vmatmul.bf16.gmra.mxu1 %v2391_v42  ;;  %1325 = vmatmul.bf16.gmra.mxu0 %v2583_v43  ;;  %v2976_v42 = vld [vmem:[%s3287_s27 + $0x64] sm:$0xf0]  ;;  %v1893_v43 = vor.u32 %v1892_v29, %v1889_v28  ;;  %v1907_v45 = vor.u32 %v1906_v31, %v1903_v30  ;;  %v1403_v28 = vshll.u32 %v2629_v8, 16  ;;  %v1417_v30 = vshll.u32 %v2631_v14, 16  ;;  %v2633_v14 = vld [vmem:[%s3287_s27 + $0xb4] sm:$0x1] }
  0x8f   : > { %1562 = vmatpush.bf16.msra.mxu1 %v2958_v34  ;;  %2083 = vmatpush.bf16.msra.mxu0 %v2990_v50  ;;  %v2399_v34 = vor.u32 %v2902_v17, %v2398_v16 }
  0x90   : > { %1198 = vmatmul.bf16.gmra.mxu3 %v2519_v47  ;;  %3030 = vmatpush.bf16.msra.mxu2 %v2990_v50  ;;  %v1377_v47 = vrot.slane %v1375_v35, 5  ;;  %v2630_v50 = vld [vmem:[%s3287_s27 + $0xa8] sm:$0xf]  ;;  %v1894_v56 = vrot.slane %v1893_v43, 4  ;;  %v1908_v58 = vrot.slane %v1907_v45, 4  ;;  %v1419_v43 = vrot.slane %v1417_v30, 5 }
  0x91   : > { %1061 = vmatmul.bf16.gmra.mxu2 %v985_v44  ;;  %v1896_v44 = vshll.u32 %v2833_v32, 16  ;;  %v1411_v63 = vshll.u32 %v2630_v50, 16  ;;  %v1924_v32 = vshll.u32 %v2837_v23, 16  ;;  %v2726_v23 = vld [vmem:[%s3287_s27 + $0x38] sm:$0xf] }
  0x92   : > { %v1913_v7 = vsel %vm3318_vm2, %v1908_v58, %v1912_v59  ;;  %v2845_v30 = vld [vmem:[%s3287_s27 + $0x3c] sm:$0x1] }
  0x93   : > { %1563 = vmatpush.bf16.msra.mxu1 %v2957_v41  ;;  %2084 = vmatpush.bf16.msra.mxu0 %v2989_v52  ;;  %v2790_v41 = vld [vmem:[%s3287_s27 + $0x60] sm:$0xf]  ;;  %v1898_v57 = vrot.slane %v1896_v44, 5  ;;  %v1413_v13 = vrot.slane %v1411_v63, 5  ;;  %v2016_v22 = vunpack.c.l.b16 %v1913_v7  ;;  %v1926_v45 = vrot.slane %v1924_v32, 5 }
  0x94   : > { %3031 = vmatpush.bf16.msra.mxu2 %v2989_v52  ;;  %v1387_v52 = vrot.slane %v1386_v40, 4  ;;  %v2791_v53 = vor.u32 %v2976_v42, %v2790_v41  ;;  %v1405_v41 = vrot.slane %v1403_v28, 5  ;;  %v2966_v28 = vld [vmem:[%s3287_s27 + $0x3c] sm:$0xf0] }
  0x95   : > { %v1899_v6 = vsel %vm3318_vm2, %v1894_v56, %v1898_v57  ;;  %v2844_v57 = vld [vmem:[%s3287_s27 + $0x38] sm:$0xf] }
  0x96   : > { %v2015_v21 = vunpack.c.l.b16 %v1899_v6  ;;  %v1974_v6 = vshll.u32 %v2844_v57, 16 }
  0x97   : > { %1564 = vmatpush.bf16.msra.mxu1 %v2956_v48  ;;  %2085 = vmatpush.bf16.msra.mxu0 %v2988_v54  ;;  %v1391_v48 = vrot.slane %v1389_v36, 5 }
  0x98   : > { %3032 = vmatpush.bf16.msra.mxu2 %v2988_v54  ;;  %v2836_v54 = vld [vmem:[%s3287_s27 + $0x18] sm:$0xf]  ;;  %v2023_v36 = vpack.c.b16 %v2016_v22, %v2015_v21 }
  0x99   : > { %v1915_v0 = vshrl.u32 %v2836_v54, 16  ;;  %v1392_v5 = vsel %vm3318_vm2, %v1387_v52, %v1391_v48  ;;  %v2632_v48 = vld [vmem:[%s3287_s27 + $0xb0] sm:$0xf] }
  0x9a   : > { %v1495_v20 = vunpack.c.l.b16 %v1392_v5  ;;  %v2842_v52 = vld [vmem:[%s3287_s27 + $0x30] sm:$0xf]  ;;  %v1425_v56 = vshll.u32 %v2632_v48, 16  ;;  %v1971_v5 = vshrl.u32 %v2844_v57, 16 }
  0x9b   : > { %1565 = vmatpush.bf16.msra.mxu1 %v2955_v51  ;;  %2086 = vmatpush.bf16.msra.mxu0 %v2987_v2  ;;  %v1373_v51 = vrot.slane %v1372_v39, 4  ;;  %v1917_v15 = vrot.slane %v1915_v0, 4  ;;  %v2977_v39 = vld [vmem:[%s3287_s27 + $0x74] sm:$0xf0] }
  0x9c   : > { %3033 = vmatpush.bf16.msra.mxu2 %v2987_v2  ;;  %v1929_v2 = vshrl.u32 %v2838_v55, 16  ;;  %v1422_v55 = vshrl.u32 %v2632_v48, 16  ;;  %v1427_v8 = vrot.slane %v1425_v56, 5 }
  0x9d   : > { %v1378_v4 = vsel %vm3318_vm2, %v1373_v51, %v1377_v47  ;;  %v2840_v51 = vld [vmem:[%s3287_s27 + $0x28] sm:$0xf] }
  0x9e   : > { %815 = vmatmul.bf16.gmra.mxu1 %v2395_v60  ;;  %1330 = vmatmul.bf16.gmra.mxu0 %v2587_v61  ;;  %v1394_v60 = vshrl.u32 %v2628_v49, 16  ;;  %v1397_v61 = vshll.u32 %v2628_v49, 16  ;;  %v1931_v17 = vrot.slane %v1929_v2, 4  ;;  %v1494_v19 = vunpack.c.l.b16 %v1378_v4 }
  0x9f   : > { %v1943_v63 = vshrl.u32 %v2840_v51, 16  ;;  %v1946_v0 = vshll.u32 %v2840_v51, 16  ;;  %v1960_v2 = vshll.u32 %v2842_v52, 16  ;;  %v1424_v7 = vrot.slane %v1422_v55, 4 }
  0xa0   : > { %1841 = vmatmul.bf16.vlgmr.msrb.gmra.mxu3 %v2787_v1  ;;  %v1918_v1 = vshll.u32 %v2836_v54, 16  ;;  %v1396_v9 = vrot.slane %v1394_v60, 4  ;;  %v1399_v11 = vrot.slane %v1397_v61, 5  ;;  %v1935_v33 = vor.u32 %v1934_v18, %v1931_v17  ;;  %v2841_v18 = vld [vmem:[%s3287_s27 + $0x2c] sm:$0x1] }
  0xa1   : > { %1704 = vmatmul.bf16.vlgmr.msrb.gmra.mxu2 %v2715_v62  ;;  %v1408_v62 = vshrl.u32 %v2630_v50, 16  ;;  %v1502_v35 = vpack.c.b16 %v1495_v20, %v1494_v19  ;;  %v2634_v50 = vld [vmem:[%s3287_s27 + $0xb8] sm:$0xf]  ;;  %v1945_v19 = vrot.slane %v1943_v63, 4  ;;  %v1948_v20 = vrot.slane %v1946_v0, 5 }
  0xa2   : > { %v1920_v16 = vrot.slane %v1918_v1, 5  ;;  %v1400_v27 = vor.u32 %v1399_v11, %v1396_v9  ;;  %v1936_v46 = vrot.slane %v1935_v33, 4  ;;  %v1436_v60 = vshrl.u32 %v2634_v50, 16  ;;  %v2638_v63 = vld [vmem:[%s3287_s27 + $0xc8] sm:$0xf] }
  0xa3   : > { %v1410_v12 = vrot.slane %v1408_v62, 4  ;;  %v1439_v61 = vshll.u32 %v2634_v50, 16  ;;  %v2846_v62 = vld [vmem:[%s3287_s27 + $0x40] sm:$0xf]  ;;  %v1957_v1 = vshrl.u32 %v2842_v52, 16  ;;  %v1962_v22 = vrot.slane %v1960_v2, 5 }
  0xa4   : > { %v1921_v31 = vor.u32 %v1920_v16, %v1917_v15  ;;  %v1401_v40 = vrot.slane %v1400_v27, 4  ;;  %v1985_v9 = vshrl.u32 %v2846_v62, 16  ;;  %v1988_v11 = vshll.u32 %v2846_v62, 16  ;;  %v2635_v15 = vld [vmem:[%s3287_s27 + $0xbc] sm:$0x1] }
  0xa5   : > { %v1414_v29 = vor.u32 %v1413_v13, %v1410_v12  ;;  %v1438_v16 = vrot.slane %v1436_v60, 4  ;;  %v1441_v17 = vrot.slane %v1439_v61, 5  ;;  %v1959_v21 = vrot.slane %v1957_v1, 4  ;;  %v2636_v60 = vld [vmem:[%s3287_s27 + $0xc0] sm:$0xf] }
  0xa6   : > { %v1922_v44 = vrot.slane %v1921_v31, 4  ;;  %v1987_v31 = vrot.slane %v1985_v9, 4  ;;  %v1990_v32 = vrot.slane %v1988_v11, 5  ;;  %v1431_v33 = vshll.u32 %v2633_v14, 16 }
  0xa7   : > { %v1415_v42 = vrot.slane %v1414_v29, 4  ;;  %v1428_v29 = vor.u32 %v1427_v8, %v1424_v7  ;;  %v1464_v7 = vshrl.u32 %v2638_v63, 16  ;;  %v1467_v8 = vshll.u32 %v2638_v63, 16 }
  0xa8   : > { %v1927_v58 = vsel %vm3318_vm2, %v1922_v44, %v1926_v45  ;;  %v2978_v44 = vld [vmem:[%s3287_s27 + $0x84] sm:$0xf0]  ;;  %v1991_v48 = vor.u32 %v1990_v32, %v1987_v31  ;;  %v1433_v50 = vrot.slane %v1431_v33, 5 }
  0xa9   : > { %v1420_v54 = vsel %vm3318_vm2, %v1415_v42, %v1419_v43  ;;  %v2017_v12 = vunpack.c.l.b16 %v1927_v58  ;;  %v2727_v42 = vor.u32 %v2966_v28, %v2726_v23  ;;  %v2798_v43 = vld [vmem:[%s3287_s27 + $0x80] sm:$0xf] }
  0xaa   : > { %v1497_v4 = vunpack.c.l.b16 %v1420_v54  ;;  %v2799_v54 = vor.u32 %v2978_v44, %v2798_v43  ;;  %v1992_v61 = vrot.slane %v1991_v48, 4 }
  0xae   : > { %820 = vmatmul.bf16.gmra.mxu1 %v2399_v34  ;;  %1335 = vmatmul.bf16.gmra.mxu0 %v2591_v37  ;;  %v1938_v34 = vshll.u32 %v2839_v24, 16  ;;  %v2723_v37 = vor.u32 %v2965_v26, %v2722_v25  ;;  %v2843_v24 = vld [vmem:[%s3287_s27 + $0x34] sm:$0x1]  ;;  %v1973_v25 = vrot.slane %v1971_v5, 4  ;;  %v1976_v26 = vrot.slane %v1974_v6, 5 }
  0xaf   : > { %v1453_v6 = vshll.u32 %v2636_v60, 16 }
  0xb0   : > { %1846 = vmatmul.bf16.gmra.mxu3 %v2791_v53  ;;  %v1940_v47 = vrot.slane %v1938_v34, 5  ;;  %v1406_v53 = vsel %vm3318_vm2, %v1401_v40, %v1405_v41  ;;  %v1442_v34 = vor.u32 %v1441_v17, %v1438_v16  ;;  %v1963_v40 = vor.u32 %v1962_v22, %v1959_v21  ;;  %v2639_v22 = vld [vmem:[%s3287_s27 + $0xcc] sm:$0x1] }
  0xb1   : > { %1709 = vmatmul.bf16.gmra.mxu2 %v2719_v38  ;;  %v2794_v38 = vld [vmem:[%s3287_s27 + $0x70] sm:$0xf]  ;;  %v1496_v3 = vunpack.c.l.b16 %v1406_v53  ;;  %v1966_v41 = vshll.u32 %v2843_v24, 16  ;;  %v1977_v45 = vor.u32 %v1976_v26, %v1973_v25  ;;  %v1469_v21 = vrot.slane %v1467_v8, 5 }
  0xb2   : > { %v2795_v49 = vor.u32 %v2977_v39, %v2794_v38  ;;  %v1941_v59 = vsel %vm3318_vm2, %v1936_v46, %v1940_v47  ;;  %v1949_v39 = vor.u32 %v1948_v20, %v1945_v19  ;;  %v1980_v46 = vshll.u32 %v2845_v30, 16 }
  0xb3   : > { %v2018_v13 = vunpack.c.l.b16 %v1941_v59  ;;  %v1503_v27 = vpack.c.b16 %v1497_v4, %v1496_v3  ;;  %v1429_v47 = vrot.slane %v1428_v29, 4  ;;  %v1443_v51 = vrot.slane %v1442_v34, 4 }
  0xb4   : > { %v1950_v55 = vrot.slane %v1949_v39, 4  ;;  %v1964_v56 = vrot.slane %v1963_v40, 4  ;;  %v1968_v57 = vrot.slane %v1966_v41, 5  ;;  %v1978_v58 = vrot.slane %v1977_v45, 4 }
  0xb5   : > { %v2024_v38 = vpack.c.b16 %v2018_v13, %v2017_v12  ;;  %v1982_v59 = vrot.slane %v1980_v46, 5  ;;  %v1434_v0 = vsel %vm3318_vm2, %v1429_v47, %v1433_v50  ;;  %v1450_v4 = vshrl.u32 %v2636_v60, 16 }
  0xb6   : > { %v1969_v3 = vsel %vm3318_vm2, %v1964_v56, %v1968_v57  ;;  %v1498_v11 = vunpack.c.l.b16 %v1434_v0  ;;  %v1455_v19 = vrot.slane %v1453_v6, 5  ;;  %v1466_v20 = vrot.slane %v1464_v7, 4 }
  0xb7   : > { %v1983_v5 = vsel %vm3318_vm2, %v1978_v58, %v1982_v59  ;;  %v2020_v14 = vunpack.c.l.b16 %v1969_v3  ;;  %v1452_v16 = vrot.slane %v1450_v4, 4  ;;  %v1473_v31 = vshll.u32 %v2639_v22, 16 }
  0xb8   : > { %v1470_v30 = vor.u32 %v1469_v21, %v1466_v20 }
  0xb9   : > { %v1456_v29 = vor.u32 %v1455_v19, %v1452_v16 }
  0xba   : > { %v1471_v34 = vrot.slane %v1470_v30, 4 }
  0xbb   : > { %v1457_v32 = vrot.slane %v1456_v29, 4 }
  0xbe   : > { %1566 = vmatmul.bf16.vlgmr.msra.gmra.mxu1 %v1502_v35  ;;  %2087 = vmatmul.bf16.vlgmr.msra.gmra.mxu0 %v2023_v36  ;;  %v1445_v35 = vshll.u32 %v2635_v15, 16  ;;  %v1952_v36 = vshll.u32 %v2841_v18, 16  ;;  %v2021_v15 = vunpack.c.l.b16 %v1983_v5  ;;  %v2637_v18 = vld [vmem:[%s3287_s27 + $0xc4] sm:$0x1] }
  0xbf   : > { %v1459_v25 = vshll.u32 %v2637_v18, 16 }
  0xc0   : > { %1851 = vmatmul.bf16.gmra.mxu3 %v2795_v49  ;;  %v1447_v52 = vrot.slane %v1445_v35, 5  ;;  %v1954_v53 = vrot.slane %v1952_v36, 5  ;;  %v1475_v35 = vrot.slane %v1473_v31, 5 }
  0xc1   : > { %1714 = vmatmul.bf16.gmra.mxu2 %v2723_v37  ;;  %v2847_v37 = vld [vmem:[%s3287_s27 + $0x44] sm:$0x1]  ;;  %v1461_v33 = vrot.slane %v1459_v25, 5 }
  0xc2   : > { %v1994_v49 = vshll.u32 %v2847_v37, 16  ;;  %v1448_v1 = vsel %vm3318_vm2, %v1443_v51, %v1447_v52  ;;  %v1955_v2 = vsel %vm3318_vm2, %v1950_v55, %v1954_v53  ;;  %v1476_v40 = vsel %vm3318_vm2, %v1471_v34, %v1475_v35 }
  0xc3   : > { %v1499_v12 = vunpack.c.l.b16 %v1448_v1  ;;  %v2019_v13 = vunpack.c.l.b16 %v1955_v2  ;;  %v1462_v39 = vsel %vm3318_vm2, %v1457_v32, %v1461_v33  ;;  %v1501_v43 = vunpack.c.l.b16 %v1476_v40 }
  0xc4   : > { %v1996_v62 = vrot.slane %v1994_v49, 5 }
  0xc5   : > { %v1504_v23 = vpack.c.b16 %v1499_v12, %v1498_v11  ;;  %v2025_v24 = vpack.c.b16 %v2020_v14, %v2019_v13 }
  0xc6   : > { %v1997_v9 = vsel %vm3318_vm2, %v1992_v61, %v1996_v62 }
  0xc7   : > { %v2022_v17 = vunpack.c.l.b16 %v1997_v9 }
  0xc9   : > { %v2026_v28 = vpack.c.b16 %v2022_v17, %v2021_v15 }
  0xce   : > { %1571 = vmatmul.bf16.gmra.mxu1 %v1503_v27  ;;  %2092 = vmatmul.bf16.gmra.mxu0 %v2024_v38 }
  0xd0   : > { %1856 = vmatmul.bf16.gmra.mxu3 %v2799_v54 }
  0xd1   : > { %1719 = vmatmul.bf16.gmra.mxu2 %v2727_v42  ;;  %v1500_v42 = vunpack.c.l.b16 %v1462_v39 }
  0xd3   : > { %v1505_v44 = vpack.c.b16 %v1501_v43, %v1500_v42 }
  0xdb   : > { %v715_v26 = vpop.f32.mrf.mxu1  ;;  %v705_v27 = vpop.f32.mrf.mxu0 }
  0xde   : > { %1576 = vmatmul.bf16.gmra.mxu1 %v1504_v23  ;;  %2097 = vmatmul.bf16.gmra.mxu0 %v2025_v24 }
  0xe1   : > { %2102 = vmatmul.bf16.vlgmr.msra.gmra.mxu2 %v2026_v28 }
  0xe3   : > { %v717_v37 = vpop.f32.mrf.mxu1  ;;  %v707_v38 = vpop.f32.mrf.mxu0 }
  0xe4   : > { %v1047_v36 = vpop.f32.mrf.mxu2  ;;  %v1184_v41 = vpop.f32.mrf.mxu3 }
  0xeb   : > { %v720_v46 = vpop.f32.mrf.mxu1  ;;  %v710_v47 = vpop.f32.mrf.mxu0 }
  0xec   : > { %v1049_v45 = vpop.f32.mrf.mxu2  ;;  %v3626_v48 = vpop.f32.mrf.mxu3 }
  0xee   : > { %1581 = vmatmul.bf16.gmra.mxu1 %v1505_v44 }
  0xf3   : > { %v722_v50 = vpop.f32.mrf.mxu1  ;;  %v712_v51 = vpop.f32.mrf.mxu0 }
  0xf4   : > { %v1052_v49 = vpop.f32.mrf.mxu2  ;;  %v1189_v52 = vpop.f32.mrf.mxu3 }
  0xfb   : > { %v806_v54 = vpop.f32.mrf.mxu1  ;;  %v1321_v55 = vpop.f32.mrf.mxu0 }
  0xfc   : > { %v1054_v53 = vpop.f32.mrf.mxu2  ;;  %v807_v56 = vadd.f32 %v806_v54, %v705_v27  ;;  %v3628_v57 = vpop.f32.mrf.mxu3 }
  0xfe   : > { %v1067_v10 = vadd.f32 %v1047_v36, %v807_v56 }
 0x100   : > { %v1204_v58 = vadd.f32 %v1184_v41, %v1067_v10 }
 0x102   : > { %v1341_v59 = vadd.f32 %v1321_v55, %v1204_v58 }
 0x103   : > { %v808_v61 = vpop.f32.mrf.mxu1  ;;  %v1323_v62 = vpop.f32.mrf.mxu0 }
 0x104   : > { %v1057_v60 = vpop.f32.mrf.mxu2  ;;  %v809_v63 = vadd.f32 %v808_v61, %v707_v38  ;;  %v1194_v1 = vpop.f32.mrf.mxu3 }
 0x106   : > { %v1068_v0 = vadd.f32 %v1049_v45, %v809_v63 }
 0x10b   : > { %v811_v3 = vpop.f32.mrf.mxu1  ;;  %v1326_v4 = vpop.f32.mrf.mxu0 }
 0x10c   : > { %v1059_v2 = vpop.f32.mrf.mxu2  ;;  %v812_v5 = vadd.f32 %v811_v3, %v710_v47  ;;  %v3630_v11 = vpop.f32.mrf.mxu3 }
 0x10e   : > { %v1069_v6 = vadd.f32 %v1052_v49, %v812_v5 }
 0x110   : > { %v1206_v7 = vadd.f32 %v1189_v52, %v1069_v6 }
 0x112   : > { %v1343_v8 = vadd.f32 %v1326_v4, %v1206_v7 }
 0x113   : > { %v813_v12 = vpop.f32.mrf.mxu1  ;;  %v3632_v13 = vpop.f32.mrf.mxu0 }
 0x114   : > { %v1062_v9 = vpop.f32.mrf.mxu2  ;;  %v814_v14 = vadd.f32 %v813_v12, %v712_v51  ;;  %v1199_v20 = vpop.f32.mrf.mxu3 }
 0x116   : > { %v1070_v15 = vadd.f32 %v1054_v53, %v814_v14 }
 0x118   : > { %v1207_v3 = vadd.f32 %v3628_v57, %v1070_v15 }
 0x11a   : > { %v1344_v14 = vadd.f32 %v3632_v13, %v1207_v3 }
 0x11b   : > { %v816_v17 = vpop.f32.mrf.mxu1  ;;  %v1331_v18 = vpop.f32.mrf.mxu0 }
 0x11c   : > { %v1064_v16 = vpop.f32.mrf.mxu2  ;;  %v817_v19 = vadd.f32 %v816_v17, %v715_v26  ;;  %v3640_v30 = vpop.f32.mrf.mxu3 }
 0x11e   : > { %v1071_v21 = vadd.f32 %v1057_v60, %v817_v19 }
 0x120   : > { %v1208_v22 = vadd.f32 %v1194_v1, %v1071_v21 }
 0x122   : > { %v3634_v23 = vadd.f32 %v1331_v18, %v1208_v22 }
 0x123   : > { %v818_v25 = vpop.f32.mrf.mxu1  ;;  %v3636_v27 = vpop.f32.mrf.mxu0 }
 0x124   : > { %v1705_v24 = vpop.f32.mrf.mxu2  ;;  %v819_v28 = vadd.f32 %v818_v25, %v717_v37  ;;  %v1842_v36 = vpop.f32.mrf.mxu3 }
 0x126   : > { %v3638_v29 = vadd.f32 %v1059_v2, %v819_v28 }
 0x12b   : > { %v821_v32 = vpop.f32.mrf.mxu1  ;;  %v1336_v33 = vpop.f32.mrf.mxu0 }
 0x12c   : > { %v1707_v31 = vpop.f32.mrf.mxu2  ;;  %v822_v34 = vadd.f32 %v821_v32, %v720_v46  ;;  %v1844_v43 = vpop.f32.mrf.mxu3  ;;  %v1205_v46 = vadd.f32 %v3626_v48, %v1068_v0  ;;  %v1209_v32 = vadd.f32 %v3630_v11, %v3638_v29 }
 0x12e   : > { %v1073_v35 = vadd.f32 %v1062_v9, %v822_v34  ;;  %v1342_v52 = vadd.f32 %v1323_v62, %v1205_v46 }
 0x130   : > { %v1210_v26 = vadd.f32 %v1199_v20, %v1073_v35 }
 0x132   : > { %v3642_v38 = vadd.f32 %v1336_v33, %v1210_v26 }
 0x133   : > { %v823_v40 = vpop.f32.mrf.mxu1  ;;  %v3644_v41 = vpop.f32.mrf.mxu0 }
 0x134   : > { %v1710_v39 = vpop.f32.mrf.mxu2  ;;  %v824_v42 = vadd.f32 %v823_v40, %v722_v50  ;;  %v1847_v10 = vpop.f32.mrf.mxu3  ;;  %v3653_v50 = vld [vmem:[%s3700_s2] ss:$0 sm:$0xff] }
 0x136   : > { %v3646_v37 = vadd.f32 %v1064_v16, %v824_v42 }
 0x13b   : > { %v1567_v44 = vpop.f32.mrf.mxu1  ;;  %v2088_v45 = vpop.f32.mrf.mxu0 }
 0x13c   : > { %v1587_v47 = vadd.f32 %v1567_v44, %v1341_v59  ;;  %v1712_v49 = vpop.f32.mrf.mxu2  ;;  %v1849_v7 = vpop.f32.mrf.mxu3 }
 0x13e   : > { %v1725_v51 = vadd.f32 %v1705_v24, %v1587_v47 }
 0x140   : > { %v1862_v53 = vadd.f32 %v1842_v36, %v1725_v51  ;;  %v1346_v36 = vadd.f32 %v3636_v27, %v1209_v32 }
 0x142   : > { %v2108_v58 = vadd.f32 %v2088_v45, %v1862_v53  ;;  %v1211_v53 = vadd.f32 %v3640_v30, %v3646_v37 }
 0x143   : > { %v1569_v54 = vpop.f32.mrf.mxu1  ;;  %v2090_v55 = vpop.f32.mrf.mxu0 }
 0x144   : > { %v1588_v56 = vadd.f32 %v1569_v54, %v1342_v52  ;;  %v1715_v61 = vpop.f32.mrf.mxu2  ;;  %v2120_v48 = vadd.f32 %v3653_v50, %v2108_v58  ;;  %v1852_v20 = vpop.f32.mrf.mxu3 }
 0x146   : > { %v1726_v60 = vadd.f32 %v1707_v31, %v1588_v56  ;;  %v2128_v4 = vmax.f32 %v2120_v48, 0.0 }
 0x148   : > { %v1863_v59 = vadd.f32 %v1844_v43, %v1726_v60  ;;  %v1348_v60 = vadd.f32 %v3644_v41, %v1211_v53 }
 0x14a   : > { %v2109_v63 = vadd.f32 %v2090_v55, %v1863_v59 }
 0x14b   : > { %v1572_v62 = vpop.f32.mrf.mxu1  ;;  %v2093_v0 = vpop.f32.mrf.mxu0 }
 0x14c   : > { %v2121_v1 = vadd.f32 %v3653_v50, %v2109_v63  ;;  %v1589_v2 = vadd.f32 %v1572_v62, %v1343_v8  ;;  %v1717_v12 = vpop.f32.mrf.mxu2  ;;  %v1854_v40 = vpop.f32.mrf.mxu3 }
 0x14e   : > { %v2129_v5 = vmax.f32 %v2121_v1, 0.0  ;;  %v1727_v6 = vadd.f32 %v1710_v39, %v1589_v2 }
 0x150   : > { %v2998_v9 = vpack.c.bf16 %v2129_v5, %v2128_v4  ;;  %v1864_v16 = vadd.f32 %v1847_v10, %v1727_v6 }
 0x152   : > { %2999 = vst [vmem:[%s3662_s11] sm:$0xff] %v2998_v9   ;;  %v2110_v57 = vadd.f32 %v2093_v0, %v1864_v16 }
 0x153   : > { %v1574_v17 = vpop.f32.mrf.mxu1  ;;  %v2095_v8 = vpop.f32.mrf.mxu0 }
 0x154   : > { %v1590_v18 = vadd.f32 %v1574_v17, %v1344_v14  ;;  %v2122_v21 = vadd.f32 %v3653_v50, %v2110_v57  ;;  %v1720_v24 = vpop.f32.mrf.mxu2  ;;  %v1857_v27 = vpop.f32.mrf.mxu3 }
 0x156   : > { %v1728_v15 = vadd.f32 %v1712_v49, %v1590_v18  ;;  %v2130_v33 = vmax.f32 %v2122_v21, 0.0 }
 0x158   : > { %v1865_v19 = vadd.f32 %v1849_v7, %v1728_v15 }
 0x15a   : > { %v2111_v22 = vadd.f32 %v2095_v8, %v1865_v19 }
 0x15b   : > { %v1577_v25 = vpop.f32.mrf.mxu1  ;;  %v2098_v13 = vpop.f32.mrf.mxu0 }
 0x15c   : > { %v2123_v28 = vadd.f32 %v3653_v50, %v2111_v22  ;;  %v1591_v31 = vadd.f32 %v1577_v25, %v3634_v23  ;;  %v1722_v44 = vpop.f32.mrf.mxu2  ;;  %v1859_v0 = vpop.f32.mrf.mxu3 }
 0x15e   : > { %v2131_v34 = vmax.f32 %v2123_v28, 0.0  ;;  %v1729_v35 = vadd.f32 %v1715_v61, %v1591_v31 }
 0x160   : > { %v3003_v26 = vpack.c.bf16 %v2131_v34, %v2130_v33  ;;  %v1866_v39 = vadd.f32 %v1852_v20, %v1729_v35 }
 0x162   : > { %3015 = vst [vmem:[%s3662_s11 + $0x8] sm:$0xff] %v3003_v26   ;;  %v2112_v45 = vadd.f32 %v2098_v13, %v1866_v39 }
 0x163   : > { %v1579_v42 = vpop.f32.mrf.mxu1  ;;  %v2100_v23 = vpop.f32.mrf.mxu0 }
 0x164   : > { %v1592_v43 = vadd.f32 %v1579_v42, %v1346_v36  ;;  %v2124_v46 = vadd.f32 %v3653_v50, %v2112_v45  ;;  %v2103_v10 = vpop.f32.mrf.mxu2 }
 0x166   : > { %v1730_v47 = vadd.f32 %v1717_v12, %v1592_v43  ;;  %v2132_v54 = vmax.f32 %v2124_v46, 0.0 }
 0x168   : > { %v1867_v49 = vadd.f32 %v1854_v40, %v1730_v47 }
 0x16a   : > { %v2113_v11 = vadd.f32 %v2100_v23, %v1867_v49 }
 0x16b   : > { %v1582_v29 = vpop.f32.mrf.mxu1 }
 0x16c   : > { %v2125_v51 = vadd.f32 %v3653_v50, %v2113_v11  ;;  %v1593_v52 = vadd.f32 %v1582_v29, %v3642_v38  ;;  %v2105_v1 = vpop.f32.mrf.mxu2 }
 0x16e   : > { %v2133_v55 = vmax.f32 %v2125_v51, 0.0  ;;  %v1731_v56 = vadd.f32 %v1720_v24, %v1593_v52 }
 0x170   : > { %v3008_v58 = vpack.c.bf16 %v2133_v55, %v2132_v54  ;;  %v1868_v61 = vadd.f32 %v1857_v27, %v1731_v56 }
 0x172   : > { %3016 = vst [vmem:[%s3662_s11 + $0x10] sm:$0xff] %v3008_v58   ;;  %v2114_v63 = vadd.f32 %v2103_v10, %v1868_v61 }
 0x173   : > { %v1584_v59 = vpop.f32.mrf.mxu1 }
 0x174   : > { %v1594_v48 = vadd.f32 %v1584_v59, %v1348_v60  ;;  %v2126_v2 = vadd.f32 %v3653_v50, %v2114_v63 }
 0x176   : > { %v1732_v62 = vadd.f32 %v1722_v44, %v1594_v48  ;;  %v2134_v3 = vmax.f32 %v2126_v2, 0.0 }
 0x178   : > { %v1869_v38 = vadd.f32 %v1859_v0, %v1732_v62 }
 0x17a   : > { %v2115_v30 = vadd.f32 %v2105_v1, %v1869_v38 }
 0x17c   : > { %v2127_v37 = vadd.f32 %v3653_v50, %v2115_v30 }
 0x17e   : > { %v2135_v4 = vmax.f32 %v2127_v37, 0.0 }
 0x180   : > { %v3013_v5 = vpack.c.bf16 %v2135_v4, %v2134_v3 }
 0x182   : > { %3017 = vst [vmem:[%s3662_s11 + $0x18] sm:$0xff] %v3013_v5  }
 0x183 PF: > { %s13_s16 = sadd.s32 1, %s3116_s16   ;;  %s3704_s12 = smov %s3104_s13 }
 0x184   : > { %p10_p10 = scmp.ge.s32.totalorder %s13_s16, 4   ;;  %s3705_s13 = smov %s3173_s20 }
 0x185   : > { %s3706_s14 = smov %s3112_s15  ;;  %s3707_s15 = smov %s3709_s17 }
 0x186   :  { %12 = sbr.rel (!%p10_p10) target bundleno = 3 (0x3), region = 128 }

// kernel: basic_block_forward.5
= control target key start
LH: loop header
LB: loop body
LE: loop exit
PB: predicated region body
PF: predicated region fallthrough
CT: control target
= control target key end

     0   :  { %s2908_s15 = smov 0   ;;  %s2910_s16 = smov 0   ;;  %s3568_s0 = inlined_call_operand.vmem [shape: bf16[1,2,10,10,128], index: 0, kind: input, shape index: {}]   ;;  %s3569_s1 = inlined_call_operand.vmem [shape: bf16[9,128,128], index: 1, kind: input, shape index: {}]   ;;  %s3570_s2 = inlined_call_operand.vmem [shape: f32[1,128], index: 2, kind: input, shape index: {}]   ;;  %s3571_s3 = inlined_call_operand.vmem [shape: f32[2,8,8,128], index: 3, kind: input, shape index: {}]   ;;  %s3572_s4 = inlined_call_operand.vmem [shape: f32[2,8,8,128], index: 4, kind: output, shape index: {}]  }
   0x1   :  { %s2912_s17 = smov 0  }
   0x2 LB: > { %s33_s18 = sadd.s32 1, %s2877_s16  ;;  %p2171_p0 = scmp.ge.s32.totalorder %s2881_s17, 1  ;;  %s2881_s17 = sphi %s2912_s17, %s14_s17   ;;  %s2877_s16 = sphi %s2910_s16, %s3578_s16   ;;  %s2873_s15 = sphi %s2908_s15, %s3577_s15  }
   0x3   : > { %p35_p1 = scmp.ge.s32.totalorder %s33_s18, 2  ;;  %p224_p2 = scmp.lt.s32.totalorder %s2881_s17, 3 }
   0x5   : > { %s3580_s18 = smov (%p35_p1, %s33_s18), 0  ;;  %p225_p3 = pnand %p2171_p0, %p224_p2 }
   0x6   : > { %p276_p4 = scmp.lt.s32.totalorder (!%p225_p3), %s2873_s15, 1 }
   0x7   : > { %228 = sbr.rel (%p225_p3) target bundleno = 337 (0x151), region = 36 }
   0xc   : > { %v2752_v0 = vld [vmem:[%s3569_s1 + $0x78] sm:$0xff]  ;;  %v2751_v2 = vld [vmem:[%s3569_s1 + $0x70] sm:$0xff]  ;;  %s3582_s15 = smov (!%p276_p4, %s2873_s15), 1  ;;  %v2750_v6 = vld [vmem:[%s3569_s1 + $0x68] sm:$0xff]  ;;  %vm350_vm0 = vsmask.f32 3328 }
   0xd   : > { %v2760_v1 = vld [vmem:[%s3569_s1 + $0xb8] sm:$0xff]  ;;  %2817 = vmatpush.bf16.msra.mxu1 %v2752_v0  ;;  %546 = vmatpush.bf16.msra.mxu0 %v2752_v0  ;;  %v2759_v3 = vld [vmem:[%s3569_s1 + $0xb0] sm:$0xff]  ;;  %s2833_s29 = smul.u32 80, %s3582_s15  ;;  %v2758_v7 = vld [vmem:[%s3569_s1 + $0xa8] sm:$0xff]  ;;  %vm351_vm1 = vsmask.f32 7440 }
   0xe   : > { %816 = vmatpush.bf16.msra.mxu2 %v2760_v1  ;;  %v2772_v4 = vld [vmem:[%s3569_s1 + $0xf8] sm:$0xff]  ;;  %v2771_v5 = vld [vmem:[%s3569_s1 + $0xf0] sm:$0xff]  ;;  %v2749_v11 = vld [vmem:[%s3569_s1 + $0x60] sm:$0xff]  ;;  %vm700_vm2 = vcmask 1042432   ;;  %vm701_vm3 = vcmask 1046532  }
   0xf   : > { %954 = vmatpush.bf16.msra.mxu3 %v2772_v4  ;;  %s2956_s12 = scalar_lea.vmem %s3568_s0, %s2833_s29  ;;  %v2757_v16 = vld [vmem:[%s3569_s1 + $0xa0] sm:$0xff]  ;;  %v2770_v17 = vld [vmem:[%s3569_s1 + $0xe8] sm:$0xff]  ;;  %v2748_v29 = vld [vmem:[%s3569_s1 + $0x58] sm:$0xff] }
  0x10   : > { %v322_v8 = vld [vmem:[%s2956_s12 + $0x20] sm:$0xf]  ;;  %v323_v9 = vld [vmem:[%s2956_s12 + $0x28] sm:$0xf]  ;;  %v2961_v10 = vld [vmem:[%s2956_s12 + $0x24] sm:$0x1] }
  0x11   : > { %2818 = vmatpush.bf16.msra.mxu1 %v2751_v2  ;;  %547 = vmatpush.bf16.msra.mxu0 %v2751_v2  ;;  %v2967_v12 = vld [vmem:[%s2956_s12 + $0x2c] sm:$0x1]  ;;  %v410_v13 = vshrl.u32 %v322_v8, 16  ;;  %v413_v14 = vshll.u32 %v322_v8, 16  ;;  %v424_v15 = vshrl.u32 %v323_v9, 16  ;;  %v427_v18 = vshll.u32 %v323_v9, 16  ;;  %vm2994_vm4 = vmor %vm350_vm0, %vm351_vm1 }
  0x12   : > { %817 = vmatpush.bf16.msra.mxu2 %v2759_v3  ;;  %v318_v19 = vld [vmem:[%s2956_s12] sm:$0xf]  ;;  %v419_v22 = vshll.u32 %v2961_v10, 16  ;;  %v319_v24 = vld [vmem:[%s2956_s12 + $0x8] sm:$0xf]  ;;  %v433_v26 = vshll.u32 %v2967_v12, 16  ;;  %vm3003_vm5 = vmor %vm700_vm2, %vm701_vm3 }
  0x13   : > { %955 = vmatpush.bf16.msra.mxu3 %v2771_v5  ;;  %v412_v20 = vrot.slane %v410_v13, 4  ;;  %v415_v21 = vrot.slane %v413_v14, 5  ;;  %v426_v23 = vrot.slane %v424_v15, 4  ;;  %v429_v25 = vrot.slane %v427_v18, 5  ;;  %v342_v27 = vld [vmem:[%s2956_s12 + $0x4] sm:$0x1] }
  0x14   : > { %v343_v28 = vld [vmem:[%s2956_s12 + $0xc] sm:$0x1]  ;;  %v354_v31 = vshrl.u32 %v318_v19, 16  ;;  %v357_v32 = vshll.u32 %v318_v19, 16  ;;  %v2769_v34 = vld [vmem:[%s3569_s1 + $0xe0] sm:$0xff]  ;;  %v363_v35 = vshll.u32 %v342_v27, 16 }
  0x15   : > { %2819 = vmatpush.bf16.msra.mxu1 %v2750_v6  ;;  %548 = vmatpush.bf16.msra.mxu0 %v2750_v6  ;;  %v416_v30 = vor.u32 %v415_v21, %v412_v20  ;;  %v430_v33 = vor.u32 %v429_v25, %v426_v23  ;;  %v368_v36 = vshrl.u32 %v319_v24, 16  ;;  %v371_v37 = vshll.u32 %v319_v24, 16  ;;  %v676_v38 = vld [vmem:[%s2956_s12] sm:$0xe]  ;;  %v677_v43 = vld [vmem:[%s2956_s12 + $0x8] sm:$0xe] }
  0x16   : > { %818 = vmatpush.bf16.msra.mxu2 %v2758_v7  ;;  %v421_v39 = vrot.slane %v419_v22, 5  ;;  %v356_v40 = vrot.slane %v354_v31, 4  ;;  %v359_v41 = vrot.slane %v357_v32, 5  ;;  %v377_v42 = vshll.u32 %v343_v28, 16  ;;  %v2756_v44 = vld [vmem:[%s3569_s1 + $0x98] sm:$0xff]  ;;  %v2747_v60 = vld [vmem:[%s3569_s1 + $0x50] sm:$0xff] }
  0x17   : > { %956 = vmatpush.bf16.msra.mxu3 %v2770_v17  ;;  %v417_v45 = vrot.slane %v416_v30, 4  ;;  %v435_v46 = vrot.slane %v433_v26, 5  ;;  %v370_v47 = vrot.slane %v368_v36, 4  ;;  %v373_v48 = vrot.slane %v371_v37, 5  ;;  %v2768_v56 = vld [vmem:[%s3569_s1 + $0xd8] sm:$0xff]  ;;  %v2755_v0 = vld [vmem:[%s3569_s1 + $0x90] sm:$0xff] }
  0x18   : > { %v431_v50 = vrot.slane %v430_v33, 4  ;;  %v360_v51 = vor.u32 %v359_v41, %v356_v40  ;;  %v2273_v52 = vrot.slane %v676_v38, 9  ;;  %v705_v53 = vrot.slane %v342_v27, 5  ;;  %v324_v59 = vld [vmem:[%s2956_s12 + $0x30] sm:$0xf]  ;;  %v2746_v14 = vld [vmem:[%s3569_s1 + $0x48] sm:$0xff] }
  0x19   : > { %2820 = vmatpush.bf16.msra.mxu1 %v2749_v11  ;;  %549 = vmatpush.bf16.msra.mxu0 %v2749_v11  ;;  %v365_v54 = vrot.slane %v363_v35, 5  ;;  %v374_v55 = vor.u32 %v373_v48, %v370_v47  ;;  %v2274_v58 = vrot.slane %v677_v43, 9  ;;  %v379_v62 = vrot.slane %v377_v42, 5  ;;  %v325_v3 = vld [vmem:[%s2956_s12 + $0x38] sm:$0xf]  ;;  %v2767_v11 = vld [vmem:[%s3569_s1 + $0xd0] sm:$0xff] }
  0x1a   : > { %819 = vmatpush.bf16.msra.mxu2 %v2757_v16  ;;  %v361_v61 = vrot.slane %v360_v51, 4  ;;  %v709_v63 = vrot.slane %v343_v28, 5  ;;  %v422_v1 = vsel %vm2994_vm4, %v417_v45, %v421_v39  ;;  %v436_v4 = vsel %vm2994_vm4, %v431_v50, %v435_v46  ;;  %v320_v7 = vld [vmem:[%s2956_s12 + $0x10] sm:$0xf]  ;;  %v2754_v19 = vld [vmem:[%s3569_s1 + $0x88] sm:$0xff]  ;;  %v2745_v24 = vld [vmem:[%s3569_s1 + $0x40] sm:$0xff] }
  0x1b   : > { %957 = vmatpush.bf16.msra.mxu3 %v2769_v34  ;;  %v375_v2 = vrot.slane %v374_v55, 4  ;;  %v706_v5 = vsel %vm3003_vm5, %v2273_v52, %v705_v53  ;;  %v438_v6 = vshrl.u32 %v324_v59, 16  ;;  %v441_v13 = vshll.u32 %v324_v59, 16  ;;  %v321_v22 = vld [vmem:[%s2956_s12 + $0x18] sm:$0xf]  ;;  %v2766_v31 = vld [vmem:[%s3569_s1 + $0xc8] sm:$0xff] }
  0x1c   : > { %v366_v8 = vsel %vm2994_vm4, %v361_v61, %v365_v54  ;;  %v710_v9 = vsel %vm3003_vm5, %v2274_v58, %v709_v63  ;;  %v3032_v15 = vunpack.c.l.b16 %v422_v1  ;;  %v452_v17 = vshrl.u32 %v325_v3, 16  ;;  %v3050_v32 = vld [vmem:[%s2956_s12 + $0x34] sm:$0x1]  ;;  %v3053_v36 = vld [vmem:[%s2956_s12 + $0x3c] sm:$0x1]  ;;  %v2753_v42 = vld [vmem:[%s3569_s1 + $0x80] sm:$0xff] }
  0x1d   : > { %2821 = vmatpush.bf16.msra.mxu1 %v2748_v29  ;;  %550 = vmatpush.bf16.msra.mxu0 %v2748_v29  ;;  %v380_v16 = vsel %vm2994_vm4, %v375_v2, %v379_v62  ;;  %v487_v18 = vunpack.c.l.b16 %v436_v4  ;;  %v752_v20 = vunpack.c.l.b16 %v706_v5  ;;  %v455_v21 = vshll.u32 %v325_v3, 16  ;;  %v2744_v29 = vld [vmem:[%s3569_s1 + $0x38] sm:$0xff]  ;;  %v3060_v43 = vld [vmem:[%s2956_s12 + $0x14] sm:$0x1]  ;;  %v2765_v58 = vld [vmem:[%s3569_s1 + $0xc0] sm:$0xff] }
  0x1e   : > { %820 = vmatpush.bf16.msra.mxu2 %v2756_v44  ;;  %v382_v23 = vshrl.u32 %v320_v7, 16  ;;  %v482_v25 = vunpack.c.l.b16 %v366_v8  ;;  %v753_v26 = vunpack.c.l.b16 %v710_v9  ;;  %v440_v27 = vrot.slane %v438_v6, 4  ;;  %v3063_v44 = vld [vmem:[%s2956_s12 + $0x1c] sm:$0x1]  ;;  %v2743_v52 = vld [vmem:[%s3569_s1 + $0x30] sm:$0xff] }
  0x1f   : > { %958 = vmatpush.bf16.msra.mxu3 %v2768_v56  ;;  %v385_v28 = vshll.u32 %v320_v7, 16  ;;  %v483_v30 = vunpack.c.l.b16 %v380_v16  ;;  %v443_v33 = vrot.slane %v441_v13, 5  ;;  %v454_v34 = vrot.slane %v452_v17, 4  ;;  %v2780_v45 = vld [vmem:[%s3569_s1 + $0x138] sm:$0xff]  ;;  %v2355_v63 = vld [vmem:[%s2956_s12 + $0x8] sm:$0xf] }
  0x20   : > { %v457_v35 = vrot.slane %v455_v21, 5  ;;  %v384_v37 = vrot.slane %v382_v23, 4  ;;  %v396_v39 = vshrl.u32 %v321_v22, 16  ;;  %v399_v40 = vshll.u32 %v321_v22, 16  ;;  %v2800_v48 = vld [vmem:[%s3569_s1 + $0x1b8] sm:$0xff]  ;;  %v2779_v1 = vld [vmem:[%s3569_s1 + $0x130] sm:$0xff] }
  0x21   : > { %2822 = vmatpush.bf16.msra.mxu1 %v2747_v60  ;;  %551 = vmatpush.bf16.msra.mxu0 %v2747_v60  ;;  %v387_v38 = vrot.slane %v385_v28, 5  ;;  %v492_v41 = vpack.c.b16 %v487_v18, %v3032_v15  ;;  %v760_v46 = vpack.c.b16 %v753_v26, %v752_v20  ;;  %v447_v47 = vshll.u32 %v3050_v32, 16  ;;  %v2808_v2 = vld [vmem:[%s3569_s1 + $0x1f8] sm:$0xff]  ;;  %v678_v4 = vld [vmem:[%s2956_s12 + $0x10] sm:$0xe]  ;;  %v2798_v26 = vld [vmem:[%s3569_s1 + $0x1a8] sm:$0xff] }
  0x22   : > { %821 = vmatpush.bf16.msra.mxu2 %v2755_v0  ;;  %v398_v50 = vrot.slane %v396_v39, 4  ;;  %v401_v51 = vrot.slane %v399_v40, 5  ;;  %v490_v53 = vpack.c.b16 %v483_v30, %v482_v25  ;;  %v444_v54 = vor.u32 %v443_v33, %v440_v27  ;;  %v2761_v0 = vld [vmem:[%s2956_s12 + $0xc] sm:$0xf0]  ;;  %v679_v5 = vld [vmem:[%s2956_s12 + $0x18] sm:$0xe] }
  0x23   : > { %959 = vmatpush.bf16.msra.mxu3 %v2767_v11  ;;  %v458_v55 = vor.u32 %v457_v35, %v454_v34  ;;  %v461_v56 = vshll.u32 %v3053_v36, 16  ;;  %v388_v59 = vor.u32 %v387_v38, %v384_v37  ;;  %v391_v60 = vshll.u32 %v3060_v43, 16  ;;  %v2799_v6 = vld [vmem:[%s3569_s1 + $0x1b0] sm:$0xff]  ;;  %v2401_v13 = vld [vmem:[%s2956_s12 + $0x8] sm:$0xf]  ;;  %v2741_v37 = vld [vmem:[%s3569_s1 + $0x20] sm:$0xff] }
  0x24   : > { %v402_v61 = vor.u32 %v401_v51, %v398_v50  ;;  %v405_v62 = vshll.u32 %v3063_v44, 16  ;;  %v449_v3 = vrot.slane %v447_v47, 5  ;;  %v445_v7 = vrot.slane %v444_v54, 4  ;;  %v2403_v18 = vld [vmem:[%s2956_s12 + $0x10] sm:$0xf]  ;;  %v2778_v25 = vld [vmem:[%s3569_s1 + $0x128] sm:$0xff] }
  0x25   : > { %2823 = vmatpush.bf16.msra.mxu1 %v2746_v14  ;;  %552 = vmatpush.bf16.msra.mxu0 %v2746_v14  ;;  %v459_v8 = vrot.slane %v458_v55, 4  ;;  %v463_v9 = vrot.slane %v461_v56, 5  ;;  %v2356_v11 = vor.u32 %v2761_v0, %v2355_v63  ;;  %v389_v14 = vrot.slane %v388_v59, 4  ;;  %v2806_v40 = vld [vmem:[%s3569_s1 + $0x1e8] sm:$0xff]  ;;  %v2740_v55 = vld [vmem:[%s3569_s1 + $0x18] sm:$0xff] }
  0x26   : > { %822 = vmatpush.bf16.msra.mxu2 %v2754_v19  ;;  %v393_v15 = vrot.slane %v391_v60, 5  ;;  %v403_v16 = vrot.slane %v402_v61, 4  ;;  %v407_v17 = vrot.slane %v405_v62, 5  ;;  %v2742_v19 = vld [vmem:[%s3569_s1 + $0x28] sm:$0xff]  ;;  %v2275_v20 = vrot.slane %v678_v4, 9 }
  0x27   : > { %960 = vmatpush.bf16.msra.mxu3 %v2766_v31  ;;  %v713_v21 = vrot.slane %v3060_v43, 5  ;;  %v2276_v22 = vrot.slane %v679_v5, 9  ;;  %v717_v23 = vrot.slane %v3063_v44, 5  ;;  %v450_v27 = vsel %vm2994_vm4, %v445_v7, %v449_v3  ;;  %v2777_v43 = vld [vmem:[%s3569_s1 + $0x120] sm:$0xff]  ;;  %v3135_v47 = vld [vmem:[%s2956_s12 + $0xc] sm:$0x1] }
  0x28   : > { %v464_v28 = vsel %vm2994_vm4, %v459_v8, %v463_v9  ;;  %v1011_v30 = vshll.u32 %v2401_v13, 16  ;;  %v394_v31 = vsel %vm2994_vm4, %v389_v14, %v393_v15  ;;  %v408_v33 = vsel %vm2994_vm4, %v403_v16, %v407_v17  ;;  %v2797_v44 = vld [vmem:[%s3569_s1 + $0x1a0] sm:$0xff]  ;;  %v3141_v56 = vld [vmem:[%s2956_s12 + $0x14] sm:$0x1]  ;;  %v2359_v62 = vld [vmem:[%s2956_s12 + $0x18] sm:$0xf] }
  0x29   : > { %2824 = vmatpush.bf16.msra.mxu1 %v2745_v24  ;;  %553 = vmatpush.bf16.msra.mxu0 %v2745_v24  ;;  %v2807_v24 = vld [vmem:[%s3569_s1 + $0x1f0] sm:$0xff]  ;;  %v1022_v34 = vshrl.u32 %v2403_v18, 16  ;;  %v1025_v35 = vshll.u32 %v2403_v18, 16  ;;  %v714_v38 = vsel %vm3003_vm5, %v2275_v20, %v713_v21  ;;  %v718_v39 = vsel %vm3003_vm5, %v2276_v22, %v717_v23  ;;  %v2762_v63 = vld [vmem:[%s2956_s12 + $0x1c] sm:$0xf0]  ;;  %v2796_v17 = vld [vmem:[%s3569_s1 + $0x198] sm:$0xff] }
  0x2a   : > { %823 = vmatpush.bf16.msra.mxu2 %v2753_v42  ;;  %v489_v42 = vunpack.c.l.b16 %v464_v28  ;;  %v1013_v50 = vrot.slane %v1011_v30, 5  ;;  %v754_v51 = vunpack.c.l.b16 %v714_v38  ;;  %v1017_v59 = vshll.u32 %v3135_v47, 16  ;;  %v681_v5 = vld [vmem:[%s2956_s12 + $0x28] sm:$0xe]  ;;  %v2775_v7 = vld [vmem:[%s3569_s1 + $0x110] sm:$0xff]  ;;  %v2805_v21 = vld [vmem:[%s3569_s1 + $0x1e0] sm:$0xff] }
  0x2b   : > { %961 = vmatpush.bf16.msra.mxu3 %v2765_v58  ;;  %v1027_v54 = vrot.slane %v1025_v35, 5  ;;  %v2776_v58 = vld [vmem:[%s3569_s1 + $0x118] sm:$0xff]  ;;  %v1031_v4 = vshll.u32 %v3141_v56, 16  ;;  %v2360_v8 = vor.u32 %v2762_v63, %v2359_v62  ;;  %v721_v14 = vrot.slane %v2961_v10, 5  ;;  %v2738_v10 = vld [vmem:[%s3569_s1 + $0x8] sm:$0xff]  ;;  %v2795_v23 = vld [vmem:[%s3569_s1 + $0x190] sm:$0xff] }
  0x2c   : > { %564 = vmatmul.bf16.vlgmr.msra.gmra.mxu1 %v492_v41  ;;  %554 = vmatmul.bf16.vlgmr.msra.gmra.mxu0 %v490_v53  ;;  %v488_v41 = vunpack.c.l.b16 %v450_v27  ;;  %v1024_v53 = vrot.slane %v1022_v34, 4  ;;  %v1019_v9 = vrot.slane %v1017_v59, 5  ;;  %v2278_v15 = vrot.slane %v681_v5, 9  ;;  %v2405_v20 = vld [vmem:[%s2956_s12 + $0x18] sm:$0xf]  ;;  %v2737_v34 = vld [vmem:[%s3569_s1] sm:$0xff] }
  0x2d   : > { %647 = vmatpush.bf16.msrb.mxu1 %v2744_v29  ;;  %1200 = vmatpush.bf16.msrb.mxu0 %v2780_v45  ;;  %v1008_v29 = vshrl.u32 %v2401_v13, 16  ;;  %v484_v45 = vunpack.c.l.b16 %v394_v31  ;;  %v725_v16 = vrot.slane %v2967_v12, 5  ;;  %v2407_v22 = vld [vmem:[%s2956_s12 + $0x20] sm:$0xf]  ;;  %v2774_v12 = vld [vmem:[%s3569_s1 + $0x108] sm:$0xff]  ;;  %v1036_v28 = vshrl.u32 %v2405_v20, 16 }
  0x2e   : > { %1512 = vmatpush.bf16.msrb.mxu2 %v2800_v48  ;;  %962 = vmatmul.bf16.vlgmr.msra.gmra.mxu3 %v2356_v11  ;;  %v493_v60 = vpack.c.b16 %v489_v42, %v488_v41  ;;  %v1028_v3 = vor.u32 %v1027_v54, %v1024_v53  ;;  %v1039_v30 = vshll.u32 %v2405_v20, 16  ;;  %v1050_v31 = vshrl.u32 %v2407_v22, 16  ;;  %v2227_v35 = vld [vmem:[%s2956_s12] sm:$0xf]  ;;  %v2787_v53 = vld [vmem:[%s3569_s1 + $0x170] sm:$0xff] }
  0x2f   : > { %824 = vmatmul.bf16.vlgmr.msra.gmra.mxu2 %v760_v46  ;;  %1758 = vmatpush.bf16.msrb.mxu3 %v2808_v2  ;;  %v485_v46 = vunpack.c.l.b16 %v408_v33  ;;  %v1010_v48 = vrot.slane %v1008_v29, 4  ;;  %v726_v27 = vsel %vm3003_vm5, %v2278_v15, %v725_v16  ;;  %v1053_v33 = vshll.u32 %v2407_v22, 16  ;;  %v2773_v38 = vld [vmem:[%s3569_s1 + $0x100] sm:$0xff]  ;;  %v2763_v62 = vld [vmem:[%s2956_s12 + $0x2c] sm:$0xf0] }
  0x30   : > { %v1029_v18 = vrot.slane %v1028_v3, 4  ;;  %v2409_v3 = vld [vmem:[%s2956_s12 + $0x28] sm:$0xf]  ;;  %v683_v5 = vld [vmem:[%s2956_s12 + $0x38] sm:$0xe]  ;;  %v729_v20 = vrot.slane %v3050_v32, 5 }
  0x31   : > { %648 = vmatpush.bf16.msrb.mxu1 %v2743_v52  ;;  %1201 = vmatpush.bf16.msrb.mxu0 %v2779_v1  ;;  %v755_v52 = vunpack.c.l.b16 %v718_v39  ;;  %v491_v61 = vpack.c.b16 %v485_v46, %v484_v45  ;;  %v1014_v0 = vor.u32 %v1013_v50, %v1010_v48  ;;  %v680_v1 = vld [vmem:[%s2956_s12 + $0x20] sm:$0xe]  ;;  %v2733_v39 = vld [vmem:[%s2956_s12 + $0x4] sm:$0xf0]  ;;  %v3205_v45 = vld [vmem:[%s3569_s1 + $0x238] sm:$0xff]  ;;  %v1038_v48 = vrot.slane %v1036_v28, 4 }
  0x32   : > { %1513 = vmatpush.bf16.msrb.mxu2 %v2799_v6  ;;  %v2739_v6 = vld [vmem:[%s3569_s1 + $0x10] sm:$0xff]  ;;  %v2277_v11 = vrot.slane %v680_v1, 9  ;;  %v3208_v46 = vld [vmem:[%s2956_s12 + $0x24] sm:$0x1]  ;;  %v1041_v50 = vrot.slane %v1039_v30, 5  ;;  %v2228_v54 = vor.u32 %v2733_v39, %v2227_v35  ;;  %v1064_v15 = vshrl.u32 %v2409_v3, 16 }
  0x33   : > { %1759 = vmatpush.bf16.msrb.mxu3 %v2807_v24  ;;  %v761_v2 = vpack.c.b16 %v755_v52, %v754_v51  ;;  %v1015_v13 = vrot.slane %v1014_v0, 4  ;;  %v2804_v24 = vld [vmem:[%s3569_s1 + $0x1d8] sm:$0xff]  ;;  %v1052_v51 = vrot.slane %v1050_v31, 4  ;;  %v1055_v52 = vrot.slane %v1053_v33, 5  ;;  %v3221_v1 = vld [vmem:[%s3569_s1 + $0x230] sm:$0xff]  ;;  %v2793_v22 = vld [vmem:[%s3569_s1 + $0x180] sm:$0xff] }
  0x34   : > { %v1059_v59 = vshll.u32 %v3208_v46, 16  ;;  %v1042_v63 = vor.u32 %v1041_v50, %v1038_v48  ;;  %v1067_v16 = vshll.u32 %v2409_v3, 16  ;;  %v2802_v32 = vld [vmem:[%s3569_s1 + $0x1c8] sm:$0xff]  ;;  %v3261_v28 = vld [vmem:[%s3569_s1 + $0x220] sm:$0xff]  ;;  %v2784_v31 = vld [vmem:[%s3569_s1 + $0x158] sm:$0xff] }
  0x35   : > { %649 = vmatpush.bf16.msrb.mxu1 %v2742_v19  ;;  %1202 = vmatpush.bf16.msrb.mxu0 %v2778_v25  ;;  %v1033_v19 = vrot.slane %v1031_v4, 5  ;;  %v1020_v25 = vsel %vm2994_vm4, %v1015_v13, %v1019_v9  ;;  %v1056_v0 = vor.u32 %v1055_v52, %v1052_v51  ;;  %v682_v4 = vld [vmem:[%s2956_s12 + $0x30] sm:$0xe]  ;;  %v3271_v33 = vld [vmem:[%s2956_s12 + $0x2c] sm:$0x1] }
  0x36   : > { %1514 = vmatpush.bf16.msrb.mxu2 %v2798_v26  ;;  %v722_v26 = vsel %vm3003_vm5, %v2277_v11, %v721_v14  ;;  %v1061_v9 = vrot.slane %v1059_v59, 5  ;;  %v2411_v11 = vld [vmem:[%s2956_s12 + $0x30] sm:$0xf]  ;;  %v1043_v13 = vrot.slane %v1042_v63, 4  ;;  %v3274_v39 = vld [vmem:[%s2956_s12 + $0x34] sm:$0x1] }
  0x37   : > { %1760 = vmatpush.bf16.msrb.mxu3 %v2806_v40  ;;  %v1034_v29 = vsel %vm2994_vm4, %v1029_v18, %v1033_v19  ;;  %v1136_v40 = vunpack.c.l.b16 %v1020_v25  ;;  %v756_v42 = vunpack.c.l.b16 %v722_v26  ;;  %v1057_v14 = vrot.slane %v1056_v0, 4  ;;  %v3240_v18 = vld [vmem:[%s3569_s1 + $0x228] sm:$0xff]  ;;  %v2603_v51 = vld [vmem:[%s2956_s12 + $0x18] sm:$0xf]  ;;  %v2764_v63 = vld [vmem:[%s2956_s12 + $0x3c] sm:$0xf0] }
  0x38   : > { %v1137_v41 = vunpack.c.l.b16 %v1034_v29  ;;  %v2279_v19 = vrot.slane %v682_v4, 9  ;;  %v1066_v26 = vrot.slane %v1064_v15, 4  ;;  %v1073_v52 = vshll.u32 %v3271_v33, 16  ;;  %v2413_v0 = vld [vmem:[%s2956_s12 + $0x38] sm:$0xf] }
  0x39   : > { %650 = vmatpush.bf16.msrb.mxu1 %v2741_v37  ;;  %1203 = vmatpush.bf16.msrb.mxu0 %v2777_v43  ;;  %v2788_v37 = vld [vmem:[%s3569_s1 + $0x178] sm:$0xff]  ;;  %v757_v43 = vunpack.c.l.b16 %v726_v27  ;;  %v1062_v25 = vsel %vm2994_vm4, %v1057_v14, %v1061_v9  ;;  %v1069_v27 = vrot.slane %v1067_v16, 5  ;;  %v1087_v59 = vshll.u32 %v3274_v39, 16  ;;  %v2415_v16 = vld [vmem:[%s2956_s12 + $0x40] sm:$0xf] }
  0x3a   : > { %1515 = vmatpush.bf16.msrb.mxu2 %v2797_v44  ;;  %v3200_v44 = vld [vmem:[%s2956_s12 + $0x1c] sm:$0x1]  ;;  %v730_v29 = vsel %vm3003_vm5, %v2279_v19, %v729_v20  ;;  %v2801_v19 = vld [vmem:[%s3569_s1 + $0x1c0] sm:$0xff]  ;;  %v1095_v20 = vshll.u32 %v2413_v0, 16 }
  0x3b   : > { %1761 = vmatpush.bf16.msrb.mxu3 %v2805_v21  ;;  %v2280_v21 = vrot.slane %v683_v5, 9  ;;  %v1070_v50 = vor.u32 %v1069_v27, %v1066_v26  ;;  %v3292_v5 = vld [vmem:[%s2956_s12 + $0x14] sm:$0x1]  ;;  %v1089_v15 = vrot.slane %v1087_v59, 5 }
  0x3c   : > { %569 = vmatmul.bf16.gmra.mxu1 %v493_v60  ;;  %559 = vmatmul.bf16.gmra.mxu0 %v491_v61  ;;  %v762_v60 = vpack.c.b16 %v757_v43, %v756_v42  ;;  %v2363_v61 = vld [vmem:[%s2956_s12 + $0x28] sm:$0xf]  ;;  %v2734_v42 = vld [vmem:[%s2956_s12 + $0x14] sm:$0xf0]  ;;  %v758_v43 = vunpack.c.l.b16 %v730_v29  ;;  %v3314_v27 = vld [vmem:[%s3569_s1 + $0x210] sm:$0xff] }
  0x3d   : > { %651 = vmatpush.bf16.msrb.mxu1 %v2740_v55  ;;  %1204 = vmatpush.bf16.msrb.mxu0 %v2776_v58  ;;  %v1144_v55 = vpack.c.b16 %v1137_v41, %v1136_v40  ;;  %v1045_v58 = vshll.u32 %v3200_v44, 16  ;;  %v2601_v40 = vld [vmem:[%s2956_s12 + $0x10] sm:$0xf]  ;;  %v1071_v4 = vrot.slane %v1070_v50, 4  ;;  %v2465_v29 = vld [vmem:[%s2956_s12 + $0x8] sm:$0xe] }
  0x3e   : > { %1516 = vmatpush.bf16.msrb.mxu2 %v2796_v17  ;;  %967 = vmatmul.bf16.gmra.mxu3 %v2360_v8  ;;  %v2803_v17 = vld [vmem:[%s3569_s1 + $0x1d0] sm:$0xff] }
  0x3f   : > { %829 = vmatmul.bf16.gmra.mxu2 %v761_v2  ;;  %1762 = vmatpush.bf16.msrb.mxu3 %v2804_v24  ;;  %v2786_v2 = vld [vmem:[%s3569_s1 + $0x168] sm:$0xff]  ;;  %v1047_v8 = vrot.slane %v1045_v58, 5  ;;  %v1081_v24 = vshll.u32 %v2411_v11, 16  ;;  %v2231_v41 = vld [vmem:[%s2956_s12 + $0x10] sm:$0xf] }
  0x41   : > { %652 = vmatpush.bf16.msrb.mxu1 %v2739_v6  ;;  %1205 = vmatpush.bf16.msrb.mxu0 %v2775_v7  ;;  %v2794_v6 = vld [vmem:[%s3569_s1 + $0x188] sm:$0xff]  ;;  %v2364_v7 = vor.u32 %v2763_v62, %v2363_v61  ;;  %v1083_v35 = vrot.slane %v1081_v24, 5  ;;  %v2232_v61 = vor.u32 %v2734_v42, %v2231_v41  ;;  %v3327_v42 = vld [vmem:[%s2956_s12 + $0x3c] sm:$0x1] }
  0x42   : > { %1517 = vmatpush.bf16.msrb.mxu2 %v2795_v23  ;;  %v1078_v23 = vshrl.u32 %v2411_v11, 16 }
  0x43   : > { %1763 = vmatpush.bf16.msrb.mxu3 %v2803_v17  ;;  %v1092_v17 = vshrl.u32 %v2413_v0, 16 }
  0x45   : > { %653 = vmatpush.bf16.msrb.mxu1 %v2738_v10  ;;  %1206 = vmatpush.bf16.msrb.mxu0 %v2774_v12  ;;  %v733_v10 = vrot.slane %v3053_v36, 5  ;;  %v2785_v12 = vld [vmem:[%s3569_s1 + $0x160] sm:$0xff]  ;;  %v1048_v36 = vsel %vm2994_vm4, %v1043_v13, %v1047_v8 }
  0x46   : > { %1518 = vmatpush.bf16.msrb.mxu2 %v2794_v6  ;;  %v1075_v6 = vrot.slane %v1073_v52, 5 }
  0x47   : > { %v734_v30 = vsel %vm3003_vm5, %v2280_v21, %v733_v10  ;;  %1764 = vmatpush.bf16.msrb.mxu3 %v2802_v32  ;;  %v1575_v10 = vshll.u32 %v3292_v5, 16  ;;  %v1267_v32 = vrot.slane %v3141_v56, 5  ;;  %v1094_v56 = vrot.slane %v1092_v17, 4 }
  0x48   : > { %v759_v48 = vunpack.c.l.b16 %v734_v30 }
  0x49   : > { %654 = vmatpush.bf16.msrb.mxu1 %v2737_v34  ;;  %1207 = vmatpush.bf16.msrb.mxu0 %v2773_v38  ;;  %v1080_v34 = vrot.slane %v1078_v23, 4  ;;  %v1139_v38 = vunpack.c.l.b16 %v1062_v25  ;;  %v1263_v23 = vrot.slane %v3135_v47, 5  ;;  %v1109_v25 = vshll.u32 %v2415_v16, 16 }
  0x4a   : > { %1519 = vmatpush.bf16.msrb.mxu2 %v2793_v22  ;;  %v763_v3 = vpack.c.b16 %v759_v48, %v758_v43  ;;  %v1076_v47 = vsel %vm2994_vm4, %v1071_v4, %v1075_v6  ;;  %v2555_v4 = vld [vmem:[%s2956_s12 + $0x10] sm:$0xf] }
  0x4b   : > { %v1084_v58 = vor.u32 %v1083_v35, %v1080_v34  ;;  %1765 = vmatpush.bf16.msrb.mxu3 %v2801_v19  ;;  %v2466_v34 = vld [vmem:[%s2956_s12 + $0x10] sm:$0xe]  ;;  %v2473_v35 = vrot.slane %v2465_v29, 9  ;;  %v1111_v52 = vrot.slane %v1109_v25, 5 }
  0x4c   : > { %655 = vmatmul.bf16.vlgmr.msrb.gmra.mxu1 %v2228_v54  ;;  %1208 = vmatmul.bf16.vlgmr.msrb.gmra.mxu0 %v1144_v55  ;;  %v1569_v54 = vshll.u32 %v2601_v40, 16  ;;  %v1580_v55 = vshrl.u32 %v2603_v51, 16  ;;  %v2474_v41 = vrot.slane %v2466_v34, 9  ;;  %v2809_v34 = vld [vmem:[%s3569_s1 + $0x200] sm:$0xff] }
  0x4d   : > { %1374 = vmatpush.bf16.msra.mxu1 %v2788_v37  ;;  %1932 = vmatpush.bf16.msra.mxu0 %v3205_v45  ;;  %v1138_v37 = vunpack.c.l.b16 %v1048_v36  ;;  %v1085_v14 = vrot.slane %v1084_v58, 4  ;;  %v1106_v36 = vshrl.u32 %v2415_v16, 16  ;;  %v1264_v50 = vsel %vm3003_vm5, %v2473_v35, %v1263_v23  ;;  %v3359_v23 = vld [vmem:[%s2956_s12 + $0x2c] sm:$0x1] }
  0x4e   : > { %972 = vmatmul.bf16.gmra.mxu3 %v2364_v7  ;;  %2825 = vmatpush.bf16.msra.mxu2 %v3205_v45  ;;  %v2367_v45 = vld [vmem:[%s2956_s12 + $0x38] sm:$0xf]  ;;  %v3295_v7 = vld [vmem:[%s2956_s12 + $0x1c] sm:$0x1]  ;;  %v1571_v9 = vrot.slane %v1569_v54, 5  ;;  %v1582_v11 = vrot.slane %v1580_v55, 4  ;;  %v1310_v54 = vunpack.c.l.b16 %v1264_v50  ;;  %v1140_v58 = vunpack.c.l.b16 %v1076_v47 }
  0x4f   : > { %834 = vmatmul.bf16.gmra.mxu2 %v762_v60  ;;  %v2783_v60 = vld [vmem:[%s3569_s1 + $0x150] sm:$0xff]  ;;  %v1145_v62 = vpack.c.b16 %v1139_v38, %v1138_v37  ;;  %v2368_v13 = vor.u32 %v2764_v63, %v2367_v45  ;;  %v1589_v24 = vshll.u32 %v3295_v7, 16  ;;  %v1090_v30 = vsel %vm2994_vm4, %v1085_v14, %v1089_v15  ;;  %v2235_v55 = vld [vmem:[%s2956_s12 + $0x20] sm:$0xf]  ;;  %v2735_v45 = vld [vmem:[%s2956_s12 + $0x24] sm:$0xf0] }
  0x50   : > { %v1097_v37 = vrot.slane %v1095_v20, 5  ;;  %v1141_v59 = vunpack.c.l.b16 %v1090_v30  ;;  %v1101_v63 = vshll.u32 %v3327_v42, 16  ;;  %v2236_v17 = vor.u32 %v2735_v45, %v2235_v55  ;;  %v2239_v55 = vld [vmem:[%s2956_s12 + $0x30] sm:$0xf] }
  0x51   : > { %1375 = vmatpush.bf16.msra.mxu1 %v2787_v53  ;;  %1933 = vmatpush.bf16.msra.mxu0 %v3221_v1  ;;  %v1566_v53 = vshrl.u32 %v2601_v40, 16  ;;  %v1577_v40 = vrot.slane %v1575_v10, 5  ;;  %v1591_v48 = vrot.slane %v1589_v24, 5 }
  0x52   : > { %2826 = vmatpush.bf16.msra.mxu2 %v3221_v1  ;;  %v2782_v1 = vld [vmem:[%s3569_s1 + $0x148] sm:$0xff] }
  0x53   : > { %v1568_v8 = vrot.slane %v1566_v53, 4  ;;  %v1268_v53 = vsel %vm3003_vm5, %v2474_v41, %v1267_v32 }
  0x55   : > { %1376 = vmatpush.bf16.msra.mxu1 %v2786_v2  ;;  %1934 = vmatpush.bf16.msra.mxu0 %v3240_v18  ;;  %v1583_v2 = vshll.u32 %v2603_v51, 16  ;;  %v1572_v21 = vor.u32 %v1571_v9, %v1568_v8  ;;  %v1108_v51 = vrot.slane %v1106_v36, 4 }
  0x56   : > { %2827 = vmatpush.bf16.msra.mxu2 %v3240_v18  ;;  %v2810_v18 = vld [vmem:[%s3569_s1 + $0x208] sm:$0xff] }
  0x57   : > { %v1585_v22 = vrot.slane %v1583_v2, 5  ;;  %v1573_v38 = vrot.slane %v1572_v21, 4  ;;  %v2605_v2 = vld [vmem:[%s2956_s12 + $0x20] sm:$0xf] }
  0x58   : > { %v1594_v9 = vshrl.u32 %v2605_v2, 16 }
  0x59   : > { %1377 = vmatpush.bf16.msra.mxu1 %v2785_v12  ;;  %1935 = vmatpush.bf16.msra.mxu0 %v3261_v28  ;;  %v2812_v12 = vld [vmem:[%s3569_s1 + $0x218] sm:$0xff]  ;;  %v1586_v26 = vor.u32 %v1585_v22, %v1582_v11  ;;  %v1578_v0 = vsel %vm2994_vm4, %v1573_v38, %v1577_v40  ;;  %v1597_v11 = vshll.u32 %v2605_v2, 16  ;;  %v3356_v22 = vld [vmem:[%s2956_s12 + $0x24] sm:$0x1]  ;;  %v2468_v38 = vld [vmem:[%s2956_s12 + $0x20] sm:$0xe] }
  0x5a   : > { %2828 = vmatpush.bf16.msra.mxu2 %v3261_v28  ;;  %v1112_v28 = vor.u32 %v1111_v52, %v1108_v51  ;;  %v1596_v19 = vrot.slane %v1594_v9, 4  ;;  %v1694_v21 = vunpack.c.l.b16 %v1578_v0  ;;  %v1271_v52 = vrot.slane %v3200_v44, 5 }
  0x5b   : > { %v1587_v43 = vrot.slane %v1586_v26, 4  ;;  %v1599_v20 = vrot.slane %v1597_v11, 5  ;;  %v1103_v26 = vrot.slane %v1101_v63, 5  ;;  %v2665_v63 = vld [vmem:[%s2956_s12 + $0x10] sm:$0xe] }
  0x5c   : > { %660 = vmatmul.bf16.gmra.mxu1 %v2232_v61  ;;  %1213 = vmatmul.bf16.gmra.mxu0 %v1145_v62  ;;  %v1311_v61 = vunpack.c.l.b16 %v1268_v53  ;;  %v1098_v62 = vor.u32 %v1097_v37, %v1094_v56  ;;  %v1113_v29 = vrot.slane %v1112_v28, 4  ;;  %v1603_v56 = vshll.u32 %v3356_v22, 16  ;;  %v2467_v37 = vld [vmem:[%s2956_s12 + $0x18] sm:$0xe] }
  0x5d   : > { %1378 = vmatpush.bf16.msra.mxu1 %v2784_v31  ;;  %1936 = vmatpush.bf16.msra.mxu0 %v2812_v12  ;;  %v2781_v31 = vld [vmem:[%s3569_s1 + $0x140] sm:$0xff]  ;;  %v1592_v6 = vsel %vm2994_vm4, %v1587_v43, %v1591_v48  ;;  %v1600_v30 = vor.u32 %v1599_v20, %v1596_v19  ;;  %v2475_v50 = vrot.slane %v2467_v37, 9  ;;  %v2476_v53 = vrot.slane %v2468_v38, 9 }
  0x5e   : > { %977 = vmatmul.bf16.gmra.mxu3 %v2368_v13  ;;  %v3351_v8 = vpack.c.b16 %v1311_v61, %v1310_v54  ;;  %v2789_v13 = vld [vmem:[%s2956_s12 + $0x14] sm:$0xf0]  ;;  %2829 = vmatpush.bf16.msra.mxu2 %v2812_v12  ;;  %v1695_v10 = vunpack.c.l.b16 %v1592_v6  ;;  %v1099_v25 = vrot.slane %v1098_v62, 4  ;;  %v1617_v12 = vshll.u32 %v3359_v23, 16 }
  0x5f   : > { %839 = vmatmul.bf16.gmra.mxu2 %v763_v3  ;;  %v2607_v3 = vld [vmem:[%s2956_s12 + $0x28] sm:$0xf]  ;;  %v2556_v36 = vor.u32 %v2789_v13, %v2555_v4  ;;  %v1605_v43 = vrot.slane %v1603_v56, 5  ;;  %v1275_v54 = vrot.slane %v3208_v46, 5  ;;  %v1821_v62 = vrot.slane %v3292_v5, 5 }
  0x60   : > { %v1608_v15 = vshrl.u32 %v2607_v3, 16  ;;  %v1611_v16 = vshll.u32 %v2607_v3, 16  ;;  %v1104_v40 = vsel %vm2994_vm4, %v1099_v25, %v1103_v26  ;;  %v1619_v48 = vrot.slane %v1617_v12, 5  ;;  %v2666_v3 = vld [vmem:[%s2956_s12 + $0x18] sm:$0xe] }
  0x61   : > { %1379 = vmatpush.bf16.msra.mxu1 %v2783_v60  ;;  %1937 = vmatpush.bf16.msra.mxu0 %v3314_v27  ;;  %v3340_v60 = vld [vmem:[%s2956_s12 + $0x44] sm:$0x1]  ;;  %v1142_v45 = vunpack.c.l.b16 %v1104_v40  ;;  %v1276_v61 = vsel %vm3003_vm5, %v2476_v53, %v1275_v54  ;;  %v2609_v4 = vld [vmem:[%s2956_s12 + $0x30] sm:$0xf]  ;;  %v2611_v6 = vld [vmem:[%s2956_s12 + $0x38] sm:$0xf] }
  0x62   : > { %v1115_v14 = vshll.u32 %v3340_v60, 16  ;;  %v1610_v24 = vrot.slane %v1608_v15, 4  ;;  %v1613_v32 = vrot.slane %v1611_v16, 5  ;;  %2830 = vmatpush.bf16.msra.mxu2 %v3314_v27  ;;  %v1601_v27 = vrot.slane %v1600_v30, 4  ;;  %v2559_v16 = vld [vmem:[%s2956_s12 + $0x20] sm:$0xf] }
  0x63   : > { %v1313_v0 = vunpack.c.l.b16 %v1276_v61  ;;  %v1622_v11 = vshrl.u32 %v2609_v4, 16  ;;  %v1625_v13 = vshll.u32 %v2609_v4, 16  ;;  %v1636_v5 = vshrl.u32 %v2611_v6, 16  ;;  %v2469_v53 = vld [vmem:[%s2956_s12 + $0x28] sm:$0xe] }
  0x64   : > { %v1117_v47 = vrot.slane %v1115_v14, 5  ;;  %v1614_v35 = vor.u32 %v1613_v32, %v1610_v24  ;;  %v1606_v46 = vsel %vm2994_vm4, %v1601_v27, %v1605_v43  ;;  %v1825_v15 = vrot.slane %v3295_v7, 5  ;;  %v2470_v54 = vld [vmem:[%s2956_s12 + $0x30] sm:$0xe]  ;;  %v2667_v4 = vld [vmem:[%s2956_s12 + $0x20] sm:$0xe] }
  0x65   : > { %1380 = vmatpush.bf16.msra.mxu1 %v2782_v1  ;;  %1938 = vmatpush.bf16.msra.mxu0 %v2810_v18  ;;  %v1146_v1 = vpack.c.b16 %v1141_v59, %v1140_v58  ;;  %v1272_v59 = vsel %vm3003_vm5, %v2475_v50, %v1271_v52  ;;  %v1696_v19 = vunpack.c.l.b16 %v1606_v46  ;;  %v1624_v24 = vrot.slane %v1622_v11, 4  ;;  %v2563_v50 = vld [vmem:[%s2956_s12 + $0x30] sm:$0xf]  ;;  %v2668_v11 = vld [vmem:[%s2956_s12 + $0x28] sm:$0xe] }
  0x66   : > { %v1118_v41 = vsel %vm2994_vm4, %v1113_v29, %v1117_v47  ;;  %2831 = vmatpush.bf16.msra.mxu2 %v2810_v18  ;;  %v1615_v51 = vrot.slane %v1614_v35, 4  ;;  %v2736_v18 = vld [vmem:[%s2956_s12 + $0x34] sm:$0xf0]  ;;  %v1312_v44 = vunpack.c.l.b16 %v1272_v59  ;;  %v1627_v32 = vrot.slane %v1625_v13, 5  ;;  %v3396_v29 = vld [vmem:[%s2956_s12 + $0x34] sm:$0x1] }
  0x67   : > { %v1143_v58 = vunpack.c.l.b16 %v1118_v41  ;;  %v2240_v28 = vor.u32 %v2736_v18, %v2239_v55  ;;  %v3399_v47 = vld [vmem:[%s2956_s12 + $0x3c] sm:$0x1]  ;;  %v2613_v55 = vld [vmem:[%s2956_s12 + $0x40] sm:$0xf]  ;;  %v2478_v59 = vrot.slane %v2470_v54, 9  ;;  %v1283_v61 = vrot.slane %v3274_v39, 5 }
  0x68   : > { %v1620_v2 = vsel %vm2994_vm4, %v1615_v51, %v1619_v48  ;;  %v3390_v9 = vpack.c.b16 %v1313_v0, %v1312_v44  ;;  %v1628_v12 = vor.u32 %v1627_v32, %v1624_v24  ;;  %v1645_v35 = vshll.u32 %v3399_v47, 16  ;;  %v2615_v18 = vld [vmem:[%s2956_s12 + $0x48] sm:$0xf] }
  0x69   : > { %1381 = vmatpush.bf16.msra.mxu1 %v2781_v31  ;;  %v1702_v31 = vpack.c.b16 %v1695_v10, %v1694_v21  ;;  %1939 = vmatpush.bf16.msra.mxu0 %v2809_v34  ;;  %v1147_v14 = vpack.c.b16 %v1143_v58, %v1142_v45  ;;  %v1697_v20 = vunpack.c.l.b16 %v1620_v2  ;;  %v2673_v21 = vrot.slane %v2665_v63, 9 }
  0x6a   : > { %2832 = vmatpush.bf16.msra.mxu2 %v2809_v34  ;;  %v2674_v10 = vrot.slane %v2666_v3, 9  ;;  %v1629_v40 = vrot.slane %v1628_v12, 4  ;;  %v1647_v43 = vrot.slane %v1645_v35, 5  ;;  %v2477_v45 = vrot.slane %v2469_v53, 9 }
  0x6b   : > { %v1703_v30 = vpack.c.b16 %v1697_v20, %v1696_v19  ;;  %v1822_v7 = vsel %vm3003_vm5, %v2673_v21, %v1821_v62  ;;  %v1279_v58 = vrot.slane %v3271_v33, 5  ;;  %v2791_v62 = vld [vmem:[%s2956_s12 + $0x34] sm:$0xf0]  ;;  %v1650_v63 = vshrl.u32 %v2613_v55, 16 }
  0x6c   : > { %665 = vmatmul.bf16.gmra.mxu1 %v2236_v17  ;;  %1218 = vmatmul.bf16.gmra.mxu0 %v1146_v1  ;;  %v2790_v17 = vld [vmem:[%s2956_s12 + $0x24] sm:$0xf0]  ;;  %v1639_v1 = vshll.u32 %v2611_v6, 16  ;;  %v1826_v56 = vsel %vm3003_vm5, %v2674_v10, %v1825_v15  ;;  %v1868_v37 = vunpack.c.l.b16 %v1822_v7  ;;  %v1653_v44 = vshll.u32 %v2613_v55, 16  ;;  %v3426_v15 = vld [vmem:[%s2956_s12 + $0x44] sm:$0x1] }
  0x6d   : > { %v2560_v26 = vor.u32 %v2790_v17, %v2559_v16  ;;  %v1869_v38 = vunpack.c.l.b16 %v1826_v56  ;;  %v1664_v0 = vshrl.u32 %v2615_v18, 16  ;;  %v1667_v46 = vshll.u32 %v2615_v18, 16  ;;  %v3429_v16 = vld [vmem:[%s2956_s12 + $0x4c] sm:$0x1] }
  0x6e   : > { %1766 = vmatmul.bf16.vlgmr.msrb.gmra.mxu3 %v1702_v31  ;;  %v1641_v25 = vrot.slane %v1639_v1, 5  ;;  %v1631_v31 = vshll.u32 %v3396_v29, 16  ;;  %v1280_v6 = vsel %vm3003_vm5, %v2477_v45, %v1279_v58  ;;  %v1284_v33 = vsel %vm3003_vm5, %v2478_v59, %v1283_v61  ;;  %v2670_v61 = vld [vmem:[%s2956_s12 + $0x38] sm:$0xe] }
  0x6f   : > { %1520 = vmatmul.bf16.vlgmr.msrb.gmra.mxu2 %v2556_v36  ;;  %v1638_v36 = vrot.slane %v1636_v5, 4  ;;  %v1876_v48 = vpack.c.b16 %v1869_v38, %v1868_v37  ;;  %v1314_v13 = vunpack.c.l.b16 %v1280_v6  ;;  %v1315_v39 = vunpack.c.l.b16 %v1284_v33  ;;  %v2471_v38 = vld [vmem:[%s2956_s12 + $0x38] sm:$0xe] }
  0x70   : > { %v1633_v41 = vrot.slane %v1631_v31, 5  ;;  %v1652_v5 = vrot.slane %v1650_v63, 4  ;;  %v1666_v17 = vrot.slane %v1664_v0, 4  ;;  %v1669_v1 = vrot.slane %v1667_v46, 5  ;;  %v2672_v63 = vld [vmem:[%s2956_s12 + $0x48] sm:$0xe] }
  0x71   : > { %v1642_v34 = vor.u32 %v1641_v25, %v1638_v36  ;;  %v2675_v19 = vrot.slane %v2667_v4, 9  ;;  %v3431_v20 = vpack.c.b16 %v1315_v39, %v1314_v13  ;;  %v1829_v10 = vrot.slane %v3356_v22, 5 }
  0x72   : > { %v1634_v51 = vsel %vm2994_vm4, %v1629_v40, %v1633_v41  ;;  %v2676_v24 = vrot.slane %v2668_v11, 9  ;;  %v1833_v32 = vrot.slane %v3359_v23, 5  ;;  %v1659_v25 = vshll.u32 %v3426_v15, 16  ;;  %v2472_v40 = vld [vmem:[%s2956_s12 + $0x40] sm:$0xe] }
  0x73   : > { %v1643_v27 = vrot.slane %v1642_v34, 4  ;;  %v1698_v2 = vunpack.c.l.b16 %v1634_v51  ;;  %v1830_v7 = vsel %vm3003_vm5, %v2675_v19, %v1829_v10  ;;  %v2479_v41 = vrot.slane %v2471_v38, 9  ;;  %v2792_v51 = vld [vmem:[%s2956_s12 + $0x44] sm:$0xf0] }
  0x74   : > { %v1834_v22 = vsel %vm3003_vm5, %v2676_v24, %v1833_v32  ;;  %v1661_v23 = vrot.slane %v1659_v25, 5  ;;  %v1870_v31 = vunpack.c.l.b16 %v1830_v7  ;;  %v1837_v0 = vrot.slane %v3396_v29, 5 }
  0x75   : > { %v1648_v52 = vsel %vm2994_vm4, %v1643_v27, %v1647_v43  ;;  %v1871_v34 = vunpack.c.l.b16 %v1834_v22  ;;  %v1287_v27 = vrot.slane %v3327_v42, 5  ;;  %v2480_v43 = vrot.slane %v2472_v40, 9  ;;  %v2669_v42 = vld [vmem:[%s2956_s12 + $0x30] sm:$0xe] }
  0x76   : > { %v1699_v3 = vunpack.c.l.b16 %v1648_v52  ;;  %v2678_v46 = vrot.slane %v2670_v61, 9  ;;  %v1849_v4 = vrot.slane %v3429_v16, 5  ;;  %v2680_v33 = vrot.slane %v2672_v63, 9 }
  0x77   : > { %v1877_v52 = vpack.c.b16 %v1871_v34, %v1870_v31  ;;  %v1288_v53 = vsel %vm3003_vm5, %v2479_v41, %v1287_v27 }
  0x78   : > { %v1704_v21 = vpack.c.b16 %v1699_v3, %v1698_v2  ;;  %v1316_v45 = vunpack.c.l.b16 %v1288_v53  ;;  %v1841_v2 = vrot.slane %v3399_v47, 5  ;;  %v1845_v3 = vrot.slane %v3426_v15, 5 }
  0x79   : > { %v1850_v29 = vsel %vm3003_vm5, %v2680_v33, %v1849_v4 }
  0x7c   : > { %670 = vmatmul.bf16.gmra.mxu1 %v2240_v28  ;;  %1223 = vmatmul.bf16.gmra.mxu0 %v1147_v14  ;;  %v1655_v28 = vrot.slane %v1653_v44, 5  ;;  %v2564_v14 = vor.u32 %v2791_v62, %v2563_v50  ;;  %v2567_v50 = vld [vmem:[%s2956_s12 + $0x40] sm:$0xf]  ;;  %v2677_v44 = vrot.slane %v2669_v42, 9 }
  0x7d   : > { %v2568_v59 = vor.u32 %v2792_v51, %v2567_v50  ;;  %v2671_v62 = vld [vmem:[%s2956_s12 + $0x40] sm:$0xe]  ;;  %s2731_s12 = sshll.u32 %s3582_s15, 6 }
  0x7e   : > { %1771 = vmatmul.bf16.gmra.mxu3 %v1703_v30  ;;  %v1656_v36 = vor.u32 %v1655_v28, %v1652_v5  ;;  %v1673_v30 = vshll.u32 %v3429_v16, 16  ;;  %v2679_v6 = vrot.slane %v2671_v62, 9  ;;  %v1838_v11 = vsel %vm3003_vm5, %v2677_v44, %v1837_v0  ;;  %s3508_s21 = scalar_lea.vmem %s3571_s3, %s2731_s12  ;;  %s3521_s25 = scalar_lea.vmem %s3572_s4, %s2731_s12 }
  0x7f   : > { %1525 = vmatmul.bf16.gmra.mxu2 %v2560_v26  ;;  %v1670_v26 = vor.u32 %v1669_v1, %v1666_v17  ;;  %v1872_v47 = vunpack.c.l.b16 %v1838_v11  ;;  %v1875_v28 = vunpack.c.l.b16 %v1850_v29 }
  0x80   : > { %v1675_v12 = vrot.slane %v1673_v30, 5  ;;  %v1846_v13 = vsel %vm3003_vm5, %v2679_v6, %v1845_v3 }
  0x81   : > { %v1671_v56 = vrot.slane %v1670_v26, 4  ;;  %v1874_v5 = vunpack.c.l.b16 %v1846_v13 }
  0x83   : > { %v1676_v37 = vsel %vm2994_vm4, %v1671_v56, %v1675_v12  ;;  %v1879_v17 = vpack.c.b16 %v1875_v28, %v1874_v5 }
  0x84   : > { %v1701_v55 = vunpack.c.l.b16 %v1676_v37 }
  0x8c   : > { %1382 = vmatmul.bf16.vlgmr.msra.gmra.mxu1 %v3351_v8  ;;  %1940 = vmatmul.bf16.vlgmr.msra.gmra.mxu0 %v1876_v48  ;;  %v1657_v8 = vrot.slane %v1656_v36, 4  ;;  %v1291_v48 = vrot.slane %v3340_v60, 5 }
  0x8e   : > { %1776 = vmatmul.bf16.gmra.mxu3 %v1704_v21  ;;  %v1662_v35 = vsel %vm2994_vm4, %v1657_v8, %v1661_v23  ;;  %v1292_v49 = vsel %vm3003_vm5, %v2480_v43, %v1291_v48 }
  0x8f   : > { %1530 = vmatmul.bf16.gmra.mxu2 %v2564_v14  ;;  %v1700_v54 = vunpack.c.l.b16 %v1662_v35  ;;  %v1317_v58 = vunpack.c.l.b16 %v1292_v49 }
  0x91   : > { %v1321_v18 = vpack.c.b16 %v1317_v58, %v1316_v45  ;;  %v1705_v60 = vpack.c.b16 %v1701_v55, %v1700_v54 }
  0x9c   : > { %1387 = vmatmul.bf16.gmra.mxu1 %v3390_v9  ;;  %1945 = vmatmul.bf16.gmra.mxu0 %v1877_v52  ;;  %v1842_v9 = vsel %vm3003_vm5, %v2678_v46, %v1841_v2 }
  0x9d   : > { %v1873_v39 = vunpack.c.l.b16 %v1842_v9 }
  0x9e   : > { %1781 = vmatmul.bf16.gmra.mxu3 %v1705_v60 }
  0x9f   : > { %1535 = vmatmul.bf16.gmra.mxu2 %v2568_v59  ;;  %v1878_v14 = vpack.c.b16 %v1873_v39, %v1872_v47 }
  0xa9   : > { %v565_v15 = vpop.f32.mrf.mxu1  ;;  %v555_v16 = vpop.f32.mrf.mxu0 }
  0xac   : > { %1392 = vmatmul.bf16.gmra.mxu1 %v3431_v20  ;;  %1950 = vmatmul.bf16.gmra.mxu0 %v1878_v14 }
  0xaf   : > { %1955 = vmatmul.bf16.vlgmr.msra.gmra.mxu2 %v1879_v17 }
  0xb1   : > { %v567_v19 = vpop.f32.mrf.mxu1  ;;  %v557_v21 = vpop.f32.mrf.mxu0 }
  0xb2   : > { %v825_v1 = vpop.f32.mrf.mxu2  ;;  %v963_v10 = vpop.f32.mrf.mxu3 }
  0xb9   : > { %v570_v32 = vpop.f32.mrf.mxu1  ;;  %v560_v57 = vpop.f32.mrf.mxu0 }
  0xba   : > { %v827_v24 = vpop.f32.mrf.mxu2  ;;  %v965_v36 = vpop.f32.mrf.mxu3 }
  0xbc   : > { %1397 = vmatmul.bf16.gmra.mxu1 %v1321_v18 }
  0xc1   : > { %v572_v26 = vpop.f32.mrf.mxu1  ;;  %v562_v30 = vpop.f32.mrf.mxu0 }
  0xc2   : > { %v830_v25 = vpop.f32.mrf.mxu2  ;;  %v3474_v7 = vpop.f32.mrf.mxu3 }
  0xc9   : > { %v656_v8 = vpop.f32.mrf.mxu1  ;;  %v1209_v23 = vpop.f32.mrf.mxu0 }
  0xca   : > { %v832_v22 = vpop.f32.mrf.mxu2  ;;  %v657_v20 = vadd.f32 %v656_v8, %v555_v16  ;;  %v3476_v12 = vpop.f32.mrf.mxu3 }
  0xcc   : > { %v845_v56 = vadd.f32 %v825_v1, %v657_v20 }
  0xce   : > { %v983_v39 = vadd.f32 %v963_v10, %v845_v56  ;;  %v3513_v10 = vld [vmem:[%s3570_s2] ss:$0 sm:$0xff] }
  0xd0   : > { %v1229_v28 = vadd.f32 %v1209_v23, %v983_v39 }
  0xd1   : > { %v658_v34 = vpop.f32.mrf.mxu1  ;;  %v1211_v35 = vpop.f32.mrf.mxu0 }
  0xd2   : > { %v835_v31 = vpop.f32.mrf.mxu2  ;;  %v659_v37 = vadd.f32 %v658_v34, %v557_v21  ;;  %v3478_v40 = vpop.f32.mrf.mxu3 }
  0xd4   : > { %v846_v38 = vadd.f32 %v827_v24, %v659_v37 }
  0xd9   : > { %v661_v27 = vpop.f32.mrf.mxu1  ;;  %v1214_v43 = vpop.f32.mrf.mxu0 }
  0xda   : > { %v837_v41 = vpop.f32.mrf.mxu2  ;;  %v662_v48 = vadd.f32 %v661_v27, %v560_v57  ;;  %v3480_v52 = vpop.f32.mrf.mxu3 }
  0xdc   : > { %v847_v50 = vadd.f32 %v830_v25, %v662_v48  ;;  %v1981_v25 = vld [vmem:[%s3508_s21] sm:$0xff] }
  0xde   : > { %v985_v23 = vadd.f32 %v3474_v7, %v847_v50 }
  0xe0   : > { %v1231_v37 = vadd.f32 %v1214_v43, %v985_v23 }
  0xe1   : > { %v663_v53 = vpop.f32.mrf.mxu1  ;;  %v3482_v49 = vpop.f32.mrf.mxu0 }
  0xe2   : > { %v840_v51 = vpop.f32.mrf.mxu2  ;;  %v664_v54 = vadd.f32 %v663_v53, %v562_v30  ;;  %v3486_v61 = vpop.f32.mrf.mxu3 }
  0xe4   : > { %v848_v55 = vadd.f32 %v832_v22, %v664_v54 }
  0xe9   : > { %v666_v58 = vpop.f32.mrf.mxu1  ;;  %v3484_v59 = vpop.f32.mrf.mxu0 }
  0xea   : > { %v842_v45 = vpop.f32.mrf.mxu2  ;;  %v667_v42 = vadd.f32 %v666_v58, %v565_v15  ;;  %v3494_v46 = vpop.f32.mrf.mxu3 }
  0xec   : > { %v3488_v18 = vadd.f32 %v835_v31, %v667_v42 }
  0xf1   : > { %v668_v63 = vpop.f32.mrf.mxu1  ;;  %v3490_v60 = vpop.f32.mrf.mxu0 }
  0xf2   : > { %v1521_v62 = vpop.f32.mrf.mxu2  ;;  %v669_v44 = vadd.f32 %v668_v63, %v567_v19  ;;  %v1767_v11 = vpop.f32.mrf.mxu3  ;;  %v984_v19 = vadd.f32 %v965_v36, %v846_v38 }
  0xf4   : > { %v3492_v0 = vadd.f32 %v837_v41, %v669_v44  ;;  %v1982_v41 = vld [vmem:[%s3508_s21 + $0x8] sm:$0xff]  ;;  %v1983_v44 = vld [vmem:[%s3508_s21 + $0x10] sm:$0xff] }
  0xf9   : > { %v671_v3 = vpop.f32.mrf.mxu1  ;;  %v3496_v4 = vpop.f32.mrf.mxu0 }
  0xfa   : > { %v1523_v2 = vpop.f32.mrf.mxu2  ;;  %v672_v6 = vadd.f32 %v671_v3, %v570_v32  ;;  %v1769_v14 = vpop.f32.mrf.mxu3  ;;  %v1230_v32 = vadd.f32 %v1211_v35, %v984_v19 }
  0xfc   : > { %v3498_v33 = vadd.f32 %v840_v51, %v672_v6  ;;  %v986_v51 = vadd.f32 %v3476_v12, %v848_v55  ;;  %v987_v12 = vadd.f32 %v3478_v40, %v3488_v18  ;;  %v988_v40 = vadd.f32 %v3480_v52, %v3492_v0 }
  0xfe   : > { %v1232_v43 = vadd.f32 %v3482_v49, %v986_v51  ;;  %v1233_v49 = vadd.f32 %v3484_v59, %v987_v12  ;;  %v989_v52 = vadd.f32 %v3486_v61, %v3498_v33 }
 0x101   : > { %v673_v13 = vpop.f32.mrf.mxu1  ;;  %v3500_v29 = vpop.f32.mrf.mxu0 }
 0x102   : > { %v1526_v9 = vpop.f32.mrf.mxu2  ;;  %v674_v47 = vadd.f32 %v673_v13, %v572_v26  ;;  %v1772_v8 = vpop.f32.mrf.mxu3 }
 0x104   : > { %v3502_v5 = vadd.f32 %v842_v45, %v674_v47 }
 0x106   : > { %v990_v61 = vadd.f32 %v3494_v46, %v3502_v5 }
 0x109   : > { %v1383_v15 = vpop.f32.mrf.mxu1  ;;  %v1941_v16 = vpop.f32.mrf.mxu0 }
 0x10a   : > { %v1403_v17 = vadd.f32 %v1383_v15, %v1229_v28  ;;  %v1528_v1 = vpop.f32.mrf.mxu2  ;;  %v1774_v45 = vpop.f32.mrf.mxu3  ;;  %v1984_v15 = vld [vmem:[%s3508_s21 + $0x18] sm:$0xff] }
 0x10c   : > { %v1541_v21 = vadd.f32 %v1521_v62, %v1403_v17 }
 0x10e   : > { %v1787_v24 = vadd.f32 %v1767_v11, %v1541_v21 }
 0x110   : > { %v1961_v57 = vadd.f32 %v1941_v16, %v1787_v24 }
 0x111   : > { %v1385_v26 = vpop.f32.mrf.mxu1  ;;  %v1943_v30 = vpop.f32.mrf.mxu0 }
 0x112   : > { %v1973_v36 = vadd.f32 %v3513_v10, %v1961_v57  ;;  %v1404_v22 = vadd.f32 %v1385_v26, %v1230_v32  ;;  %v1531_v31 = vpop.f32.mrf.mxu2  ;;  %v1777_v39 = vpop.f32.mrf.mxu3  ;;  %v1234_v57 = vadd.f32 %v3490_v60, %v988_v40  ;;  %v1985_v26 = vld [vmem:[%s3508_s21 + $0x20] sm:$0xff]  ;;  %v1235_v60 = vadd.f32 %v3496_v4, %v989_v52 }
 0x113   : > { %v1236_v4 = vadd.f32 %v3500_v29, %v990_v61 }
 0x114   : > { %v1989_v20 = vadd.f32 %v1981_v25, %v1973_v36  ;;  %v1542_v56 = vadd.f32 %v1523_v2, %v1404_v22 }
 0x116   : > { %v1997_v34 = vmax.f32 %v1989_v20, 0.0  ;;  %v1788_v35 = vadd.f32 %v1769_v14, %v1542_v56 }
 0x118   : > { %2005 = vst [vmem:[%s3521_s25] sm:$0xff] %v1997_v34  ;;  %v1962_v38 = vadd.f32 %v1943_v30, %v1788_v35  ;;  %v1986_v35 = vld [vmem:[%s3508_s21 + $0x28] sm:$0xff] }
 0x119   : > { %v1388_v27 = vpop.f32.mrf.mxu1  ;;  %v1946_v48 = vpop.f32.mrf.mxu0 }
 0x11a   : > { %v1974_v7 = vadd.f32 %v3513_v10, %v1962_v38  ;;  %v1405_v50 = vadd.f32 %v1388_v27, %v1231_v37  ;;  %v1533_v62 = vpop.f32.mrf.mxu2  ;;  %v1779_v25 = vpop.f32.mrf.mxu3 }
 0x11c   : > { %v1990_v53 = vadd.f32 %v1982_v41, %v1974_v7  ;;  %v1543_v54 = vadd.f32 %v1526_v9, %v1405_v50 }
 0x11e   : > { %v1998_v58 = vmax.f32 %v1990_v53, 0.0  ;;  %v1789_v42 = vadd.f32 %v1772_v8, %v1543_v54  ;;  %v1987_v54 = vld [vmem:[%s3508_s21 + $0x30] sm:$0xff] }
 0x120   : > { %2006 = vst [vmem:[%s3521_s25 + $0x8] sm:$0xff] %v1998_v58  ;;  %v1963_v63 = vadd.f32 %v1946_v48, %v1789_v42 }
 0x121   : > { %v1390_v2 = vpop.f32.mrf.mxu1  ;;  %v1948_v3 = vpop.f32.mrf.mxu0 }
 0x122   : > { %v1975_v6 = vadd.f32 %v3513_v10, %v1963_v63  ;;  %v1406_v11 = vadd.f32 %v1390_v2, %v1232_v43  ;;  %v1536_v14 = vpop.f32.mrf.mxu2  ;;  %v1782_v27 = vpop.f32.mrf.mxu3 }
 0x124   : > { %v1991_v55 = vadd.f32 %v1983_v44, %v1975_v6  ;;  %v1544_v9 = vadd.f32 %v1528_v1, %v1406_v11 }
 0x126   : > { %v1999_v13 = vmax.f32 %v1991_v55, 0.0  ;;  %v1790_v47 = vadd.f32 %v1774_v45, %v1544_v9 }
 0x128   : > { %2007 = vst [vmem:[%s3521_s25 + $0x10] sm:$0xff] %v1999_v13  ;;  %v1964_v28 = vadd.f32 %v1948_v3, %v1790_v47  ;;  %v1988_v3 = vld [vmem:[%s3508_s21 + $0x38] sm:$0xff] }
 0x129   : > { %v1393_v16 = vpop.f32.mrf.mxu1  ;;  %v1951_v21 = vpop.f32.mrf.mxu0 }
 0x12a   : > { %v1976_v17 = vadd.f32 %v3513_v10, %v1964_v28  ;;  %v1407_v19 = vadd.f32 %v1393_v16, %v1233_v49  ;;  %v1538_v8 = vpop.f32.mrf.mxu2  ;;  %v1784_v46 = vpop.f32.mrf.mxu3 }
 0x12c   : > { %v1992_v18 = vadd.f32 %v1984_v15, %v1976_v17  ;;  %v1545_v1 = vadd.f32 %v1531_v31, %v1407_v19 }
 0x12e   : > { %v2000_v24 = vmax.f32 %v1992_v18, 0.0  ;;  %v1791_v32 = vadd.f32 %v1777_v39, %v1545_v1 }
 0x130   : > { %2008 = vst [vmem:[%s3521_s25 + $0x18] sm:$0xff] %v2000_v24  ;;  %v1965_v59 = vadd.f32 %v1951_v21, %v1791_v32 }
 0x131   : > { %v1395_v30 = vpop.f32.mrf.mxu1  ;;  %v1953_v20 = vpop.f32.mrf.mxu0 }
 0x132   : > { %v1977_v36 = vadd.f32 %v3513_v10, %v1965_v59  ;;  %v1408_v22 = vadd.f32 %v1395_v30, %v1234_v57  ;;  %v1956_v7 = vpop.f32.mrf.mxu2 }
 0x134   : > { %v1993_v0 = vadd.f32 %v1985_v26, %v1977_v36  ;;  %v1546_v23 = vadd.f32 %v1533_v62, %v1408_v22 }
 0x136   : > { %v2001_v56 = vmax.f32 %v1993_v0, 0.0  ;;  %v1792_v31 = vadd.f32 %v1779_v25, %v1546_v23 }
 0x138   : > { %2009 = vst [vmem:[%s3521_s25 + $0x20] sm:$0xff] %v2001_v56  ;;  %v1966_v34 = vadd.f32 %v1953_v20, %v1792_v31 }
 0x139   : > { %v1398_v37 = vpop.f32.mrf.mxu1 }
 0x13a   : > { %v1978_v38 = vadd.f32 %v3513_v10, %v1966_v34  ;;  %v1409_v41 = vadd.f32 %v1398_v37, %v1235_v60  ;;  %v1958_v44 = vpop.f32.mrf.mxu2 }
 0x13c   : > { %v1994_v33 = vadd.f32 %v1986_v35, %v1978_v38  ;;  %v1547_v48 = vadd.f32 %v1536_v14, %v1409_v41 }
 0x13e   : > { %v2002_v50 = vmax.f32 %v1994_v33, 0.0  ;;  %v1793_v51 = vadd.f32 %v1782_v27, %v1547_v48 }
 0x140   : > { %2010 = vst [vmem:[%s3521_s25 + $0x28] sm:$0xff] %v2002_v50  ;;  %v1967_v53 = vadd.f32 %v1956_v7, %v1793_v51 }
 0x141   : > { %v1400_v45 = vpop.f32.mrf.mxu1 }
 0x142   : > { %v1979_v58 = vadd.f32 %v3513_v10, %v1967_v53  ;;  %v1410_v42 = vadd.f32 %v1400_v45, %v1236_v4 }
 0x144   : > { %v1995_v62 = vadd.f32 %v1987_v54, %v1979_v58  ;;  %v1548_v43 = vadd.f32 %v1538_v8, %v1410_v42 }
 0x146   : > { %v2003_v5 = vmax.f32 %v1995_v62, 0.0  ;;  %v1794_v63 = vadd.f32 %v1784_v46, %v1548_v43 }
 0x148   : > { %2011 = vst [vmem:[%s3521_s25 + $0x30] sm:$0xff] %v2003_v5  ;;  %v1968_v2 = vadd.f32 %v1958_v44, %v1794_v63 }
 0x14a   : > { %v1980_v6 = vadd.f32 %v3513_v10, %v1968_v2 }
 0x14c   : > { %v1996_v29 = vadd.f32 %v1988_v3, %v1980_v6 }
 0x14e   : > { %v2004_v11 = vmax.f32 %v1996_v29, 0.0 }
 0x150   : > { %2012 = vst [vmem:[%s3521_s25 + $0x38] sm:$0xff] %v2004_v11 }
 0x151 PF: > { %s14_s17 = sadd.s32 1, %s2881_s17   ;;  %s3577_s15 = smov %s2877_s16 }
 0x152   : > { %p11_p5 = scmp.ge.s32.totalorder %s14_s17, 4   ;;  %s3578_s16 = smov %s3580_s18 }
 0x154   :  { %13 = sbr.rel (!%p11_p5) target bundleno = 2 (0x2), region = 86 }

</bundles_post_ra>
